<compile_context>
chip_gen: v5e
topology: v5e:2x2
jax: 0.10.0
libtpu: 0.0.40
codegen_flags: <defaults>
</compile_context>

<pallas_src>
import jax
import jax.numpy as jnp
from jax.experimental import pallas as pl
from jax.experimental.pallas import tpu as pltpu

HIDDEN_DIM = 64
INPUT_DIM = 13          # len(COLUMNS) + len(RATIOS) + len(INDICATORS) = 7 + 2 + 4
OUTPUT_DIM = 1
TILE_BATCH_MAX = 4096   # rows per grid step (upper cap)


def _round_up(v, m):
    return ((v + m - 1) // m) * m


def _default_pack_width():
    """4 sub-tiles (256 lanes) on v6e/v7x (256x256 MXU); 2 on v5e and older."""
    try:
        kind = jax.devices()[0].device_kind.lower()
    except Exception:
        return 4
    if any(tag in kind for tag in ("v2", "v3", "v4", "v5")):
        return 2
    return 4


def _block_diag(w, pack):
    """Block-diagonal replication: diag(W, W, ..., W) with `pack` copies."""
    din, dout = w.shape
    out = jnp.zeros((pack * din, pack * dout), w.dtype)
    for k in range(pack):
        out = out.at[k * din:(k + 1) * din, k * dout:(k + 1) * dout].set(w)
    return out


def pack_params(params, pack):
    """Pre-pack params (done once at init; total weights are only ~1 MB).

    params: [(W_in, b_in), 7x (W_h, b_h), (W_out, b_out)], W is (in, out), b is (1, out).
    """
    w_in, b_in = params[0]
    hidden = params[1:-1]
    w_out, b_out = params[-1]

    w_in_p = w_in.astype(jnp.bfloat16)                                   # (13, 64)
    b_in_p = b_in.reshape(1, -1).astype(jnp.float32)                     # (1, 64)
    w_hid_p = jnp.stack([_block_diag(w, pack) for w, _ in hidden]
                        ).astype(jnp.bfloat16)                           # (7, 64P, 64P)
    b_hid_p = jnp.stack([jnp.tile(b.reshape(-1), pack) for _, b in hidden]
                        ).astype(jnp.float32)                            # (7, 64P)
    w_out_p = _block_diag(w_out, pack).astype(jnp.bfloat16)              # (64P, P)
    b_out_p = jnp.tile(b_out.reshape(1, -1), (1, pack)).astype(jnp.float32)  # (1, P)
    return (w_in_p, b_in_p, w_hid_p, b_hid_p, w_out_p, b_out_p)


def _make_mlp_kernel(pack, num_hidden):
    def kernel(*refs):
        x_refs = refs[:pack]                                # pack x (TBP, 13) bf16
        (w_in_ref, b_in_ref, w_hid_ref, b_hid_ref,
         w_out_ref, b_out_ref) = refs[pack:pack + 6]
        o_ref = refs[pack + 6]                              # (TBP, pack) f32

        # Input layer, one sub-tile at a time: (TBP,13)@(13,64) fp32 acc, bias+ReLU
        # in fp32, cast to bf16, then concatenate sub-tiles along the lane axis.
        w_in = w_in_ref[...]
        b_in = b_in_ref[...]
        subs = []
        for p in range(pack):
            y = jnp.dot(x_refs[p][...], w_in,
                        preferred_element_type=jnp.float32) + b_in
            subs.append(jnp.maximum(y, 0.0).astype(jnp.bfloat16))
        h = jnp.concatenate(subs, axis=1)                   # (TBP, 64*pack) bf16

        # 7 hidden layers with block-diagonal packed weights (resident in VMEM).
        for l in range(num_hidden):
            y = jnp.dot(h, w_hid_ref[l], preferred_element_type=jnp.float32)
            y = y + b_hid_ref[l:l + 1, :]
            h = jnp.maximum(y, 0.0).astype(jnp.bfloat16)

        # Packed output head: column p holds sub-tile p's logit.
        z = jnp.dot(h, w_out_ref[...],
                    preferred_element_type=jnp.float32) + b_out_ref[...]

        # Numerically stable sigmoid (no overflow for large |z|, exact division).
        e = jnp.exp(-jnp.abs(z))
        r = 1.0 / (1.0 + e)
        o_ref[...] = jnp.where(z >= 0.0, r, e * r)
    return kernel


def dl_forward(x, params, *, tile_batch=TILE_BATCH_MAX, pack=None):
    """x: (B, INPUT_DIM) float32; params: list of (W, b), W (in, out), b (1, out)."""
    B, D = x.shape
    assert D == INPUT_DIM
    if pack is None:
        pack = _default_pack_width()
    num_hidden = len(params) - 2

    # Tile size: big (amortizes per-step overhead + MXU weight reloads), but
    # clamped so the grid has >= 2 steps when B allows (v7x megacore sharding).
    unit = 16 * pack                       # keeps TB/pack a multiple of 16 (bf16 sublanes)
    tb = min(tile_batch, _round_up(max(pl.cdiv(B, 2), 1), unit))
    tb = max(unit, (tb // unit) * unit)
    tbp = tb // pack
    grid = pl.cdiv(B, tb)
    b_pad = grid * tb

    # bf16 x feed (halves the input DMA); pad batch to a whole number of tiles.
    x = x.astype(jnp.bfloat16)
    if b_pad != B:
        x = jnp.concatenate([x, jnp.zeros((b_pad - B, D), x.dtype)], axis=0)

    packed = pack_params(params, pack)

    def const_spec(arr):
        # Whole-array block; same block index every step -> DMA'd once, resident.
        return pl.BlockSpec(arr.shape, lambda i, _r=arr.ndim: (0,) * _r)

    # x is passed `pack` times; each spec picks a different row sub-tile of the
    # same batch tile (no wrapper-side repack pass over x).
    in_specs = [pl.BlockSpec((tbp, D), (lambda i, _p=p: (pack * i + _p, 0)))
                for p in range(pack)]
    in_specs += [const_spec(a) for a in packed]

    out_packed = pl.pallas_call(
        _make_mlp_kernel(pack, num_hidden),
        out_shape=jax.ShapeDtypeStruct((grid * tbp, pack), jnp.float32),
        grid_spec=pltpu.PrefetchScalarGridSpec(
            num_scalar_prefetch=0,
            grid=(grid,),
            in_specs=in_specs,
            out_specs=pl.BlockSpec((tbp, pack), lambda i: (i, 0)),
        ),
        compiler_params=pltpu.CompilerParams(
            dimension_semantics=("parallel",)),
    )(*([x] * pack), *packed)

    # Unpack: step i, row r, column p  <->  global row i*tb + p*tbp + r.
    out = (out_packed.reshape(grid, tbp, pack)
                     .transpose(0, 2, 1)
                     .reshape(b_pad, 1))
    return out[:B]


def init_params(key):
    """Deterministic parameter init (PyTorch nn.Linear-style uniform bounds)."""
    dims = [INPUT_DIM] + [HIDDEN_DIM] * 8 + [OUTPUT_DIM]
    params = []
    for i in range(len(dims) - 1):
        fan_in, fan_out = dims[i], dims[i + 1]
        key, kw, kb = jax.random.split(key, 3)
        bound = 1.0 / jnp.sqrt(fan_in)
        w = jax.random.uniform(kw, (fan_in, fan_out), jnp.float32, -bound, bound)
        b = jax.random.uniform(kb, (1, fan_out), jnp.float32, -bound, bound)
        params.append((w, b))
    return params


def reference_forward(x, params):
    """Pure-JAX reference with the same bf16-input / fp32-accumulate matmuls."""
    h = x
    for w, b in params[:-1]:
        y = jnp.dot(h.astype(jnp.bfloat16), w.astype(jnp.bfloat16),
                    preferred_element_type=jnp.float32) + b
        h = jnp.maximum(y, 0.0)
    w, b = params[-1]
    z = jnp.dot(h.astype(jnp.bfloat16), w.astype(jnp.bfloat16),
                preferred_element_type=jnp.float32) + b
    return jax.nn.sigmoid(z)


if __name__ == "__main__":
    key = jax.random.PRNGKey(0)
    key, kx = jax.random.split(key)
    B = 1000  # non-multiple of the tile: exercises padding + a 2-step grid
    x = jax.random.uniform(kx, (B, INPUT_DIM), jnp.float32)  # MinMax-scaled-like inputs
    params = init_params(key)

    y = jax.block_until_ready(dl_forward(x, params))

    y_ref = reference_forward(x, params)
    assert y.shape == (B, OUTPUT_DIM)
    err = float(jnp.max(jnp.abs(y - y_ref)))
    assert jnp.allclose(y, y_ref, atol=5e-3, rtol=0.0), f"mismatch vs reference: {err}"
    print("KERNEL_OK")
</pallas_src>

<mosaic_0001>
module attributes {stable_mosaic.version = 11 : i64} {
  func.func @kernel(%arg0: i32, %arg1: memref<128x13xbf16, #tpu.memory_space<vmem>>, %arg2: memref<128x13xbf16, #tpu.memory_space<vmem>>, %arg3: memref<128x13xbf16, #tpu.memory_space<vmem>>, %arg4: memref<128x13xbf16, #tpu.memory_space<vmem>>, %arg5: memref<13x64xbf16, #tpu.memory_space<vmem>>, %arg6: memref<1x64xf32, #tpu.memory_space<vmem>>, %arg7: memref<7x256x256xbf16, #tpu.memory_space<vmem>>, %arg8: memref<7x256xf32, #tpu.memory_space<vmem>>, %arg9: memref<256x4xbf16, #tpu.memory_space<vmem>>, %arg10: memref<1x4xf32, #tpu.memory_space<vmem>>, %arg11: memref<128x4xf32, #tpu.memory_space<vmem>>) attributes {dimension_semantics = [#tpu.dimension_semantics<parallel>], iteration_bounds = array<i64: 2>, scalar_prefetch = 0 : i64, scratch_operands = 0 : i64, tpu.core_type = #tpu.core_type<tc>, window_params = [{transform_indices = @transform_0, window_bounds = array<i64: 128, 13>}, {transform_indices = @transform_1, window_bounds = array<i64: 128, 13>}, {transform_indices = @transform_2, window_bounds = array<i64: 128, 13>}, {transform_indices = @transform_3, window_bounds = array<i64: 128, 13>}, {pipeline_mode = #tpu.pipeline_mode<synchronous>, transform_indices = @transform_4, window_bounds = array<i64: 13, 64>}, {pipeline_mode = #tpu.pipeline_mode<synchronous>, transform_indices = @transform_5, window_bounds = array<i64: 1, 64>}, {pipeline_mode = #tpu.pipeline_mode<synchronous>, transform_indices = @transform_6, window_bounds = array<i64: 7, 256, 256>}, {pipeline_mode = #tpu.pipeline_mode<synchronous>, transform_indices = @transform_7, window_bounds = array<i64: 7, 256>}, {pipeline_mode = #tpu.pipeline_mode<synchronous>, transform_indices = @transform_8, window_bounds = array<i64: 256, 4>}, {pipeline_mode = #tpu.pipeline_mode<synchronous>, transform_indices = @transform_9, window_bounds = array<i64: 1, 4>}, {transform_indices = @transform_10, window_bounds = array<i64: 128, 4>}]} {
    %c0 = arith.constant 0 : index
    %c0_0 = arith.constant 0 : index
    %0 = vector.load %arg5[%c0, %c0_0] : memref<13x64xbf16, #tpu.memory_space<vmem>>, vector<13x64xbf16>
    %c0_1 = arith.constant 0 : index
    %c0_2 = arith.constant 0 : index
    %1 = vector.load %arg6[%c0_1, %c0_2] : memref<1x64xf32, #tpu.memory_space<vmem>>, vector<1x64xf32>
    %c0_3 = arith.constant 0 : index
    %c0_4 = arith.constant 0 : index
    %2 = vector.load %arg1[%c0_3, %c0_4] : memref<128x13xbf16, #tpu.memory_space<vmem>>, vector<128x13xbf16>
    %cst = arith.constant dense<0.000000e+00> : vector<128x64xf32>
    %3 = tpu.matmul %2, %0, %cst {dimension_numbers = #tpu.dot_dimension_numbers<[1], [0], [0], [1], [0, 0, 1, 1], [], []>} : vector<128x13xbf16>, vector<13x64xbf16>, vector<128x64xf32> -> vector<128x64xf32>
    %4 = vector.broadcast %1 : vector<1x64xf32> to vector<128x64xf32>
    %5 = arith.addf %3, %4 : vector<128x64xf32>
    %cst_5 = arith.constant 0.000000e+00 : f32
    %6 = vector.broadcast %cst_5 : f32 to vector<128x64xf32>
    %7 = arith.maximumf %5, %6 : vector<128x64xf32>
    %8 = arith.truncf %7 : vector<128x64xf32> to vector<128x64xbf16>
    %c0_6 = arith.constant 0 : index
    %c0_7 = arith.constant 0 : index
    %9 = vector.load %arg2[%c0_6, %c0_7] : memref<128x13xbf16, #tpu.memory_space<vmem>>, vector<128x13xbf16>
    %cst_8 = arith.constant dense<0.000000e+00> : vector<128x64xf32>
    %10 = tpu.matmul %9, %0, %cst_8 {dimension_numbers = #tpu.dot_dimension_numbers<[1], [0], [0], [1], [0, 0, 1, 1], [], []>} : vector<128x13xbf16>, vector<13x64xbf16>, vector<128x64xf32> -> vector<128x64xf32>
    %11 = vector.broadcast %1 : vector<1x64xf32> to vector<128x64xf32>
    %12 = arith.addf %10, %11 : vector<128x64xf32>
    %cst_9 = arith.constant 0.000000e+00 : f32
    %13 = vector.broadcast %cst_9 : f32 to vector<128x64xf32>
    %14 = arith.maximumf %12, %13 : vector<128x64xf32>
    %15 = arith.truncf %14 : vector<128x64xf32> to vector<128x64xbf16>
    %c0_10 = arith.constant 0 : index
    %c0_11 = arith.constant 0 : index
    %16 = vector.load %arg3[%c0_10, %c0_11] : memref<128x13xbf16, #tpu.memory_space<vmem>>, vector<128x13xbf16>
    %cst_12 = arith.constant dense<0.000000e+00> : vector<128x64xf32>
    %17 = tpu.matmul %16, %0, %cst_12 {dimension_numbers = #tpu.dot_dimension_numbers<[1], [0], [0], [1], [0, 0, 1, 1], [], []>} : vector<128x13xbf16>, vector<13x64xbf16>, vector<128x64xf32> -> vector<128x64xf32>
    %18 = vector.broadcast %1 : vector<1x64xf32> to vector<128x64xf32>
    %19 = arith.addf %17, %18 : vector<128x64xf32>
    %cst_13 = arith.constant 0.000000e+00 : f32
    %20 = vector.broadcast %cst_13 : f32 to vector<128x64xf32>
    %21 = arith.maximumf %19, %20 : vector<128x64xf32>
    %22 = arith.truncf %21 : vector<128x64xf32> to vector<128x64xbf16>
    %c0_14 = arith.constant 0 : index
    %c0_15 = arith.constant 0 : index
    %23 = vector.load %arg4[%c0_14, %c0_15] : memref<128x13xbf16, #tpu.memory_space<vmem>>, vector<128x13xbf16>
    %cst_16 = arith.constant dense<0.000000e+00> : vector<128x64xf32>
    %24 = tpu.matmul %23, %0, %cst_16 {dimension_numbers = #tpu.dot_dimension_numbers<[1], [0], [0], [1], [0, 0, 1, 1], [], []>} : vector<128x13xbf16>, vector<13x64xbf16>, vector<128x64xf32> -> vector<128x64xf32>
    %25 = vector.broadcast %1 : vector<1x64xf32> to vector<128x64xf32>
    %26 = arith.addf %24, %25 : vector<128x64xf32>
    %cst_17 = arith.constant 0.000000e+00 : f32
    %27 = vector.broadcast %cst_17 : f32 to vector<128x64xf32>
    %28 = arith.maximumf %26, %27 : vector<128x64xf32>
    %29 = arith.truncf %28 : vector<128x64xf32> to vector<128x64xbf16>
    %30 = tpu.concatenate %8, %15, %22, %29 in 1 : vector<128x64xbf16>, vector<128x64xbf16>, vector<128x64xbf16>, vector<128x64xbf16> -> vector<128x256xbf16>
    %c0_18 = arith.constant 0 : index
    %c0_19 = arith.constant 0 : index
    %c0_20 = arith.constant 0 : index
    %31 = vector.load %arg7[%c0_18, %c0_19, %c0_20] : memref<7x256x256xbf16, #tpu.memory_space<vmem>>, vector<1x256x256xbf16>
    %32 = vector.shape_cast %31 : vector<1x256x256xbf16> to vector<256x256xbf16>
    %cst_21 = arith.constant dense<0.000000e+00> : vector<128x256xf32>
    %33 = tpu.matmul %30, %32, %cst_21 {dimension_numbers = #tpu.dot_dimension_numbers<[1], [0], [0], [1], [0, 0, 1, 1], [], []>} : vector<128x256xbf16>, vector<256x256xbf16>, vector<128x256xf32> -> vector<128x256xf32>
    %c0_22 = arith.constant 0 : index
    %c0_23 = arith.constant 0 : index
    %34 = vector.load %arg8[%c0_22, %c0_23] : memref<7x256xf32, #tpu.memory_space<vmem>>, vector<1x256xf32>
    %35 = vector.broadcast %34 : vector<1x256xf32> to vector<128x256xf32>
    %36 = arith.addf %33, %35 : vector<128x256xf32>
    %cst_24 = arith.constant 0.000000e+00 : f32
    %37 = vector.broadcast %cst_24 : f32 to vector<128x256xf32>
    %38 = arith.maximumf %36, %37 : vector<128x256xf32>
    %39 = arith.truncf %38 : vector<128x256xf32> to vector<128x256xbf16>
    %c1 = arith.constant 1 : index
    %c0_25 = arith.constant 0 : index
    %c0_26 = arith.constant 0 : index
    %40 = vector.load %arg7[%c1, %c0_25, %c0_26] : memref<7x256x256xbf16, #tpu.memory_space<vmem>>, vector<1x256x256xbf16>
    %41 = vector.shape_cast %40 : vector<1x256x256xbf16> to vector<256x256xbf16>
    %cst_27 = arith.constant dense<0.000000e+00> : vector<128x256xf32>
    %42 = tpu.matmul %39, %41, %cst_27 {dimension_numbers = #tpu.dot_dimension_numbers<[1], [0], [0], [1], [0, 0, 1, 1], [], []>} : vector<128x256xbf16>, vector<256x256xbf16>, vector<128x256xf32> -> vector<128x256xf32>
    %c1_28 = arith.constant 1 : index
    %c0_29 = arith.constant 0 : index
    %43 = vector.load %arg8[%c1_28, %c0_29] : memref<7x256xf32, #tpu.memory_space<vmem>>, vector<1x256xf32>
    %44 = vector.broadcast %43 : vector<1x256xf32> to vector<128x256xf32>
    %45 = arith.addf %42, %44 : vector<128x256xf32>
    %cst_30 = arith.constant 0.000000e+00 : f32
    %46 = vector.broadcast %cst_30 : f32 to vector<128x256xf32>
    %47 = arith.maximumf %45, %46 : vector<128x256xf32>
    %48 = arith.truncf %47 : vector<128x256xf32> to vector<128x256xbf16>
    %c2 = arith.constant 2 : index
    %c0_31 = arith.constant 0 : index
    %c0_32 = arith.constant 0 : index
    %49 = vector.load %arg7[%c2, %c0_31, %c0_32] : memref<7x256x256xbf16, #tpu.memory_space<vmem>>, vector<1x256x256xbf16>
    %50 = vector.shape_cast %49 : vector<1x256x256xbf16> to vector<256x256xbf16>
    %cst_33 = arith.constant dense<0.000000e+00> : vector<128x256xf32>
    %51 = tpu.matmul %48, %50, %cst_33 {dimension_numbers = #tpu.dot_dimension_numbers<[1], [0], [0], [1], [0, 0, 1, 1], [], []>} : vector<128x256xbf16>, vector<256x256xbf16>, vector<128x256xf32> -> vector<128x256xf32>
    %c2_34 = arith.constant 2 : index
    %c0_35 = arith.constant 0 : index
    %52 = vector.load %arg8[%c2_34, %c0_35] : memref<7x256xf32, #tpu.memory_space<vmem>>, vector<1x256xf32>
    %53 = vector.broadcast %52 : vector<1x256xf32> to vector<128x256xf32>
    %54 = arith.addf %51, %53 : vector<128x256xf32>
    %cst_36 = arith.constant 0.000000e+00 : f32
    %55 = vector.broadcast %cst_36 : f32 to vector<128x256xf32>
    %56 = arith.maximumf %54, %55 : vector<128x256xf32>
    %57 = arith.truncf %56 : vector<128x256xf32> to vector<128x256xbf16>
    %c3 = arith.constant 3 : index
    %c0_37 = arith.constant 0 : index
    %c0_38 = arith.constant 0 : index
    %58 = vector.load %arg7[%c3, %c0_37, %c0_38] : memref<7x256x256xbf16, #tpu.memory_space<vmem>>, vector<1x256x256xbf16>
    %59 = vector.shape_cast %58 : vector<1x256x256xbf16> to vector<256x256xbf16>
    %cst_39 = arith.constant dense<0.000000e+00> : vector<128x256xf32>
    %60 = tpu.matmul %57, %59, %cst_39 {dimension_numbers = #tpu.dot_dimension_numbers<[1], [0], [0], [1], [0, 0, 1, 1], [], []>} : vector<128x256xbf16>, vector<256x256xbf16>, vector<128x256xf32> -> vector<128x256xf32>
    %c3_40 = arith.constant 3 : index
    %c0_41 = arith.constant 0 : index
    %61 = vector.load %arg8[%c3_40, %c0_41] : memref<7x256xf32, #tpu.memory_space<vmem>>, vector<1x256xf32>
    %62 = vector.broadcast %61 : vector<1x256xf32> to vector<128x256xf32>
    %63 = arith.addf %60, %62 : vector<128x256xf32>
    %cst_42 = arith.constant 0.000000e+00 : f32
    %64 = vector.broadcast %cst_42 : f32 to vector<128x256xf32>
    %65 = arith.maximumf %63, %64 : vector<128x256xf32>
    %66 = arith.truncf %65 : vector<128x256xf32> to vector<128x256xbf16>
    %c4 = arith.constant 4 : index
    %c0_43 = arith.constant 0 : index
    %c0_44 = arith.constant 0 : index
    %67 = vector.load %arg7[%c4, %c0_43, %c0_44] : memref<7x256x256xbf16, #tpu.memory_space<vmem>>, vector<1x256x256xbf16>
    %68 = vector.shape_cast %67 : vector<1x256x256xbf16> to vector<256x256xbf16>
    %cst_45 = arith.constant dense<0.000000e+00> : vector<128x256xf32>
    %69 = tpu.matmul %66, %68, %cst_45 {dimension_numbers = #tpu.dot_dimension_numbers<[1], [0], [0], [1], [0, 0, 1, 1], [], []>} : vector<128x256xbf16>, vector<256x256xbf16>, vector<128x256xf32> -> vector<128x256xf32>
    %c4_46 = arith.constant 4 : index
    %c0_47 = arith.constant 0 : index
    %70 = vector.load %arg8[%c4_46, %c0_47] : memref<7x256xf32, #tpu.memory_space<vmem>>, vector<1x256xf32>
    %71 = vector.broadcast %70 : vector<1x256xf32> to vector<128x256xf32>
    %72 = arith.addf %69, %71 : vector<128x256xf32>
    %cst_48 = arith.constant 0.000000e+00 : f32
    %73 = vector.broadcast %cst_48 : f32 to vector<128x256xf32>
    %74 = arith.maximumf %72, %73 : vector<128x256xf32>
    %75 = arith.truncf %74 : vector<128x256xf32> to vector<128x256xbf16>
    %c5 = arith.constant 5 : index
    %c0_49 = arith.constant 0 : index
    %c0_50 = arith.constant 0 : index
    %76 = vector.load %arg7[%c5, %c0_49, %c0_50] : memref<7x256x256xbf16, #tpu.memory_space<vmem>>, vector<1x256x256xbf16>
    %77 = vector.shape_cast %76 : vector<1x256x256xbf16> to vector<256x256xbf16>
    %cst_51 = arith.constant dense<0.000000e+00> : vector<128x256xf32>
    %78 = tpu.matmul %75, %77, %cst_51 {dimension_numbers = #tpu.dot_dimension_numbers<[1], [0], [0], [1], [0, 0, 1, 1], [], []>} : vector<128x256xbf16>, vector<256x256xbf16>, vector<128x256xf32> -> vector<128x256xf32>
    %c5_52 = arith.constant 5 : index
    %c0_53 = arith.constant 0 : index
    %79 = vector.load %arg8[%c5_52, %c0_53] : memref<7x256xf32, #tpu.memory_space<vmem>>, vector<1x256xf32>
    %80 = vector.broadcast %79 : vector<1x256xf32> to vector<128x256xf32>
    %81 = arith.addf %78, %80 : vector<128x256xf32>
    %cst_54 = arith.constant 0.000000e+00 : f32
    %82 = vector.broadcast %cst_54 : f32 to vector<128x256xf32>
    %83 = arith.maximumf %81, %82 : vector<128x256xf32>
    %84 = arith.truncf %83 : vector<128x256xf32> to vector<128x256xbf16>
    %c6 = arith.constant 6 : index
    %c0_55 = arith.constant 0 : index
    %c0_56 = arith.constant 0 : index
    %85 = vector.load %arg7[%c6, %c0_55, %c0_56] : memref<7x256x256xbf16, #tpu.memory_space<vmem>>, vector<1x256x256xbf16>
    %86 = vector.shape_cast %85 : vector<1x256x256xbf16> to vector<256x256xbf16>
    %cst_57 = arith.constant dense<0.000000e+00> : vector<128x256xf32>
    %87 = tpu.matmul %84, %86, %cst_57 {dimension_numbers = #tpu.dot_dimension_numbers<[1], [0], [0], [1], [0, 0, 1, 1], [], []>} : vector<128x256xbf16>, vector<256x256xbf16>, vector<128x256xf32> -> vector<128x256xf32>
    %c6_58 = arith.constant 6 : index
    %c0_59 = arith.constant 0 : index
    %88 = vector.load %arg8[%c6_58, %c0_59] : memref<7x256xf32, #tpu.memory_space<vmem>>, vector<1x256xf32>
    %89 = vector.broadcast %88 : vector<1x256xf32> to vector<128x256xf32>
    %90 = arith.addf %87, %89 : vector<128x256xf32>
    %cst_60 = arith.constant 0.000000e+00 : f32
    %91 = vector.broadcast %cst_60 : f32 to vector<128x256xf32>
    %92 = arith.maximumf %90, %91 : vector<128x256xf32>
    %93 = arith.truncf %92 : vector<128x256xf32> to vector<128x256xbf16>
    %c0_61 = arith.constant 0 : index
    %c0_62 = arith.constant 0 : index
    %94 = vector.load %arg9[%c0_61, %c0_62] : memref<256x4xbf16, #tpu.memory_space<vmem>>, vector<256x4xbf16>
    %cst_63 = arith.constant dense<0.000000e+00> : vector<128x4xf32>
    %95 = tpu.matmul %93, %94, %cst_63 {dimension_numbers = #tpu.dot_dimension_numbers<[1], [0], [0], [1], [0, 0, 1, 1], [], []>} : vector<128x256xbf16>, vector<256x4xbf16>, vector<128x4xf32> -> vector<128x4xf32>
    %c0_64 = arith.constant 0 : index
    %c0_65 = arith.constant 0 : index
    %96 = vector.load %arg10[%c0_64, %c0_65] : memref<1x4xf32, #tpu.memory_space<vmem>>, vector<1x4xf32>
    %97 = vector.broadcast %96 : vector<1x4xf32> to vector<128x4xf32>
    %98 = arith.addf %95, %97 : vector<128x4xf32>
    %99 = math.absf %98 : vector<128x4xf32>
    %cst_66 = arith.constant 0.000000e+00 : f32
    %100 = vector.broadcast %cst_66 : f32 to vector<128x4xf32>
    %101 = arith.subf %100, %99 : vector<128x4xf32>
    %102 = math.exp %101 : vector<128x4xf32>
    %cst_67 = arith.constant 1.000000e+00 : f32
    %103 = vector.broadcast %cst_67 : f32 to vector<128x4xf32>
    %104 = arith.addf %103, %102 : vector<128x4xf32>
    %cst_68 = arith.constant 1.000000e+00 : f32
    %105 = vector.broadcast %cst_68 : f32 to vector<128x4xf32>
    %106 = arith.divf %105, %104 : vector<128x4xf32>
    %cst_69 = arith.constant 0.000000e+00 : f32
    %107 = vector.broadcast %cst_69 : f32 to vector<128x4xf32>
    %108 = arith.cmpf oge, %98, %107 : vector<128x4xf32>
    %109 = arith.mulf %102, %106 : vector<128x4xf32>
    %110 = arith.select %108, %106, %109 : vector<128x4xi1>, vector<128x4xf32>
    %c0_70 = arith.constant 0 : index
    %c0_71 = arith.constant 0 : index
    %111 = vector.load %arg11[%c0_70, %c0_71] : memref<128x4xf32, #tpu.memory_space<vmem>>, vector<128x4xf32>
    tpu.vector_store %arg11[%c0_70, %c0_71], %110 {strides = array<i32>} : memref<128x4xf32, #tpu.memory_space<vmem>>, vector<128x4xf32>,
    return
  }
  func.func @transform_0(%arg0: i32) -> (i32, i32) {
    %c4_i32 = arith.constant 4 : i32
    %0 = arith.muli %c4_i32, %arg0 : i32
    %c0_i32 = arith.constant 0 : i32
    %1 = arith.addi %0, %c0_i32 : i32
    %c0_i32_0 = arith.constant 0 : i32
    %c0_i32_1 = arith.constant 0 : i32
    return %1, %c0_i32_0 : i32, i32
  }
  func.func @transform_1(%arg0: i32) -> (i32, i32) {
    %c4_i32 = arith.constant 4 : i32
    %0 = arith.muli %c4_i32, %arg0 : i32
    %c1_i32 = arith.constant 1 : i32
    %1 = arith.addi %0, %c1_i32 : i32
    %c0_i32 = arith.constant 0 : i32
    %c0_i32_0 = arith.constant 0 : i32
    return %1, %c0_i32 : i32, i32
  }
  func.func @transform_2(%arg0: i32) -> (i32, i32) {
    %c4_i32 = arith.constant 4 : i32
    %0 = arith.muli %c4_i32, %arg0 : i32
    %c2_i32 = arith.constant 2 : i32
    %1 = arith.addi %0, %c2_i32 : i32
    %c0_i32 = arith.constant 0 : i32
    %c0_i32_0 = arith.constant 0 : i32
    return %1, %c0_i32 : i32, i32
  }
  func.func @transform_3(%arg0: i32) -> (i32, i32) {
    %c4_i32 = arith.constant 4 : i32
    %0 = arith.muli %c4_i32, %arg0 : i32
    %c3_i32 = arith.constant 3 : i32
    %1 = arith.addi %0, %c3_i32 : i32
    %c0_i32 = arith.constant 0 : i32
    %c0_i32_0 = arith.constant 0 : i32
    return %1, %c0_i32 : i32, i32
  }
  func.func @transform_4(%arg0: i32) -> (i32, i32) {
    %c0_i32 = arith.constant 0 : i32
    %c0_i32_0 = arith.constant 0 : i32
    %c0_i32_1 = arith.constant 0 : i32
    return %c0_i32, %c0_i32_0 : i32, i32
  }
  func.func @transform_5(%arg0: i32) -> (i32, i32) {
    %c0_i32 = arith.constant 0 : i32
    %c0_i32_0 = arith.constant 0 : i32
    %c0_i32_1 = arith.constant 0 : i32
    return %c0_i32, %c0_i32_0 : i32, i32
  }
  func.func @transform_6(%arg0: i32) -> (i32, i32, i32) {
    %c0_i32 = arith.constant 0 : i32
    %c0_i32_0 = arith.constant 0 : i32
    %c0_i32_1 = arith.constant 0 : i32
    %c0_i32_2 = arith.constant 0 : i32
    return %c0_i32, %c0_i32_0, %c0_i32_1 : i32, i32, i32
  }
  func.func @transform_7(%arg0: i32) -> (i32, i32) {
    %c0_i32 = arith.constant 0 : i32
    %c0_i32_0 = arith.constant 0 : i32
    %c0_i32_1 = arith.constant 0 : i32
    return %c0_i32, %c0_i32_0 : i32, i32
  }
  func.func @transform_8(%arg0: i32) -> (i32, i32) {
    %c0_i32 = arith.constant 0 : i32
    %c0_i32_0 = arith.constant 0 : i32
    %c0_i32_1 = arith.constant 0 : i32
    return %c0_i32, %c0_i32_0 : i32, i32
  }
  func.func @transform_9(%arg0: i32) -> (i32, i32) {
    %c0_i32 = arith.constant 0 : i32
    %c0_i32_0 = arith.constant 0 : i32
    %c0_i32_1 = arith.constant 0 : i32
    return %c0_i32, %c0_i32_0 : i32, i32
  }
  func.func @transform_10(%arg0: i32) -> (i32, i32) {
    %c0_i32 = arith.constant 0 : i32
    %c0_i32_0 = arith.constant 0 : i32
    return %arg0, %c0_i32 : i32, i32
  }
}

</mosaic_0001>

<bundles_post_ra>
// kernel: tpu_custom_call.1
= control target key start
LH: loop header
LB: loop body
LE: loop exit
PB: predicated region body
PF: predicated region fallthrough
CT: control target
= control target key end

     0   :  { %15 = vsyncpa [#allocation3], 0  ;;  %s6887_s13 = smov 0   ;;  %s7679_s0 = inlined_call_operand.vmem [shape: bf16[1024,13], index: 0, kind: input, shape index: {}]   ;;  %s7680_s1 = inlined_call_operand.vmem [shape: bf16[1024,13], index: 1, kind: input, shape index: {}]   ;;  %s7681_s2 = inlined_call_operand.vmem [shape: bf16[1024,13], index: 2, kind: input, shape index: {}]   ;;  %s7682_s3 = inlined_call_operand.vmem [shape: bf16[1024,13], index: 3, kind: input, shape index: {}]   ;;  %s7683_s4 = inlined_call_operand.vmem [shape: bf16[13,64], index: 4, kind: input, shape index: {}]   ;;  %s7684_s5 = inlined_call_operand.vmem [shape: f32[1,64], index: 5, kind: input, shape index: {}]   ;;  %s7685_s6 = inlined_call_operand.hbm [shape: bf16[7,256,256], index: 6, kind: input, shape index: {}]   ;;  %s7686_s7 = inlined_call_operand.vmem [shape: f32[7,256], index: 7, kind: input, shape index: {}]   ;;  %s7687_s8 = inlined_call_operand.vmem [shape: bf16[256,4], index: 8, kind: input, shape index: {}]   ;;  %s7688_s9 = inlined_call_operand.vmem [shape: f32[1,4], index: 9, kind: input, shape index: {}]   ;;  %s7689_s10 = inlined_call_operand.vmem [shape: f32[256,4], index: 10, kind: output, shape index: {}]  }
   0x1 LB: > { %s313_s16 = sshll.u32 %s7685_s6, 4  ;;  %s6896_s17 = sadd.s32 4294967295, %s6825_s13   ;;  %s6825_s13 = sphi %s6887_s13, %s21_s13   ;;  %s314_s16 = int_to_ptr.hbm [resolvable:$true] %s313_s16 }
   0x2   : > { %p5251_p0 = scmp.ge.s32.totalorder %s6825_s13, 1  ;;  %p296_p1 = scmp.lt.s32.totalorder %s6825_s13, 3 }
   0x3   : > { %p6703_p2 = scmp.eq.s32.totalorder %s6896_s17, 0  ;;  %s6827_s18 = smov [#allocation2]  }
   0x4   : > { %p297_p3 = pnand %p5251_p0, %p296_p1  ;;  %s315_s19 = sshll.u32 %s6827_s18, 4  ;;  %s316_s19 = int_to_ptr.vmem [resolvable:$true] %s315_s19 }
   0x5   : > { %s6828_s20 = smov 128   ;;  %s6829_s21 = smov 8  }
   0x6   : > { %p6699_p4 = pneg %p297_p3  ;;  %390 = sbr.rel (%p297_p3) target bundleno = 1657 (0x679), region = 60 }
   0x8   : > { %p6700_p5 = pnand %p6703_p2, %p6699_p4 }
   0xa   : > { %6702 = dma.hbm_to_vmem [thread:$0]  (!%p6700_p5), %s314_s16, 28672, %s316_s19, [#allocation3], %s6828_s20, %s6828_s20, %s6829_s21  }
   0xb   : > { %6820 = dma.done.wait (%p6703_p2), [#allocation3], 28672  }
   0xc   : > { %6822 = vsyncadd (%p6703_p2), [#allocation3], 4294938624  ;;  %s6902_s22 = sshll.u32 %s6896_s17, 6  ;;  %vm588_vm0 = vcmask 1045504   ;;  %vm589_vm1 = vcmask 1046528   ;;  %v6830_v0 = vmov 65535  }
   0xd   : > { %s6412_s23 = sadd.s32 16, %s6902_s22  ;;  %v590_v1 = vsel %vm588_vm0, 4294967295, %v6830_v0  ;;  %v5304_v2 = vld [vmem:[%s7683_s4] sm:$0xf]  ;;  %v6417_v3 = vld [vmem:[%s7683_s4] sm:$0x70] }
   0xe   : > { %p462_p6 = scmp.lt.s32.totalorder %s6412_s23, 127  ;;  %v591_v4 = vsel %vm589_vm1, %v590_v1, 0  ;;  %v5305_v5 = vor.u32 %v6417_v3, %v5304_v2  ;;  %vm563_vm2 = vcmask 105472   ;;  %p453_p7 = scmp.lt.s32.totalorder %s6902_s22, 127  ;;  %v6965_v26 = vld [vmem:[%s7684_s5] ss:$0 sm:$0xff] }
   0xf   : > { %s6416_s15 = sadd.s32 48, %s6902_s22  ;;  %s6414_s25 = sadd.s32 32, %s6902_s22  ;;  %v6464_v63 = vld [vmem:[#allocation2 + $0x74] sm:$0xf]  ;;  %v5494_v0 = vld [vmem:[#allocation2 + $0x78] sm:$0xf0] }
  0x10   : > { %s7691_s23 = smov (!%p462_p6, %s6412_s23), 127  ;;  %v593_v6 = vand.u32 %v5305_v5, %v591_v4  ;;  %p482_p8 = scmp.lt.s32.totalorder %s6416_s15, 127  ;;  %v6480_v1 = vld [vmem:[#allocation2 + $0xf4] sm:$0xf]  ;;  %v5497_v3 = vor.u32 %v6464_v63, %v5494_v0  ;;  %v5558_v4 = vld [vmem:[#allocation2 + $0xf8] sm:$0xf0] }
  0x11   : > { %s5261_s24 = sshll.u32 %s7691_s23, 2  ;;  %p472_p9 = scmp.lt.s32.totalorder %s6414_s25, 127  ;;  %vm1351_vm3 = vcmask 523264   ;;  %vm5120_vm8 = vcmask 31744  }
  0x12   : > { %s465_s11 = scalar_lea.vmem %s7680_s1, %s5261_s24  ;;  %6694 = vmatpush.bf16.msra.mxu3 %v593_v6  ;;  %763 = vmatpush.bf16.msra.mxu1 %v593_v6  ;;  %s7693_s15 = smov (!%p482_p8, %s6416_s15), 127 }
  0x13   : > { %v6430_v7 = vld [vmem:[%s465_s11 + $0x20] sm:$0xff]  ;;  %6693 = vmatpush.bf16.msra.mxu2 %v593_v6  ;;  %602 = vmatpush.bf16.msra.mxu0 %v593_v6  ;;  %v6431_v9 = vld [vmem:[%s465_s11 + $0x28] sm:$0xff]  ;;  %v6432_v11 = vld [vmem:[%s465_s11 + $0x30] sm:$0xff]  ;;  %s454_s12 = scalar_select %p453_p7, %s6902_s22, 127 }
  0x14   : > { %v6426_v8 = vld [vmem:[%s465_s11] sm:$0xff]  ;;  %v6427_v10 = vld [vmem:[%s465_s11 + $0x8] sm:$0xff]  ;;  %v6428_v12 = vld [vmem:[%s465_s11 + $0x10] sm:$0xff]  ;;  %s5267_s20 = sshll.u32 %s7693_s15, 2  ;;  %s7695_s25 = smov (!%p472_p9, %s6414_s25), 127 }
  0x15   : > { %5350 = vmatmul.msk.bf16.vlgmr.msra.gmra.mxu3 %vm563_vm2, %v6430_v7  ;;  %5346 = vmatmul.msk.bf16.vlgmr.msra.gmra.mxu1 %vm563_vm2, %v6426_v8  ;;  %s5258_s14 = sshll.u32 %s454_s12, 2  ;;  %v6433_v13 = vld [vmem:[%s465_s11 + $0x38] sm:$0xff]  ;;  %s6935_s24 = scalar_lea.vmem %s7682_s3, %s5267_s20 }
  0x16   : > { %1085 = vmatpush.bf16.msrb.mxu3 %v593_v6  ;;  %v6429_v14 = vld [vmem:[%s465_s11 + $0x18] sm:$0xff]  ;;  %s6926_s19 = scalar_lea.vmem %s7679_s0, %s5258_s14  ;;  %v6442_v16 = vld [vmem:[%s6935_s24] sm:$0xff]  ;;  %v6443_v18 = vld [vmem:[%s6935_s24 + $0x8] sm:$0xff]  ;;  %s5264_s26 = sshll.u32 %s7695_s25, 2 }
  0x17   : > { %924 = vmatpush.bf16.msrb.mxu2 %v593_v6  ;;  %v6422_v15 = vld [vmem:[%s6926_s19 + $0x20] sm:$0xff]  ;;  %v6423_v17 = vld [vmem:[%s6926_s19 + $0x28] sm:$0xff]  ;;  %v6424_v19 = vld [vmem:[%s6926_s19 + $0x30] sm:$0xff]  ;;  %s6957_s29 = scalar_lea.vmem %s7681_s2, %s5264_s26  ;;  %s6831_s11 = smov 64   ;;  %v5561_v6 = vor.u32 %v6480_v1, %v5558_v4 }
  0x18   : > { %5310 = vmatmul.msk.bf16.vlgmr.msra.gmra.mxu2 %vm563_vm2, %v6422_v15  ;;  %v6444_v20 = vld [vmem:[%s6935_s24 + $0x10] sm:$0xff]  ;;  %v6425_v21 = vld [vmem:[%s6926_s19 + $0x38] sm:$0xff]  ;;  %v6418_v23 = vld [vmem:[%s6926_s19] sm:$0xff] }
  0x19   : > { %v6445_v22 = vld [vmem:[%s6935_s24 + $0x18] sm:$0xff]  ;;  %5306 = vmatmul.msk.bf16.vlgmr.msra.gmra.mxu0 %vm563_vm2, %v6418_v23  ;;  %v6434_v24 = vld [vmem:[%s6957_s29] sm:$0xff]  ;;  %v6419_v28 = vld [vmem:[%s6926_s19 + $0x8] sm:$0xff] }
  0x1a   : > { %v6446_v25 = vld [vmem:[%s6935_s24 + $0x20] sm:$0xff]  ;;  %v6435_v36 = vld [vmem:[%s6957_s29 + $0x8] sm:$0xff]  ;;  %v6420_v43 = vld [vmem:[%s6926_s19 + $0x10] sm:$0xff]  ;;  %1761 = vmatpush.bf16.msra.mxu3 %v5561_v6 }
  0x1b   : > { %v6447_v40 = vld [vmem:[%s6935_s24 + $0x28] sm:$0xff]  ;;  %v6436_v52 = vld [vmem:[%s6957_s29 + $0x10] sm:$0xff]  ;;  %v6421_v59 = vld [vmem:[%s6926_s19 + $0x18] sm:$0xff]  ;;  %1712 = vmatpush.bf16.msra.mxu2 %v5497_v3 }
  0x1c   : > { %v6448_v56 = vld [vmem:[%s6935_s24 + $0x30] sm:$0xff]  ;;  %v6437_v62 = vld [vmem:[%s6957_s29 + $0x18] sm:$0xff] }
  0x1d   : > { %v6449_v5 = vld [vmem:[%s6935_s24 + $0x38] sm:$0xff] }
  0x25   : > { %5351 = vmatmul.msk.bf16.gmra.mxu3 %vm563_vm2, %v6431_v9  ;;  %5347 = vmatmul.msk.bf16.gmra.mxu1 %vm563_vm2, %v6427_v10 }
  0x28   : > { %5311 = vmatmul.msk.bf16.gmra.mxu2 %vm563_vm2, %v6423_v17  ;;  %v5486_v17 = vld [vmem:[#allocation2 + $0x68] sm:$0xf0] }
  0x29   : > { %5307 = vmatmul.msk.bf16.gmra.mxu0 %vm563_vm2, %v6419_v28 }
  0x35   : > { %5352 = vmatmul.msk.bf16.gmra.mxu3 %vm563_vm2, %v6432_v11  ;;  %5348 = vmatmul.msk.bf16.gmra.mxu1 %vm563_vm2, %v6428_v12 }
  0x38   : > { %5312 = vmatmul.msk.bf16.gmra.mxu2 %vm563_vm2, %v6424_v19 }
  0x39   : > { %5308 = vmatmul.msk.bf16.gmra.mxu0 %vm563_vm2, %v6420_v43 }
  0x45   : > { %5353 = vmatmul.msk.bf16.gmra.mxu3 %vm563_vm2, %v6433_v13  ;;  %5349 = vmatmul.msk.bf16.gmra.mxu1 %vm563_vm2, %v6429_v14  ;;  %v6438_v13 = vld [vmem:[%s6957_s29 + $0x20] sm:$0xff] }
  0x48   : > { %5313 = vmatmul.msk.bf16.gmra.mxu2 %vm563_vm2, %v6425_v21  ;;  %v5550_v21 = vld [vmem:[#allocation2 + $0xe8] sm:$0xf0] }
  0x49   : > { %5309 = vmatmul.msk.bf16.gmra.mxu0 %vm563_vm2, %v6421_v59 }
  0x55   : > { %5426 = vmatmul.msk.bf16.vlgmr.msrb.gmra.mxu3 %vm563_vm2, %v6442_v16  ;;  %v6462_v16 = vld [vmem:[#allocation2 + $0x64] sm:$0xf] }
  0x58   : > { %5386 = vmatmul.msk.bf16.vlgmr.msrb.gmra.mxu2 %vm563_vm2, %v6434_v24 }
  0x65   : > { %5427 = vmatmul.msk.bf16.gmra.mxu3 %vm563_vm2, %v6443_v18  ;;  %v6478_v18 = vld [vmem:[#allocation2 + $0xe4] sm:$0xf] }
  0x68   : > { %5387 = vmatmul.msk.bf16.gmra.mxu2 %vm563_vm2, %v6435_v36 }
  0x75   : > { %5428 = vmatmul.msk.bf16.gmra.mxu3 %vm563_vm2, %v6444_v20  ;;  %v5489_v20 = vor.u32 %v6462_v16, %v5486_v17 }
  0x77   : > { %1713 = vmatpush.bf16.msra.mxu2 %v5489_v20  ;;  %v5534_v20 = vld [vmem:[#allocation2 + $0xc8] sm:$0xf0] }
  0x78   : > { %5388 = vmatmul.msk.bf16.gmra.mxu2 %vm563_vm2, %v6436_v52 }
  0x85   : > { %5429 = vmatmul.msk.bf16.gmra.mxu3 %vm563_vm2, %v6445_v22  ;;  %v5553_v22 = vor.u32 %v6478_v18, %v5550_v21 }
  0x87   : > { %1762 = vmatpush.bf16.msra.mxu3 %v5553_v22 }
  0x88   : > { %5389 = vmatmul.msk.bf16.gmra.mxu2 %vm563_vm2, %v6437_v62 }
  0x92   : > { %v765_v27 = vpop.f32.mrf.mxu1 }
  0x93   : > { %v766_v29 = vadd.f32 %v6965_v26, %v765_v27 }
  0x95   : > { %5430 = vmatmul.msk.bf16.gmra.mxu3 %vm563_vm2, %v6446_v25  ;;  %v805_v30 = vmax.f32 %v766_v29, 0.0 }
  0x97   : > { %v821_v33 = vpack.c.bf16 %v805_v30, %v805_v30 }
  0x98   : > { %v6971_v31 = vpop.f32.mrf.mxu3  ;;  %5390 = vmatmul.msk.bf16.gmra.mxu2 %vm563_vm2, %v6438_v13  ;;  %v5470_v13 = vld [vmem:[#allocation2 + $0x48] sm:$0xf0] }
  0x99   : > { %v1215_v37 = vunpack.c.l.b16 %v821_v33 }
  0x9a   : > { %v767_v32 = vpop.f32.mrf.mxu1 }
  0x9b   : > { %v768_v34 = vadd.f32 %v6965_v26, %v767_v32  ;;  %v624_v27 = vpop.f32.mrf.mxu2 }
  0x9d   : > { %v806_v35 = vmax.f32 %v768_v34, 0.0 }
  0x9f   : > { %v822_v38 = vpack.c.bf16 %v806_v35, %v806_v35  ;;  %v6439_v35 = vld [vmem:[%s6957_s29 + $0x28] sm:$0xff] }
  0xa0   : > { %v6975_v39 = vpop.f32.mrf.mxu3 }
  0xa1   : > { %v1216_v41 = vunpack.c.l.b16 %v822_v38  ;;  %v6460_v38 = vld [vmem:[#allocation2 + $0x54] sm:$0xf] }
  0xa2   : > { %v770_v42 = vpop.f32.mrf.mxu1 }
  0xa3   : > { %v771_v44 = vadd.f32 %v6965_v26, %v770_v42  ;;  %v1231_v45 = vpack.c.b16 %v1216_v41, %v1215_v37  ;;  %v626_v32 = vpop.f32.mrf.mxu2  ;;  %v6476_v41 = vld [vmem:[#allocation2 + $0xd4] sm:$0xf] }
  0xa5   : > { %5431 = vmatmul.msk.bf16.gmra.mxu3 %vm563_vm2, %v6447_v40  ;;  %1239 = vrot.lane.b32.xlu0 %v1231_v45, %s6831_s11  ;;  %v807_v46 = vmax.f32 %v771_v44, 0.0  ;;  %v5478_v40 = vld [vmem:[#allocation2 + $0x58] sm:$0xf0] }
  0xa6   : > { %v5481_v43 = vor.u32 %v6460_v38, %v5478_v40  ;;  %v5542_v44 = vld [vmem:[#allocation2 + $0xd8] sm:$0xf0]  ;;  %v5484_v38 = vld [vmem:[#allocation2 + $0x60] sm:$0xf]  ;;  %v6463_v40 = vld [vmem:[#allocation2 + $0x64] sm:$0xf0] }
  0xa7   : > { %v823_v49 = vpack.c.bf16 %v807_v46, %v807_v46  ;;  %v5545_v46 = vor.u32 %v6476_v41, %v5542_v44  ;;  %v5485_v44 = vor.u32 %v6463_v40, %v5484_v38  ;;  %v5454_v38 = vld [vmem:[#allocation2 + $0x28] sm:$0xf0] }
  0xa8   : > { %v6984_v47 = vpop.f32.mrf.mxu3  ;;  %5391 = vmatmul.msk.bf16.gmra.mxu2 %vm563_vm2, %v6439_v35 }
  0xa9   : > { %v1217_v53 = vunpack.c.l.b16 %v823_v49  ;;  %1714 = vmatpush.bf16.msra.mxu2 %v5481_v43  ;;  %1763 = vmatpush.bf16.msra.mxu3 %v5545_v46 }
  0xaa   : > { %v772_v48 = vpop.f32.mrf.mxu1 }
  0xab   : > { %v773_v50 = vadd.f32 %v6965_v26, %v772_v48  ;;  %v629_v52 = vpop.f32.mrf.mxu2 }
  0xad   : > { %v808_v51 = vmax.f32 %v773_v50, 0.0 }
  0xaf   : > { %v824_v54 = vpack.c.bf16 %v808_v51, %v808_v51 }
  0xb0   : > { %v6988_v55 = vpop.f32.mrf.mxu3 }
  0xb1   : > { %v1218_v57 = vunpack.c.l.b16 %v824_v54  ;;  %v627_v54 = vadd.f32 %v6965_v26, %v626_v32 }
  0xb2   : > { %v775_v61 = vpop.f32.mrf.mxu1 }
  0xb3   : > { %v1232_v58 = vpack.c.b16 %v1218_v57, %v1217_v53  ;;  %v776_v8 = vadd.f32 %v6965_v26, %v775_v61  ;;  %v625_v53 = vadd.f32 %v6965_v26, %v624_v27  ;;  %v653_v0 = vmax.f32 %v627_v54, 0.0  ;;  %v5492_v27 = vld [vmem:[#allocation2 + $0x70] sm:$0xf] }
  0xb5   : > { %5432 = vmatmul.msk.bf16.gmra.mxu3 %vm563_vm2, %v6448_v56  ;;  %1241 = vrot.lane.b32.xlu1 %v1232_v58, %s6831_s11  ;;  %v809_v11 = vmax.f32 %v776_v8, 0.0  ;;  %v652_v63 = vmax.f32 %v625_v53, 0.0  ;;  %v631_v8 = vpop.f32.mrf.mxu2  ;;  %v788_v53 = vadd.f32 %v6965_v26, %v6975_v39 }
  0xb7   : > { %v825_v14 = vpack.c.bf16 %v809_v11, %v809_v11  ;;  %v668_v6 = vpack.c.bf16 %v652_v63, %v652_v63 }
  0xb8   : > { %v6996_v60 = vpop.f32.mrf.mxu3 }
  0xb9   : > { %v1219_v24 = vunpack.c.l.b16 %v825_v14  ;;  %v6474_v14 = vld [vmem:[#allocation2 + $0xc4] sm:$0xf]  ;;  %v1183_v16 = vunpack.c.l.b16 %v668_v6 }
  0xba   : > { %v777_v7 = vpop.f32.mrf.mxu1  ;;  %v5537_v22 = vor.u32 %v6474_v14, %v5534_v20 }
  0xbb   : > { %v778_v9 = vadd.f32 %v6965_v26, %v777_v7  ;;  %v669_v7 = vpack.c.bf16 %v653_v0, %v653_v0  ;;  %v5526_v0 = vld [vmem:[#allocation2 + $0xb8] sm:$0xf0] }
  0xbc   : > { %1764 = vmatpush.bf16.msra.mxu3 %v5537_v22 }
  0xbd   : > { %v810_v12 = vmax.f32 %v778_v9, 0.0  ;;  %v1184_v17 = vunpack.c.l.b16 %v669_v7  ;;  %v604_v7 = vpop.f32.mrf.mxu0 }
  0xbf   : > { %v826_v15 = vpack.c.bf16 %v810_v12, %v810_v12  ;;  %v6458_v12 = vld [vmem:[#allocation2 + $0x44] sm:$0xf] }
  0xc0   : > { %v6999_v2 = vpop.f32.mrf.mxu3  ;;  %v5473_v18 = vor.u32 %v6458_v12, %v5470_v13 }
  0xc1   : > { %v1220_v25 = vunpack.c.l.b16 %v826_v15 }
  0xc2   : > { %v780_v23 = vpop.f32.mrf.mxu1  ;;  %1715 = vmatpush.bf16.msra.mxu2 %v5473_v18 }
  0xc3   : > { %v1233_v28 = vpack.c.b16 %v1220_v25, %v1219_v24  ;;  %v781_v36 = vadd.f32 %v6965_v26, %v780_v23  ;;  %v6440_v25 = vld [vmem:[%s6957_s29 + $0x30] sm:$0xff] }
  0xc4   : > { %5392 = vmatmul.msk.bf16.gmra.mxu2 %vm563_vm2, %v6440_v25 }
  0xc5   : > { %5433 = vmatmul.msk.bf16.gmra.mxu3 %vm563_vm2, %v6449_v5  ;;  %1243 = vrot.lane.b32.xlu2 %v1233_v28, %s6831_s11  ;;  %v811_v49 = vmax.f32 %v781_v36, 0.0  ;;  %v6465_v28 = vld [vmem:[#allocation2 + $0x74] sm:$0xf0] }
  0xc6   : > { %v5493_v32 = vor.u32 %v6465_v28, %v5492_v27  ;;  %v605_v28 = vadd.f32 %v6965_v26, %v604_v7 }
  0xc7   : > { %v827_v58 = vpack.c.bf16 %v811_v49, %v811_v49  ;;  %v6461_v49 = vld [vmem:[#allocation2 + $0x54] sm:$0xf0] }
  0xc8   : > { %v7006_v10 = vpop.f32.mrf.mxu3  ;;  %1614 = vmatpush.bf16.msrb.mxu0 %v5493_v32  ;;  %v5452_v32 = vld [vmem:[#allocation2 + $0x20] sm:$0xf] }
  0xc9   : > { %v1221_v4 = vunpack.c.l.b16 %v827_v58  ;;  %v6472_v58 = vld [vmem:[#allocation2 + $0xb4] sm:$0xf] }
  0xca   : > { %v782_v33 = vpop.f32.mrf.mxu1  ;;  %v5529_v39 = vor.u32 %v6472_v58, %v5526_v0  ;;  %v6452_v58 = vld [vmem:[#allocation2 + $0x14] sm:$0xf] }
  0xcb   : > { %v783_v37 = vadd.f32 %v6965_v26, %v782_v33  ;;  %v7028_v33 = vpack.c.b16 %v1184_v17, %v1183_v16  ;;  %v5460_v16 = vld [vmem:[#allocation2 + $0x30] sm:$0xf]  ;;  %v6457_v17 = vld [vmem:[#allocation2 + $0x34] sm:$0xf0] }
  0xcc   : > { %1615 = vmatpush.bf16.msrb.mxu0 %v5485_v44  ;;  %1765 = vmatpush.bf16.msra.mxu3 %v5529_v39 }
  0xcd   : > { %v812_v51 = vmax.f32 %v783_v37, 0.0  ;;  %v634_v37 = vpop.f32.mrf.mxu2 }
  0xcf   : > { %v828_v61 = vpack.c.bf16 %v812_v51, %v812_v51 }
  0xd0   : > { %v7009_v19 = vpop.f32.mrf.mxu3 }
  0xd1   : > { %v1222_v5 = vunpack.c.l.b16 %v828_v61 }
  0xd3   : > { %v1234_v11 = vpack.c.b16 %v1222_v5, %v1221_v4  ;;  %v786_v4 = vadd.f32 %v6965_v26, %v6971_v31  ;;  %v5461_v31 = vor.u32 %v6457_v17, %v5460_v16 }
  0xd5   : > { %v636_v6 = vpop.f32.mrf.mxu2  ;;  %v813_v20 = vmax.f32 %v786_v4, 0.0  ;;  %v5548_v4 = vld [vmem:[#allocation2 + $0xe0] sm:$0xf] }
  0xd6   : > { %v637_v12 = vadd.f32 %v6965_v26, %v636_v6  ;;  %v6470_v6 = vld [vmem:[#allocation2 + $0xa4] sm:$0xf] }
  0xd7   : > { %v829_v40 = vpack.c.bf16 %v813_v20, %v813_v20 }
  0xd8   : > { %v1087_v29 = vpop.f32.mrf.mxu3 }
  0xd9   : > { %v1088_v30 = vadd.f32 %v6965_v26, %v1087_v29  ;;  %v630_v29 = vadd.f32 %v6965_v26, %v629_v52 }
  0xdb   : > { %v1127_v34 = vmax.f32 %v1088_v30, 0.0  ;;  %v632_v30 = vadd.f32 %v6965_v26, %v631_v8 }
  0xdd   : > { %v1143_v48 = vpack.c.bf16 %v1127_v34, %v1127_v34  ;;  %v655_v43 = vmax.f32 %v632_v30, 0.0  ;;  %v6481_v30 = vld [vmem:[#allocation2 + $0xf4] sm:$0xf0] }
  0xdf   : > { %v1311_v57 = vunpack.c.l.b16 %v1143_v48  ;;  %v5476_v48 = vld [vmem:[#allocation2 + $0x50] sm:$0xf]  ;;  %v671_v51 = vpack.c.bf16 %v655_v43, %v655_v43  ;;  %v606_v43 = vpop.f32.mrf.mxu0 }
  0xe0   : > { %v1089_v42 = vpop.f32.mrf.mxu3  ;;  %v5477_v52 = vor.u32 %v6461_v49, %v5476_v48 }
  0xe1   : > { %v1090_v45 = vadd.f32 %v6965_v26, %v1089_v42  ;;  %v654_v42 = vmax.f32 %v630_v29, 0.0  ;;  %v5556_v29 = vld [vmem:[#allocation2 + $0xf0] sm:$0xf] }
  0xe2   : > { %1616 = vmatpush.bf16.msrb.mxu0 %v5477_v52  ;;  %v6453_v52 = vld [vmem:[#allocation2 + $0x14] sm:$0xf0] }
  0xe3   : > { %v1128_v50 = vmax.f32 %v1090_v45, 0.0 }
  0xe5   : > { %v1144_v56 = vpack.c.bf16 %v1128_v50, %v1128_v50  ;;  %v670_v50 = vpack.c.bf16 %v654_v42, %v654_v42  ;;  %v644_v42 = vmax.f32 %v605_v28, 0.0 }
  0xe7   : > { %v1312_v59 = vunpack.c.l.b16 %v1144_v56  ;;  %v6456_v56 = vld [vmem:[#allocation2 + $0x34] sm:$0xf]  ;;  %v1185_v61 = vunpack.c.l.b16 %v670_v50 }
  0xe8   : > { %v1092_v62 = vpop.f32.mrf.mxu3 }
  0xe9   : > { %v1327_v1 = vpack.c.b16 %v1312_v59, %v1311_v57  ;;  %v1093_v3 = vadd.f32 %v6965_v26, %v1092_v62  ;;  %v5462_v57 = vld [vmem:[#allocation2 + $0x38] sm:$0xf0]  ;;  %v1186_v62 = vunpack.c.l.b16 %v671_v51  ;;  %v5444_v51 = vld [vmem:[#allocation2 + $0x10] sm:$0xf] }
  0xea   : > { %v5465_v63 = vor.u32 %v6456_v56, %v5462_v57  ;;  %v5445_v57 = vor.u32 %v6453_v52, %v5444_v51 }
  0xeb   : > { %1335 = vrot.lane.b32.xlu0 %v1327_v1, %s6831_s11  ;;  %v1129_v9 = vmax.f32 %v1093_v3, 0.0  ;;  %v5468_v1 = vld [vmem:[#allocation2 + $0x40] sm:$0xf]  ;;  %v6459_v3 = vld [vmem:[#allocation2 + $0x44] sm:$0xf0]  ;;  %v7041_v18 = vpack.c.b16 %v1186_v62, %v1185_v61  ;;  %v1223_v61 = vunpack.c.l.b16 %v829_v40 }
  0xec   : > { %v5469_v8 = vor.u32 %v6459_v3, %v5468_v1  ;;  %1716 = vmatpush.bf16.msra.mxu2 %v5465_v63 }
  0xed   : > { %v1145_v23 = vpack.c.bf16 %v1129_v9, %v1129_v9  ;;  %v814_v9 = vmax.f32 %v788_v53, 0.0 }
  0xee   : > { %1617 = vmatpush.bf16.msrb.mxu0 %v5469_v8 }
  0xef   : > { %v1313_v35 = vunpack.c.l.b16 %v1145_v23  ;;  %v657_v23 = vmax.f32 %v637_v12, 0.0  ;;  %v5518_v12 = vld [vmem:[#allocation2 + $0xa8] sm:$0xf0] }
  0xf0   : > { %v1094_v15 = vpop.f32.mrf.mxu3  ;;  %v5521_v17 = vor.u32 %v6470_v6, %v5518_v12  ;;  %v798_v6 = vadd.f32 %v6965_v26, %v6999_v2 }
  0xf1   : > { %v1095_v21 = vadd.f32 %v6965_v26, %v1094_v15  ;;  %v6441_v15 = vld [vmem:[%s6957_s29 + $0x38] sm:$0xff]  ;;  %v673_v53 = vpack.c.bf16 %v657_v23, %v657_v23  ;;  %v7051_v23 = vpop.f32.mrf.mxu2  ;;  %s5268_s29 = sshll.u32 %s6896_s17, 4 }
  0xf2   : > { %5393 = vmatmul.msk.bf16.gmra.mxu2 %vm563_vm2, %v6441_v15  ;;  %1618 = vmatpush.bf16.msrb.mxu0 %v5461_v31  ;;  %v793_v15 = vadd.f32 %v6965_v26, %v6988_v55  ;;  %v609_v31 = vpop.f32.mrf.mxu0  ;;  %p490_p10 = scmp.lt.s32.totalorder %s5268_s29, 31 }
  0xf3   : > { %v1130_v24 = vmax.f32 %v1095_v21, 0.0  ;;  %1245 = vrot.lane.b32.xlu0 %v1234_v11, %s6831_s11  ;;  %v635_v11 = vadd.f32 %v6965_v26, %v634_v37  ;;  %v6454_v37 = vld [vmem:[#allocation2 + $0x24] sm:$0xf]  ;;  %v1188_v7 = vunpack.c.l.b16 %v673_v53  ;;  %1766 = vmatpush.bf16.msra.mxu3 %v5521_v17 }
  0xf4   : > { %v5457_v48 = vor.u32 %v6454_v37, %v5454_v38  ;;  %v610_v37 = vadd.f32 %v6965_v26, %v609_v31  ;;  %v5540_v38 = vld [vmem:[#allocation2 + $0xd0] sm:$0xf]  ;;  %s7697_s29 = smov (!%p490_p10, %s5268_s29), 31 }
  0xf5   : > { %v1146_v34 = vpack.c.bf16 %v1130_v24, %v1130_v24  ;;  %v656_v22 = vmax.f32 %v635_v11, 0.0  ;;  %v830_v24 = vpack.c.bf16 %v814_v9, %v814_v9  ;;  %s5269_s17 = sshll.u32 %s7697_s29, 3 }
  0xf6   : > { %1717 = vmatpush.bf16.msra.mxu2 %v5457_v48 }
  0xf7   : > { %v1314_v36 = vunpack.c.l.b16 %v1146_v34  ;;  %v1224_v49 = vunpack.c.l.b16 %v830_v24  ;;  %v672_v50 = vpack.c.bf16 %v656_v22, %v656_v22  ;;  %v5438_v22 = vld [vmem:[#allocation2 + $0x8] sm:$0xf0] }
  0xf8   : > { %v1097_v41 = vpop.f32.mrf.mxu3 }
  0xf9   : > { %v1328_v45 = vpack.c.b16 %v1314_v36, %v1313_v35  ;;  %v1098_v46 = vadd.f32 %v6965_v26, %v1097_v41  ;;  %v5557_v35 = vor.u32 %v6481_v30, %v5556_v29  ;;  %v6455_v36 = vld [vmem:[#allocation2 + $0x24] sm:$0xf0]  ;;  %v1235_v1 = vpack.c.b16 %v1224_v49, %v1223_v61  ;;  %v7063_v52 = vpop.f32.mrf.mxu2  ;;  %v5532_v61 = vld [vmem:[#allocation2 + $0xc0] sm:$0xf] }
  0xfa   : > { %v1187_v3 = vunpack.c.l.b16 %v672_v50  ;;  %v816_v30 = vmax.f32 %v793_v15, 0.0  ;;  %v611_v48 = vpop.f32.mrf.mxu0  ;;  %v818_v15 = vmax.f32 %v798_v6, 0.0  ;;  %v6469_v6 = vld [vmem:[#allocation2 + $0x94] sm:$0xf0] }
  0xfb   : > { %1337 = vrot.lane.b32.xlu1 %v1328_v45, %s6831_s11  ;;  %v1131_v54 = vmax.f32 %v1098_v46, 0.0  ;;  %1663 = vmatpush.bf16.msrb.mxu1 %v5557_v35  ;;  %v607_v45 = vadd.f32 %v6965_v26, %v606_v43  ;;  %v5453_v46 = vor.u32 %v6455_v36, %v5452_v32  ;;  %v612_v50 = vadd.f32 %v6965_v26, %v611_v48  ;;  %v6466_v48 = vld [vmem:[#allocation2 + $0x84] sm:$0xf] }
  0xfc   : > { %v7056_v29 = vpack.c.b16 %v1188_v7, %v1187_v3 }
  0xfd   : > { %v1147_v13 = vpack.c.bf16 %v1131_v54, %v1131_v54  ;;  %v660_v54 = vpack.c.bf16 %v644_v42, %v644_v42  ;;  %v645_v56 = vmax.f32 %v607_v45, 0.0  ;;  %1619 = vmatpush.bf16.msrb.mxu0 %v5453_v46  ;;  %v646_v46 = vmax.f32 %v610_v37, 0.0 }
  0xff   : > { %v1315_v25 = vunpack.c.l.b16 %v1147_v13  ;;  %v661_v0 = vpack.c.bf16 %v645_v56, %v645_v56  ;;  %v1175_v8 = vunpack.c.l.b16 %v660_v54  ;;  %v5436_v13 = vld [vmem:[#allocation2] sm:$0xf]  ;;  %v662_v53 = vpack.c.bf16 %v646_v46, %v646_v46  ;;  %v6471_v46 = vld [vmem:[#allocation2 + $0xa4] sm:$0xf0] }
 0x100   : > { %v1099_v59 = vpop.f32.mrf.mxu3  ;;  %v647_v54 = vmax.f32 %v612_v50, 0.0 }
 0x101   : > { %v1100_v5 = vadd.f32 %v6965_v26, %v1099_v59  ;;  %v5446_v59 = vld [vmem:[#allocation2 + $0x18] sm:$0xf0]  ;;  %v1176_v9 = vunpack.c.l.b16 %v661_v0  ;;  %1620 = vmatpush.bf16.msrb.mxu0 %v5445_v57  ;;  %v7071_v17 = vpop.f32.mrf.mxu2 }
 0x102   : > { %v5449_v62 = vor.u32 %v6452_v58, %v5446_v59  ;;  %v663_v58 = vpack.c.bf16 %v647_v54, %v647_v54  ;;  %v5502_v54 = vld [vmem:[#allocation2 + $0x88] sm:$0xf0] }
 0x103   : > { %v1132_v14 = vmax.f32 %v1100_v5, 0.0  ;;  %v6479_v5 = vld [vmem:[#allocation2 + $0xe4] sm:$0xf0]  ;;  %v1191_v55 = vpack.c.b16 %v1176_v9, %v1175_v8  ;;  %v614_v9 = vpop.f32.mrf.mxu0 }
 0x104   : > { %v5549_v11 = vor.u32 %v6479_v5, %v5548_v4  ;;  %1718 = vmatpush.bf16.msra.mxu2 %v5449_v62  ;;  %v6475_v62 = vld [vmem:[#allocation2 + $0xc4] sm:$0xf0]  ;;  %v1178_v3 = vunpack.c.l.b16 %v663_v58  ;;  %v5510_v5 = vld [vmem:[#allocation2 + $0x98] sm:$0xf0] }
 0x105   : > { %v1148_v21 = vpack.c.bf16 %v1132_v14, %v1132_v14  ;;  %v6451_v14 = vld [vmem:[#allocation2 + $0x4] sm:$0xf0]  ;;  %v5533_v4 = vor.u32 %v6475_v62, %v5532_v61  ;;  %v801_v62 = vadd.f32 %v6965_v26, %v7006_v10 }
 0x106   : > { %v5437_v20 = vor.u32 %v6451_v14, %v5436_v13  ;;  %1664 = vmatpush.bf16.msrb.mxu1 %v5549_v11  ;;  %v796_v11 = vadd.f32 %v6965_v26, %v6996_v60 }
 0x107   : > { %v1316_v27 = vunpack.c.l.b16 %v1148_v21  ;;  %v6450_v21 = vld [vmem:[#allocation2 + $0x4] sm:$0xf] }
 0x108   : > { %v1102_v34 = vpop.f32.mrf.mxu3  ;;  %v5441_v24 = vor.u32 %v6450_v21, %v5438_v22  ;;  %1621 = vmatpush.bf16.msrb.mxu0 %v5437_v20  ;;  %v817_v2 = vmax.f32 %v796_v11, 0.0  ;;  %v615_v21 = vadd.f32 %v6965_v26, %v614_v9  ;;  %v5524_v22 = vld [vmem:[#allocation2 + $0xb0] sm:$0xf]  ;;  %v5500_v11 = vld [vmem:[#allocation2 + $0x80] sm:$0xf] }
 0x109   : > { %v1329_v41 = vpack.c.b16 %v1316_v27, %v1315_v25  ;;  %v1103_v44 = vadd.f32 %v6965_v26, %v1102_v34  ;;  %v791_v25 = vadd.f32 %v6965_v26, %v6984_v47  ;;  %v6477_v47 = vld [vmem:[#allocation2 + $0xd4] sm:$0xf0]  ;;  %v928_v50 = vpop.f32.mrf.mxu2 }
 0x10a   : > { %1719 = vmatpush.bf16.msra.mxu2 %v5441_v24  ;;  %v5541_v42 = vor.u32 %v6477_v47, %v5540_v38  ;;  %v6473_v24 = vld [vmem:[#allocation2 + $0xb4] sm:$0xf0]  ;;  %v833_v37 = vpack.c.bf16 %v817_v2, %v817_v2 }
 0x10b   : > { %1339 = vrot.lane.b32.xlu2 %v1329_v41, %s6831_s11  ;;  %v1133_v63 = vmax.f32 %v1103_v44, 0.0  ;;  %v815_v34 = vmax.f32 %v791_v25, 0.0  ;;  %v832_v44 = vpack.c.bf16 %v816_v30, %v816_v30  ;;  %v5525_v60 = vor.u32 %v6473_v24, %v5524_v22 }
 0x10c   : > { %1665 = vmatpush.bf16.msrb.mxu1 %v5541_v42 }
 0x10d   : > { %v1149_v27 = vpack.c.bf16 %v1133_v63, %v1133_v63  ;;  %v831_v51 = vpack.c.bf16 %v815_v34, %v815_v34  ;;  %v1226_v56 = vunpack.c.l.b16 %v832_v44  ;;  %v6468_v63 = vld [vmem:[#allocation2 + $0x94] sm:$0xf]  ;;  %v616_v34 = vpop.f32.mrf.mxu0  ;;  %v1227_v44 = vunpack.c.l.b16 %v833_v37 }
 0x10e   : > { %v5513_v8 = vor.u32 %v6468_v63, %v5510_v5  ;;  %v5508_v5 = vld [vmem:[#allocation2 + $0x90] sm:$0xf] }
 0x10f   : > { %v1317_v35 = vunpack.c.l.b16 %v1149_v27  ;;  %v1225_v59 = vunpack.c.l.b16 %v831_v51 }
 0x110   : > { %v1104_v39 = vpop.f32.mrf.mxu3  ;;  %1666 = vmatpush.bf16.msrb.mxu1 %v5533_v4  ;;  %1767 = vmatpush.bf16.msra.mxu3 %v5513_v8 }
 0x111   : > { %v1105_v16 = vadd.f32 %v6965_v26, %v1104_v39  ;;  %v1236_v7 = vpack.c.b16 %v1226_v56, %v1225_v59  ;;  %v803_v56 = vadd.f32 %v6965_v26, %v7009_v19  ;;  %v5505_v59 = vor.u32 %v6466_v48, %v5502_v54  ;;  %v5623_v48 = vld [vmem:[#allocation2 + $0x178] sm:$0xf0] }
 0x112   : > { %v5509_v19 = vor.u32 %v6469_v6, %v5508_v5  ;;  %v5687_v54 = vld [vmem:[#allocation2 + $0x1f8] sm:$0xf0] }
 0x113   : > { %v1134_v28 = vmax.f32 %v1105_v16, 0.0  ;;  %1247 = vrot.lane.b32.xlu2 %v1235_v1, %s6831_s11  ;;  %v1177_v1 = vunpack.c.l.b16 %v662_v53 }
 0x114   : > { %1667 = vmatpush.bf16.msrb.mxu1 %v5525_v60  ;;  %1768 = vmatpush.bf16.msra.mxu3 %v5505_v59  ;;  %v6513_v59 = vld [vmem:[#allocation2 + $0x1f4] sm:$0xf0] }
 0x115   : > { %v1150_v32 = vpack.c.bf16 %v1134_v28, %v1134_v28  ;;  %v1192_v14 = vpack.c.b16 %v1178_v3, %v1177_v1  ;;  %v820_v3 = vmax.f32 %v803_v56, 0.0  ;;  %v5621_v56 = vld [vmem:[#allocation2 + $0x170] sm:$0xf] }
 0x117   : > { %v1318_v36 = vunpack.c.l.b16 %v1150_v32  ;;  %v1240_v40 = vpop.permute.xlu0 %1239  ;;  %v648_v32 = vmax.f32 %v615_v21, 0.0 }
 0x118   : > { %v1107_v41 = vpop.f32.mrf.mxu3  ;;  %v1354_v43 = vsel %vm1351_vm3, %v1191_v55, %v1240_v40  ;;  %v834_v55 = vpack.c.bf16 %v818_v15, %v818_v15 }
 0x119   : > { %v1330_v45 = vpack.c.b16 %v1318_v36, %v1317_v35  ;;  %1622 = vmatmul.bf16.vlgmr.msrb.gmra.mxu0 %v1354_v43  ;;  %1720 = vmatmul.bf16.vlgmr.msra.gmra.mxu2 %v1354_v43  ;;  %v1108_v49 = vadd.f32 %v6965_v26, %v1107_v41  ;;  %v617_v36 = vadd.f32 %v6965_v26, %v616_v34 }
 0x11a   : > { %v664_v38 = vpack.c.bf16 %v648_v32, %v648_v32  ;;  %v1228_v40 = vunpack.c.l.b16 %v834_v55  ;;  %v619_v32 = vpop.f32.mrf.mxu0 }
 0x11b   : > { %1341 = vrot.lane.b32.xlu1 %v1330_v45, %s6831_s11  ;;  %v1135_v57 = vmax.f32 %v1108_v49, 0.0  ;;  %v649_v47 = vmax.f32 %v617_v36, 0.0  ;;  %v5516_v45 = vld [vmem:[#allocation2 + $0xa0] sm:$0xf] }
 0x11c   : > { %v1179_v42 = vunpack.c.l.b16 %v664_v38  ;;  %v5517_v53 = vor.u32 %v6471_v46, %v5516_v45  ;;  %v1237_v58 = vpack.c.b16 %v1228_v40, %v1227_v44  ;;  %v927_v38 = vadd.f32 %v6965_v26, %v7071_v17  ;;  %v6496_v46 = vld [vmem:[#allocation2 + $0x174] sm:$0xf] }
 0x11d   : > { %v1151_v12 = vpack.c.bf16 %v1135_v57, %v1135_v57  ;;  %v665_v43 = vpack.c.bf16 %v649_v47, %v649_v47  ;;  %v929_v47 = vadd.f32 %v6965_v26, %v928_v50 }
 0x11e   : > { %1668 = vmatpush.bf16.msrb.mxu1 %v5517_v53  ;;  %v6512_v53 = vld [vmem:[#allocation2 + $0x1f4] sm:$0xf] }
 0x11f   : > { %v1319_v31 = vunpack.c.l.b16 %v1151_v12  ;;  %v1180_v51 = vunpack.c.l.b16 %v665_v43  ;;  %v1244_v1 = vpop.permute.xlu2 %1243  ;;  %v6467_v12 = vld [vmem:[#allocation2 + $0x84] sm:$0xf0]  ;;  %v967_v43 = vmax.f32 %v929_v47, 0.0  ;;  %v5690_v50 = vor.u32 %v6512_v53, %v5687_v54 }
 0x120   : > { %v1109_v0 = vpop.f32.mrf.mxu3  ;;  %v5501_v10 = vor.u32 %v6467_v12, %v5500_v11 }
 0x121   : > { %v1110_v39 = vadd.f32 %v6965_v26, %v1109_v0  ;;  %v1193_v61 = vpack.c.b16 %v1180_v51, %v1179_v42  ;;  %v5626_v51 = vor.u32 %v6496_v46, %v5623_v48  ;;  %2205 = vmatpush.bf16.msrb.mxu3 %v5690_v50  ;;  %v983_v5 = vpack.c.bf16 %v967_v43, %v967_v43 }
 0x122   : > { %1669 = vmatpush.bf16.msrb.mxu1 %v5509_v19  ;;  %v621_v45 = vpop.f32.mrf.mxu0 }
 0x123   : > { %v1136_v13 = vmax.f32 %v1110_v39, 0.0  ;;  %1249 = vrot.lane.b32.xlu1 %v1236_v7, %s6831_s11  ;;  %v1362_v39 = vsel %vm1351_vm3, %v1193_v61, %v1244_v1  ;;  %v819_v7 = vmax.f32 %v801_v62, 0.0  ;;  %v620_v61 = vadd.f32 %v6965_v26, %v619_v32  ;;  %2156 = vmatpush.bf16.msrb.mxu2 %v5626_v51  ;;  %v6510_v32 = vld [vmem:[#allocation2 + $0x1e4] sm:$0xf] }
 0x124   : > { %v622_v62 = vadd.f32 %v6965_v26, %v621_v45  ;;  %v1272_v11 = vunpack.c.l.b16 %v983_v5  ;;  %v6493_v5 = vld [vmem:[#allocation2 + $0x154] sm:$0xf0] }
 0x125   : > { %v1152_v16 = vpack.c.bf16 %v1136_v13, %v1136_v13  ;;  %v835_v2 = vpack.c.bf16 %v819_v7, %v819_v7  ;;  %v650_v19 = vmax.f32 %v620_v61, 0.0  ;;  %v6492_v61 = vld [vmem:[#allocation2 + $0x154] sm:$0xf] }
 0x126   : > { %1670 = vmatpush.bf16.msrb.mxu1 %v5501_v10 }
 0x127   : > { %v1320_v20 = vunpack.c.l.b16 %v1152_v16  ;;  %v1242_v25 = vpop.permute.xlu1 %1241  ;;  %v7085_v16 = vpop.f32.mrf.mxu2  ;;  %v1229_v21 = vunpack.c.l.b16 %v835_v2  ;;  %v666_v10 = vpack.c.bf16 %v650_v19, %v650_v19 }
 0x128   : > { %v1112_v27 = vpop.f32.mrf.mxu3  ;;  %v1358_v28 = vsel %vm1351_vm3, %v1192_v14, %v1242_v25  ;;  %v836_v14 = vpack.c.bf16 %v820_v3, %v820_v3 }
 0x129   : > { %v1331_v30 = vpack.c.b16 %v1320_v20, %v1319_v31  ;;  %1627 = vmatmul.bf16.gmra.mxu0 %v1358_v28  ;;  %1725 = vmatmul.bf16.gmra.mxu2 %v1358_v28  ;;  %v1113_v35 = vadd.f32 %v6965_v26, %v1112_v27 }
 0x12a   : > { %v1230_v20 = vunpack.c.l.b16 %v836_v14 }
 0x12b   : > { %1343 = vrot.lane.b32.xlu0 %v1331_v30, %s6831_s11  ;;  %v1137_v41 = vmax.f32 %v1113_v35, 0.0 }
 0x12c   : > { %v1238_v27 = vpack.c.b16 %v1230_v20, %v1229_v21  ;;  %v1181_v21 = vunpack.c.l.b16 %v666_v10  ;;  %v7116_v10 = vld [vmem:[%s7684_s5] ss:$0 sm:$0xff] }
 0x12d   : > { %v1153_v63 = vpack.c.bf16 %v1137_v41, %v1137_v41  ;;  %v966_v41 = vmax.f32 %v927_v38, 0.0 }
 0x12f   : > { %v1321_v8 = vunpack.c.l.b16 %v1153_v63  ;;  %v933_v55 = vpop.f32.mrf.mxu2 }
 0x130   : > { %v1114_v49 = vpop.f32.mrf.mxu3  ;;  %v934_v2 = vadd.f32 %v6965_v26, %v933_v55  ;;  %v6495_v55 = vld [vmem:[#allocation2 + $0x164] sm:$0xf0] }
 0x131   : > { %v1115_v57 = vadd.f32 %v6965_v26, %v1114_v49 }
 0x133   : > { %v1138_v0 = vmax.f32 %v1115_v57, 0.0  ;;  %1251 = vrot.lane.b32.xlu0 %v1237_v58, %s6831_s11  ;;  %v6497_v57 = vld [vmem:[#allocation2 + $0x174] sm:$0xf0]  ;;  %v5685_v58 = vld [vmem:[#allocation2 + $0x1f0] sm:$0xf] }
 0x134   : > { %v5622_v63 = vor.u32 %v6497_v57, %v5621_v56 }
 0x135   : > { %v1154_v4 = vpack.c.bf16 %v1138_v0, %v1138_v0  ;;  %v5686_v0 = vor.u32 %v6513_v59, %v5685_v58 }
 0x136   : > { %2058 = vmatpush.bf16.msra.mxu0 %v5622_v63 }
 0x137   : > { %v1322_v9 = vunpack.c.l.b16 %v1154_v4  ;;  %v7096_v42 = vpop.f32.mrf.mxu2  ;;  %v982_v4 = vpack.c.bf16 %v966_v41, %v966_v41  ;;  %2107 = vmatpush.bf16.msra.mxu1 %v5686_v0  ;;  %v6508_v0 = vld [vmem:[#allocation2 + $0x1d4] sm:$0xf] }
 0x138   : > { %v1117_v13 = vpop.f32.mrf.mxu3  ;;  %v937_v53 = vadd.f32 %v6965_v26, %v7096_v42  ;;  %v5669_v42 = vld [vmem:[#allocation2 + $0x1d0] sm:$0xf] }
 0x139   : > { %v1332_v15 = vpack.c.b16 %v1322_v9, %v1321_v8  ;;  %1632 = vmatmul.bf16.gmra.mxu0 %v1362_v39  ;;  %1730 = vmatmul.bf16.gmra.mxu2 %v1362_v39  ;;  %v1118_v31 = vadd.f32 %v6965_v26, %v1117_v13  ;;  %v651_v39 = vmax.f32 %v622_v62, 0.0  ;;  %v1271_v9 = vunpack.c.l.b16 %v982_v4  ;;  %v5607_v62 = vld [vmem:[#allocation2 + $0x158] sm:$0xf0] }
 0x13a   : > { %v970_v57 = vmax.f32 %v937_v53, 0.0  ;;  %v5610_v63 = vor.u32 %v6492_v61, %v5607_v62  ;;  %v5653_v61 = vld [vmem:[#allocation2 + $0x1b0] sm:$0xf]  ;;  %v6505_v62 = vld [vmem:[#allocation2 + $0x1b4] sm:$0xf0] }
 0x13b   : > { %1345 = vrot.lane.b32.xlu2 %v1332_v15, %s6831_s11  ;;  %v1139_v22 = vmax.f32 %v1118_v31, 0.0  ;;  %v667_v14 = vpack.c.bf16 %v651_v39, %v651_v39  ;;  %v932_v15 = vadd.f32 %v6965_v26, %v7085_v16  ;;  %v1287_v31 = vpack.c.b16 %v1272_v11, %v1271_v9  ;;  %v5613_v16 = vld [vmem:[#allocation2 + $0x160] sm:$0xf] }
 0x13d   : > { %v1155_v60 = vpack.c.bf16 %v1139_v22, %v1139_v22  ;;  %v1182_v22 = vunpack.c.l.b16 %v667_v14 }
 0x13f   : > { %v1323_v34 = vunpack.c.l.b16 %v1155_v60  ;;  %v938_v12 = vpop.f32.mrf.mxu2  ;;  %v6494_v60 = vld [vmem:[#allocation2 + $0x164] sm:$0xf]  ;;  %v1194_v47 = vpack.c.b16 %v1182_v22, %v1181_v21 }
 0x140   : > { %v1119_v24 = vpop.f32.mrf.mxu3  ;;  %v939_v54 = vadd.f32 %v6965_v26, %v938_v12  ;;  %v6490_v22 = vld [vmem:[#allocation2 + $0x144] sm:$0xf] }
 0x141   : > { %v1120_v25 = vadd.f32 %v6965_v26, %v1119_v24 }
 0x142   : > { %v971_v58 = vmax.f32 %v939_v54, 0.0 }
 0x143   : > { %v1140_v28 = vmax.f32 %v1120_v25, 0.0  ;;  %1253 = vrot.lane.b32.xlu2 %v1238_v27, %s6831_s11  ;;  %v968_v25 = vmax.f32 %v932_v15, 0.0  ;;  %v969_v27 = vmax.f32 %v934_v2, 0.0 }
 0x144   : > { %v987_v19 = vpack.c.bf16 %v971_v58, %v971_v58  ;;  %v6489_v58 = vld [vmem:[#allocation2 + $0x134] sm:$0xf0] }
 0x145   : > { %v1156_v30 = vpack.c.bf16 %v1140_v28, %v1140_v28  ;;  %v5615_v28 = vld [vmem:[#allocation2 + $0x168] sm:$0xf0]  ;;  %v984_v43 = vpack.c.bf16 %v968_v25, %v968_v25 }
 0x146   : > { %v1276_v11 = vunpack.c.l.b16 %v987_v19 }
 0x147   : > { %v1324_v35 = vunpack.c.l.b16 %v1156_v30  ;;  %v5618_v30 = vor.u32 %v6494_v60, %v5615_v28  ;;  %v941_v38 = vpop.f32.mrf.mxu2  ;;  %v1273_v48 = vunpack.c.l.b16 %v984_v43  ;;  %v5663_v60 = vld [vmem:[#allocation2 + $0x1c8] sm:$0xf0]  ;;  %v5597_v28 = vld [vmem:[#allocation2 + $0x140] sm:$0xf] }
 0x148   : > { %v1122_v36 = vpop.f32.mrf.mxu3  ;;  %v942_v14 = vadd.f32 %v7116_v10, %v941_v38 }
 0x149   : > { %v1333_v37 = vpack.c.b16 %v1324_v35, %v1323_v34  ;;  %v1123_v40 = vadd.f32 %v6965_v26, %v1122_v36  ;;  %v5679_v34 = vld [vmem:[#allocation2 + $0x1e8] sm:$0xf0]  ;;  %v5677_v36 = vld [vmem:[#allocation2 + $0x1e0] sm:$0xf]  ;;  %2157 = vmatpush.bf16.msrb.mxu2 %v5618_v30  ;;  %v6491_v30 = vld [vmem:[#allocation2 + $0x144] sm:$0xf0] }
 0x14a   : > { %v5682_v35 = vor.u32 %v6510_v32, %v5679_v34  ;;  %v5598_v34 = vor.u32 %v6491_v30, %v5597_v28  ;;  %v640_v28 = vadd.f32 %v7116_v10, %v7051_v23  ;;  %v642_v30 = vadd.f32 %v7116_v10, %v7063_v52 }
 0x14b   : > { %1347 = vrot.lane.b32.xlu1 %v1333_v37, %s6831_s11  ;;  %v1141_v44 = vmax.f32 %v1123_v40, 0.0  ;;  %v6511_v37 = vld [vmem:[#allocation2 + $0x1e4] sm:$0xf0]  ;;  %v5614_v40 = vor.u32 %v6495_v55, %v5613_v16  ;;  %v5661_v16 = vld [vmem:[#allocation2 + $0x1c0] sm:$0xf] }
 0x14c   : > { %v5678_v41 = vor.u32 %v6511_v37, %v5677_v36  ;;  %2206 = vmatpush.bf16.msrb.mxu3 %v5682_v35  ;;  %v6507_v35 = vld [vmem:[#allocation2 + $0x1c4] sm:$0xf0] }
 0x14d   : > { %v1157_v1 = vpack.c.bf16 %v1141_v44, %v1141_v44  ;;  %v985_v44 = vpack.c.bf16 %v969_v27, %v969_v27  ;;  %2059 = vmatpush.bf16.msra.mxu0 %v5614_v40  ;;  %2158 = vmatpush.bf16.msrb.mxu2 %v5610_v63  ;;  %v5662_v55 = vor.u32 %v6507_v35, %v5661_v16 }
 0x14e   : > { %2108 = vmatpush.bf16.msra.mxu1 %v5678_v41  ;;  %v5654_v63 = vor.u32 %v6505_v62, %v5653_v61  ;;  %v6501_v61 = vld [vmem:[#allocation2 + $0x194] sm:$0xf0] }
 0x14f   : > { %v1325_v7 = vunpack.c.l.b16 %v1157_v1  ;;  %v943_v56 = vpop.f32.mrf.mxu2  ;;  %v5671_v1 = vld [vmem:[#allocation2 + $0x1d8] sm:$0xf0] }
 0x150   : > { %v1124_v49 = vpop.f32.mrf.mxu3  ;;  %v5674_v4 = vor.u32 %v6508_v0, %v5671_v1  ;;  %v944_v15 = vadd.f32 %v7116_v10, %v943_v56 }
 0x151   : > { %v1125_v17 = vadd.f32 %v6965_v26, %v1124_v49  ;;  %v1274_v49 = vunpack.c.l.b16 %v985_v44  ;;  %v986_v26 = vpack.c.bf16 %v970_v57, %v970_v57  ;;  %v5589_v57 = vld [vmem:[#allocation2 + $0x130] sm:$0xf] }
 0x152   : > { %2207 = vmatpush.bf16.msrb.mxu3 %v5674_v4 }
 0x153   : > { %v1142_v3 = vmax.f32 %v1125_v17, 0.0  ;;  %v1288_v17 = vpack.c.b16 %v1274_v49, %v1273_v48  ;;  %v1275_v9 = vunpack.c.l.b16 %v986_v26  ;;  %v6488_v48 = vld [vmem:[#allocation2 + $0x134] sm:$0xf]  ;;  %v5591_v49 = vld [vmem:[#allocation2 + $0x138] sm:$0xf0] }
 0x154   : > { %v5594_v56 = vor.u32 %v6488_v48, %v5591_v49  ;;  %v6500_v48 = vld [vmem:[#allocation2 + $0x194] sm:$0xf] }
 0x155   : > { %v1158_v6 = vpack.c.bf16 %v1142_v3, %v1142_v3  ;;  %v5605_v3 = vld [vmem:[#allocation2 + $0x150] sm:$0xf]  ;;  %v1289_v2 = vpack.c.b16 %v1276_v11, %v1275_v9 }
 0x156   : > { %v5606_v39 = vor.u32 %v6493_v5, %v5605_v3 }
 0x157   : > { %v1326_v8 = vunpack.c.l.b16 %v1158_v6  ;;  %v6509_v6 = vld [vmem:[#allocation2 + $0x1d4] sm:$0xf0]  ;;  %v946_v12 = vpop.f32.mrf.mxu2 }
 0x158   : > { %2060 = vmatpush.bf16.msra.mxu0 %v5606_v39  ;;  %v947_v41 = vadd.f32 %v7116_v10, %v946_v12 }
 0x159   : > { %v1334_v13 = vpack.c.b16 %v1326_v8, %v1325_v7  ;;  %v5670_v7 = vor.u32 %v6509_v6, %v5669_v42 }
 0x15a   : > { %v974_v53 = vmax.f32 %v947_v41, 0.0 }
 0x15b   : > { %1349 = vrot.lane.b32.xlu0 %v1334_v13, %s6831_s11  ;;  %2109 = vmatpush.bf16.msra.mxu1 %v5670_v7  ;;  %s7505_s11 = scalar_lea.vmem %s7689_s10, %s5269_s17 }
 0x15c   : > { %2061 = vmatpush.bf16.msra.mxu0 %v5598_v34  ;;  %v990_v0 = vpack.c.bf16 %v974_v53, %v974_v53 }
 0x15d   : > { %v1336_v20 = vpop.permute.xlu0 %1335 }
 0x15e   : > { %v1386_v24 = vsel %vm1351_vm3, %v1287_v31, %v1336_v20  ;;  %v972_v31 = vmax.f32 %v942_v14, 0.0  ;;  %v973_v20 = vmax.f32 %v944_v15, 0.0  ;;  %v1279_v42 = vunpack.c.l.b16 %v990_v0  ;;  %v5583_v14 = vld [vmem:[#allocation2 + $0x128] sm:$0xf0] }
 0x15f   : > { %1671 = vmatmul.bf16.vlgmr.msrb.gmra.mxu1 %v1386_v24  ;;  %1769 = vmatmul.bf16.vlgmr.msra.gmra.mxu3 %v1386_v24  ;;  %v6506_v24 = vld [vmem:[#allocation2 + $0x1c4] sm:$0xf]  ;;  %v948_v25 = vpop.f32.mrf.mxu2 }
 0x160   : > { %v5666_v32 = vor.u32 %v6506_v24, %v5663_v60  ;;  %v988_v36 = vpack.c.bf16 %v972_v31, %v972_v31  ;;  %v989_v37 = vpack.c.bf16 %v973_v20, %v973_v20  ;;  %2110 = vmatpush.bf16.msra.mxu1 %v5662_v55  ;;  %v949_v43 = vadd.f32 %v7116_v10, %v948_v25  ;;  %v5581_v31 = vld [vmem:[#allocation2 + $0x120] sm:$0xf]  ;;  %v6487_v20 = vld [vmem:[#allocation2 + $0x124] sm:$0xf0] }
 0x161   : > { %v6503_v24 = vld [vmem:[#allocation2 + $0x1a4] sm:$0xf0] }
 0x162   : > { %2208 = vmatpush.bf16.msrb.mxu3 %v5666_v32  ;;  %v1277_v38 = vunpack.c.l.b16 %v988_v36  ;;  %v975_v54 = vmax.f32 %v949_v43, 0.0  ;;  %v658_v36 = vmax.f32 %v640_v28, 0.0  ;;  %v5629_v28 = vld [vmem:[#allocation2 + $0x180] sm:$0xf] }
 0x164   : > { %v991_v1 = vpack.c.bf16 %v975_v54, %v975_v54  ;;  %2111 = vmatpush.bf16.msra.mxu1 %v5654_v63  ;;  %v674_v41 = vpack.c.bf16 %v658_v36, %v658_v36 }
 0x165   : > { %v1246_v45 = vpop.permute.xlu0 %1245  ;;  %v1340_v51 = vpop.permute.xlu2 %1339 }
 0x166   : > { %v1366_v46 = vsel %vm1351_vm3, %v1194_v47, %v1246_v45  ;;  %v1394_v21 = vsel %vm1351_vm3, %v1289_v2, %v1340_v51  ;;  %v1278_v47 = vunpack.c.l.b16 %v989_v37  ;;  %v6504_v51 = vld [vmem:[#allocation2 + $0x1b4] sm:$0xf]  ;;  %v1280_v6 = vunpack.c.l.b16 %v991_v1  ;;  %v5647_v2 = vld [vmem:[#allocation2 + $0x1a8] sm:$0xf0] }
 0x167   : > { %1637 = vmatmul.bf16.gmra.mxu0 %v1366_v46  ;;  %1735 = vmatmul.bf16.gmra.mxu2 %v1366_v46  ;;  %v951_v40 = vpop.f32.mrf.mxu2  ;;  %v659_v37 = vmax.f32 %v642_v30, 0.0  ;;  %v1189_v49 = vunpack.c.l.b16 %v674_v41  ;;  %v6499_v30 = vld [vmem:[#allocation2 + $0x184] sm:$0xf0] }
 0x168   : > { %v1290_v44 = vpack.c.b16 %v1278_v47, %v1277_v38  ;;  %v952_v26 = vadd.f32 %v7116_v10, %v951_v40  ;;  %v1291_v7 = vpack.c.b16 %v1280_v6, %v1279_v42 }
 0x169   : > { %v675_v52 = vpack.c.bf16 %v659_v37, %v659_v37 }
 0x16a   : > { %v976_v9 = vmax.f32 %v952_v26, 0.0 }
 0x16c   : > { %v992_v25 = vpack.c.bf16 %v976_v9, %v976_v9 }
 0x16d   : > { %v1338_v50 = vpop.permute.xlu1 %1337  ;;  %v1248_v8 = vpop.permute.xlu2 %1247 }
 0x16e   : > { %v1390_v59 = vsel %vm1351_vm3, %v1288_v17, %v1338_v50  ;;  %v1370_v13 = vsel %vm1351_vm3, %v7028_v33, %v1248_v8  ;;  %v5599_v33 = vld [vmem:[#allocation2 + $0x148] sm:$0xf0]  ;;  %v5655_v17 = vld [vmem:[#allocation2 + $0x1b8] sm:$0xf0]  ;;  %v1281_v34 = vunpack.c.l.b16 %v992_v25 }
 0x16f   : > { %1676 = vmatmul.bf16.gmra.mxu1 %v1390_v59  ;;  %1774 = vmatmul.bf16.gmra.mxu3 %v1390_v59  ;;  %v5602_v27 = vor.u32 %v6490_v22, %v5599_v33  ;;  %v5658_v50 = vor.u32 %v6504_v51, %v5655_v17  ;;  %v5590_v59 = vor.u32 %v6489_v58, %v5589_v57  ;;  %v953_v3 = vpop.f32.mrf.mxu2  ;;  %v5645_v33 = vld [vmem:[#allocation2 + $0x1a0] sm:$0xf]  ;;  %v1190_v51 = vunpack.c.l.b16 %v675_v52  ;;  %v5573_v17 = vld [vmem:[#allocation2 + $0x110] sm:$0xf]  ;;  %v6528_v52 = vld [vmem:[#allocation2 + $0x274] sm:$0xf] }
 0x170   : > { %v954_v19 = vadd.f32 %v7116_v10, %v953_v3  ;;  %v5582_v22 = vor.u32 %v6487_v20, %v5581_v31  ;;  %v5646_v60 = vor.u32 %v6503_v24, %v5645_v33  ;;  %v6483_v33 = vld [vmem:[#allocation2 + $0x104] sm:$0xf0] }
 0x171   : > { %2159 = vmatpush.bf16.msrb.mxu2 %v5602_v27  ;;  %2209 = vmatpush.bf16.msrb.mxu3 %v5658_v50  ;;  %v6485_v50 = vld [vmem:[#allocation2 + $0x114] sm:$0xf0]  ;;  %v1198_v3 = vpack.c.b16 %v1190_v51, %v1189_v49 }
 0x172   : > { %2062 = vmatpush.bf16.msra.mxu0 %v5590_v59  ;;  %v977_v11 = vmax.f32 %v954_v19, 0.0  ;;  %2112 = vmatpush.bf16.msra.mxu1 %v5646_v60  ;;  %v5574_v58 = vor.u32 %v6485_v50, %v5573_v17  ;;  %v5637_v59 = vld [vmem:[#allocation2 + $0x190] sm:$0xf] }
 0x173   : > { %v5638_v62 = vor.u32 %v6501_v61, %v5637_v59  ;;  %v5750_v61 = vld [vmem:[#allocation2 + $0x270] sm:$0xf] }
 0x174   : > { %v993_v27 = vpack.c.bf16 %v977_v11, %v977_v11  ;;  %v6482_v11 = vld [vmem:[#allocation2 + $0x104] sm:$0xf] }
 0x175   : > { %2160 = vmatpush.bf16.msrb.mxu2 %v5594_v56  ;;  %v5639_v56 = vld [vmem:[#allocation2 + $0x198] sm:$0xf0] }
 0x176   : > { %2063 = vmatpush.bf16.msra.mxu0 %v5582_v22  ;;  %v1282_v16 = vunpack.c.l.b16 %v993_v27  ;;  %v5642_v57 = vor.u32 %v6500_v48, %v5639_v56  ;;  %2113 = vmatpush.bf16.msra.mxu1 %v5638_v62  ;;  %v5565_v22 = vld [vmem:[#allocation2 + $0x100] sm:$0xf]  ;;  %v5816_v56 = vld [vmem:[#allocation2 + $0x2f8] sm:$0xf0]  ;;  %v6529_v62 = vld [vmem:[#allocation2 + $0x274] sm:$0xf0] }
 0x177   : > { %1642 = vmatmul.bf16.gmra.mxu0 %v1370_v13  ;;  %1740 = vmatmul.bf16.gmra.mxu2 %v1370_v13  ;;  %v956_v39 = vpop.f32.mrf.mxu2  ;;  %v6486_v13 = vld [vmem:[#allocation2 + $0x124] sm:$0xf]  ;;  %v5566_v24 = vor.u32 %v6483_v33, %v5565_v22  ;;  %v5808_v22 = vld [vmem:[#allocation2 + $0x2e8] sm:$0xf0] }
 0x178   : > { %v5586_v15 = vor.u32 %v6486_v13, %v5583_v14  ;;  %v957_v47 = vadd.f32 %v7116_v10, %v956_v39  ;;  %v1292_v40 = vpack.c.b16 %v1282_v16, %v1281_v34  ;;  %v6498_v13 = vld [vmem:[#allocation2 + $0x184] sm:$0xf] }
 0x17a   : > { %2161 = vmatpush.bf16.msrb.mxu2 %v5586_v15  ;;  %v978_v43 = vmax.f32 %v957_v47, 0.0  ;;  %2064 = vmatpush.bf16.msra.mxu0 %v5574_v58 }
 0x17c   : > { %v994_v0 = vpack.c.bf16 %v978_v43, %v978_v43  ;;  %v5752_v43 = vld [vmem:[#allocation2 + $0x278] sm:$0xf0] }
 0x17e   : > { %2065 = vmatpush.bf16.msra.mxu0 %v5566_v24 }
 0x17f   : > { %1681 = vmatmul.bf16.gmra.mxu1 %v1394_v21  ;;  %1779 = vmatmul.bf16.gmra.mxu3 %v1394_v21  ;;  %v958_v35 = vpop.f32.mrf.mxu2 }
 0x180   : > { %v959_v23 = vadd.f32 %v7116_v10, %v958_v35 }
 0x187   : > { %v961_v53 = vpop.f32.mrf.mxu2 }
 0x188   : > { %v962_v26 = vadd.f32 %v7116_v10, %v961_v53 }
 0x18a   : > { %v980_v14 = vmax.f32 %v962_v26, 0.0 }
 0x18c   : > { %v996_v20 = vpack.c.bf16 %v980_v14, %v980_v14  ;;  %v5744_v14 = vld [vmem:[#allocation2 + $0x268] sm:$0xf0] }
 0x18d   : > { %v1342_v45 = vpop.permute.xlu1 %1341 }
 0x18e   : > { %v1398_v46 = vsel %vm1351_vm3, %v1290_v44, %v1342_v45  ;;  %v979_v44 = vmax.f32 %v959_v23, 0.0  ;;  %v1285_v25 = vunpack.c.l.b16 %v996_v20 }
 0x18f   : > { %1686 = vmatmul.bf16.gmra.mxu1 %v1398_v46  ;;  %1784 = vmatmul.bf16.gmra.mxu3 %v1398_v46  ;;  %v6484_v46 = vld [vmem:[#allocation2 + $0x114] sm:$0xf]  ;;  %v963_v6 = vpop.f32.mrf.mxu2 }
 0x190   : > { %v995_v1 = vpack.c.bf16 %v979_v44, %v979_v44  ;;  %v964_v19 = vadd.f32 %v7116_v10, %v963_v6 }
 0x192   : > { %v1284_v42 = vunpack.c.l.b16 %v995_v1  ;;  %v6545_v1 = vld [vmem:[#allocation2 + $0x2f4] sm:$0xf0] }
 0x195   : > { %v1250_v4 = vpop.permute.xlu1 %1249  ;;  %v1346_v38 = vpop.permute.xlu2 %1345 }
 0x196   : > { %v1374_v5 = vsel %vm1351_vm3, %v7041_v18, %v1250_v4  ;;  %v6502_v18 = vld [vmem:[#allocation2 + $0x1a4] sm:$0xf]  ;;  %v1406_v45 = vsel %vm1351_vm3, %v1292_v40, %v1346_v38  ;;  %v1448_v38 = vld [vmem:[%s7686_s7] ss:$8 sm:$0x3] }
 0x197   : > { %1647 = vmatmul.bf16.gmra.mxu0 %v1374_v5  ;;  %1745 = vmatmul.bf16.gmra.mxu2 %v1374_v5  ;;  %v5650_v21 = vor.u32 %v6502_v18, %v5647_v2  ;;  %v1283_v5 = vunpack.c.l.b16 %v994_v0  ;;  %v981_v18 = vmax.f32 %v964_v19, 0.0  ;;  %v5631_v2 = vld [vmem:[#allocation2 + $0x188] sm:$0xf0]  ;;  %v7146_v40 = vperm.slane %v1448_v38, 0  ;;  %v5814_v0 = vld [vmem:[#allocation2 + $0x2f0] sm:$0xf] }
 0x198   : > { %v5634_v31 = vor.u32 %v6498_v13, %v5631_v2  ;;  %v6526_v13 = vld [vmem:[#allocation2 + $0x264] sm:$0xf] }
 0x199   : > { %2210 = vmatpush.bf16.msrb.mxu3 %v5650_v21  ;;  %v1293_v39 = vpack.c.b16 %v1284_v42, %v1283_v5  ;;  %v997_v21 = vpack.c.bf16 %v981_v18, %v981_v18  ;;  %v5815_v42 = vor.u32 %v6545_v1, %v5814_v0  ;;  %v5734_v1 = vld [vmem:[#allocation2 + $0x250] sm:$0xf] }
 0x19b   : > { %v1286_v27 = vunpack.c.l.b16 %v997_v21 }
 0x19c   : > { %v1721_v10 = vpop.f32.mrf.mxu2 }
 0x19d   : > { %v1344_v8 = vpop.permute.xlu0 %1343  ;;  %v1254_v63 = vpop.permute.xlu2 %1253  ;;  %2211 = vmatpush.bf16.msrb.mxu3 %v5642_v57  ;;  %v1294_v34 = vpack.c.b16 %v1286_v27, %v1285_v25 }
 0x19e   : > { %v1402_v12 = vsel %vm1351_vm3, %v1291_v7, %v1344_v8  ;;  %v1382_v4 = vsel %vm1351_vm3, %v1198_v3, %v1254_v63  ;;  %v1623_v8 = vpop.f32.mrf.mxu0  ;;  %v5751_v63 = vor.u32 %v6529_v62, %v5750_v61  ;;  %v5800_v61 = vld [vmem:[#allocation2 + $0x2d8] sm:$0xf0] }
 0x19f   : > { %1691 = vmatmul.bf16.gmra.mxu1 %v1402_v12  ;;  %1789 = vmatmul.bf16.gmra.mxu3 %v1402_v12  ;;  %v5567_v12 = vld [vmem:[#allocation2 + $0x108] sm:$0xf0]  ;;  %v1624_v41 = vadd.f32 %v1623_v8, %v7146_v40 }
 0x1a0   : > { %v5570_v15 = vor.u32 %v6482_v11, %v5567_v12  ;;  %2502 = vmatpush.bf16.msrb.mxu0 %v5751_v63 }
 0x1a1   : > { %2212 = vmatpush.bf16.msrb.mxu3 %v5634_v31 }
 0x1a4   : > { %v1723_v35 = vpop.f32.mrf.mxu2 }
 0x1a5   : > { %v1252_v32 = vpop.permute.xlu0 %1251 }
 0x1a6   : > { %v1378_v55 = vsel %vm1351_vm3, %v7056_v29, %v1252_v32  ;;  %v5575_v29 = vld [vmem:[#allocation2 + $0x118] sm:$0xf0]  ;;  %v1625_v60 = vpop.f32.mrf.mxu0  ;;  %v5630_v32 = vor.u32 %v6499_v30, %v5629_v28  ;;  %v5742_v28 = vld [vmem:[#allocation2 + $0x260] sm:$0xf]  ;;  %v6527_v30 = vld [vmem:[#allocation2 + $0x264] sm:$0xf0] }
 0x1a7   : > { %1652 = vmatmul.bf16.gmra.mxu0 %v1378_v55  ;;  %1750 = vmatmul.bf16.gmra.mxu2 %v1378_v55  ;;  %v5578_v54 = vor.u32 %v6484_v46, %v5575_v29  ;;  %v5755_v46 = vor.u32 %v6528_v52, %v5752_v43  ;;  %v7151_v29 = vperm.slane %v1448_v38, 1  ;;  %v1626_v48 = vadd.f32 %v1625_v60, %v7146_v40 }
 0x1a8   : > { %2114 = vmatpush.bf16.msra.mxu1 %v5630_v32 }
 0x1a9   : > { %2162 = vmatpush.bf16.msrb.mxu2 %v5578_v54  ;;  %v6544_v54 = vld [vmem:[#allocation2 + $0x2f4] sm:$0xf]  ;;  %v1722_v57 = vadd.f32 %v1721_v10, %v7151_v29  ;;  %v1724_v3 = vadd.f32 %v1723_v35, %v7151_v29  ;;  %v6542_v10 = vld [vmem:[#allocation2 + $0x2e4] sm:$0xf]  ;;  %v6543_v35 = vld [vmem:[#allocation2 + $0x2e4] sm:$0xf0] }
 0x1aa   : > { %v5819_v50 = vor.u32 %v6544_v54, %v5816_v56  ;;  %v5811_v24 = vor.u32 %v6542_v10, %v5808_v22 }
 0x1ac   : > { %v1726_v37 = vpop.f32.mrf.mxu2  ;;  %2649 = vmatpush.bf16.msra.mxu3 %v5819_v50  ;;  %2551 = vmatpush.bf16.msrb.mxu1 %v5815_v42  ;;  %v5798_v42 = vld [vmem:[#allocation2 + $0x2d0] sm:$0xf] }
 0x1ad   : > { %2163 = vmatpush.bf16.msrb.mxu2 %v5570_v15  ;;  %v5747_v15 = vor.u32 %v6526_v13, %v5744_v14  ;;  %v1727_v25 = vadd.f32 %v1726_v37, %v7151_v29 }
 0x1ae   : > { %v1628_v36 = vpop.f32.mrf.mxu0 }
 0x1af   : > { %1696 = vmatmul.bf16.gmra.mxu1 %v1406_v45  ;;  %1794 = vmatmul.bf16.gmra.mxu3 %v1406_v45  ;;  %v1629_v12 = vadd.f32 %v1628_v36, %v7146_v40 }
 0x1b0   : > { %2650 = vmatpush.bf16.msra.mxu3 %v5811_v24 }
 0x1b1   : > { %2600 = vmatpush.bf16.msra.mxu2 %v5755_v46 }
 0x1b4   : > { %v7149_v44 = vpop.f32.mrf.mxu2 }
 0x1b5   : > { %2601 = vmatpush.bf16.msra.mxu2 %v5747_v15 }
 0x1b6   : > { %v1630_v47 = vpop.f32.mrf.mxu0 }
 0x1b7   : > { %1657 = vmatmul.bf16.gmra.mxu0 %v1382_v4  ;;  %1755 = vmatmul.bf16.gmra.mxu2 %v1382_v4  ;;  %v1631_v2 = vadd.f32 %v1630_v47, %v7146_v40 }
 0x1bc   : > { %v7158_v19 = vpop.f32.mrf.mxu2 }
 0x1bd   : > { %v1348_v7 = vpop.permute.xlu1 %1347  ;;  %v1732_v63 = vadd.f32 %v7158_v19, %v7151_v29 }
 0x1be   : > { %v1410_v9 = vsel %vm1351_vm3, %v1293_v39, %v1348_v7  ;;  %v7154_v17 = vpop.f32.mrf.mxu0 }
 0x1bf   : > { %1701 = vmatmul.bf16.gmra.mxu1 %v1410_v9  ;;  %1799 = vmatmul.bf16.gmra.mxu3 %v1410_v9 }
 0x1c4   : > { %v1733_v33 = vpop.f32.mrf.mxu2 }
 0x1c6   : > { %v1635_v11 = vpop.f32.mrf.mxu0 }
 0x1c7   : > { %v1636_v56 = vadd.f32 %v1635_v11, %v7146_v40 }
 0x1cd   : > { %v1350_v16 = vpop.permute.xlu0 %1349 }
 0x1ce   : > { %v1414_v55 = vsel %vm1351_vm3, %v1294_v34, %v1350_v16  ;;  %v5743_v34 = vor.u32 %v6527_v30, %v5742_v28  ;;  %v5806_v16 = vld [vmem:[#allocation2 + $0x2e0] sm:$0xf] }
 0x1cf   : > { %1706 = vmatmul.bf16.gmra.mxu1 %v1414_v55  ;;  %1804 = vmatmul.bf16.gmra.mxu3 %v1414_v55  ;;  %v1729_v55 = vadd.f32 %v7149_v44, %v7151_v29  ;;  %v5807_v47 = vor.u32 %v6543_v35, %v5806_v16  ;;  %v6524_v44 = vld [vmem:[#allocation2 + $0x254] sm:$0xf]  ;;  %v5726_v35 = vld [vmem:[#allocation2 + $0x240] sm:$0xf] }
 0x1d0   : > { %2503 = vmatpush.bf16.msrb.mxu0 %v5743_v34 }
 0x1d1   : > { %2552 = vmatpush.bf16.msrb.mxu1 %v5807_v47  ;;  %v6539_v47 = vld [vmem:[#allocation2 + $0x2c4] sm:$0xf0] }
 0x1dc   : > { %v1672_v23 = vpop.f32.mrf.mxu1 }
 0x1dd   : > { %v1673_v49 = vadd.f32 %v1672_v23, %v1624_v41 }
 0x1df   : > { %v1810_v58 = vmax.f32 %v1673_v49, 0.0  ;;  %v5736_v49 = vld [vmem:[#allocation2 + $0x258] sm:$0xf0] }
 0x1e0   : > { %v5739_v54 = vor.u32 %v6524_v44, %v5736_v49 }
 0x1e2   : > { %v1770_v45 = vpop.f32.mrf.mxu3  ;;  %2602 = vmatpush.bf16.msra.mxu2 %v5739_v54 }
 0x1e3   : > { %v1771_v4 = vadd.f32 %v1770_v45, %v1722_v57 }
 0x1e4   : > { %v1674_v51 = vpop.f32.mrf.mxu1  ;;  %v1638_v32 = vpop.f32.mrf.mxu0 }
 0x1e5   : > { %v1675_v53 = vadd.f32 %v1674_v51, %v1626_v48  ;;  %v1811_v7 = vmax.f32 %v1771_v4, 0.0  ;;  %v1634_v48 = vadd.f32 %v7154_v17, %v7146_v40  ;;  %v1639_v15 = vadd.f32 %v1638_v32, %v7146_v40 }
 0x1e7   : > { %v1812_v59 = vmax.f32 %v1675_v53, 0.0 }
 0x1e9   : > { %v1842_v5 = vpack.c.bf16 %v1812_v59, %v1810_v58  ;;  %v6540_v59 = vld [vmem:[#allocation2 + $0x2d4] sm:$0xf] }
 0x1ea   : > { %v1772_v6 = vpop.f32.mrf.mxu3  ;;  %v1736_v45 = vpop.f32.mrf.mxu2  ;;  %v5803_v62 = vor.u32 %v6540_v59, %v5800_v61 }
 0x1eb   : > { %v1773_v26 = vadd.f32 %v1772_v6, %v1724_v3  ;;  %2066 = vmatmul.bf16.vlgmr.msra.gmra.mxu0 %v1842_v5  ;;  %2164 = vmatmul.bf16.vlgmr.msrb.gmra.mxu2 %v1842_v5  ;;  %v6525_v3 = vld [vmem:[#allocation2 + $0x254] sm:$0xf0]  ;;  %v1737_v34 = vadd.f32 %v1736_v45, %v7151_v29 }
 0x1ec   : > { %v1677_v39 = vpop.f32.mrf.mxu1  ;;  %v1640_v51 = vpop.f32.mrf.mxu0  ;;  %2651 = vmatpush.bf16.msra.mxu3 %v5803_v62  ;;  %v5735_v5 = vor.u32 %v6525_v3, %v5734_v1  ;;  %v6541_v6 = vld [vmem:[#allocation2 + $0x2d4] sm:$0xf0]  ;;  %v5784_v1 = vld [vmem:[#allocation2 + $0x2b8] sm:$0xf0] }
 0x1ed   : > { %v1813_v8 = vmax.f32 %v1773_v26, 0.0  ;;  %v1678_v31 = vadd.f32 %v1677_v39, %v1629_v12  ;;  %v1734_v26 = vadd.f32 %v1733_v33, %v7151_v29  ;;  %v1641_v22 = vadd.f32 %v1640_v51, %v7146_v40 }
 0x1ee   : > { %2504 = vmatpush.bf16.msrb.mxu0 %v5735_v5 }
 0x1ef   : > { %v1843_v9 = vpack.c.bf16 %v1813_v8, %v1811_v7  ;;  %v1814_v27 = vmax.f32 %v1678_v31, 0.0  ;;  %v5799_v8 = vor.u32 %v6541_v6, %v5798_v42  ;;  %v5728_v31 = vld [vmem:[#allocation2 + $0x248] sm:$0xf0]  ;;  %v5718_v6 = vld [vmem:[#allocation2 + $0x230] sm:$0xf] }
 0x1f1   : > { %2115 = vmatmul.bf16.vlgmr.msra.gmra.mxu1 %v1843_v9  ;;  %2213 = vmatmul.bf16.vlgmr.msrb.gmra.mxu3 %v1843_v9 }
 0x1f2   : > { %v1775_v18 = vpop.f32.mrf.mxu3  ;;  %v1738_v4 = vpop.f32.mrf.mxu2  ;;  %2553 = vmatpush.bf16.msrb.mxu1 %v5799_v8  ;;  %v5782_v8 = vld [vmem:[#allocation2 + $0x2b0] sm:$0xf] }
 0x1f3   : > { %v1776_v36 = vadd.f32 %v1775_v18, %v1727_v25 }
 0x1f4   : > { %v1679_v20 = vpop.f32.mrf.mxu1  ;;  %v1643_v19 = vpop.f32.mrf.mxu0 }
 0x1f5   : > { %v1680_v21 = vadd.f32 %v1679_v20, %v1631_v2  ;;  %v1815_v52 = vmax.f32 %v1776_v36, 0.0  ;;  %v6522_v2 = vld [vmem:[#allocation2 + $0x244] sm:$0xf]  ;;  %v1644_v54 = vadd.f32 %v1643_v19, %v7146_v40 }
 0x1f6   : > { %v5731_v10 = vor.u32 %v6522_v2, %v5728_v31 }
 0x1f7   : > { %v1816_v60 = vmax.f32 %v1680_v21, 0.0 }
 0x1f8   : > { %2603 = vmatpush.bf16.msra.mxu2 %v5731_v10 }
 0x1f9   : > { %v1844_v38 = vpack.c.bf16 %v1816_v60, %v1814_v27  ;;  %v6538_v27 = vld [vmem:[#allocation2 + $0x2c4] sm:$0xf]  ;;  %v5792_v60 = vld [vmem:[#allocation2 + $0x2c8] sm:$0xf0] }
 0x1fa   : > { %v1777_v23 = vpop.f32.mrf.mxu3  ;;  %v1741_v20 = vpop.f32.mrf.mxu2  ;;  %v5795_v30 = vor.u32 %v6538_v27, %v5792_v60 }
 0x1fb   : > { %v1778_v41 = vadd.f32 %v1777_v23, %v1729_v55  ;;  %2071 = vmatmul.bf16.gmra.mxu0 %v1844_v38  ;;  %2169 = vmatmul.bf16.gmra.mxu2 %v1844_v38  ;;  %v6523_v55 = vld [vmem:[#allocation2 + $0x244] sm:$0xf0]  ;;  %v5790_v38 = vld [vmem:[#allocation2 + $0x2c0] sm:$0xf]  ;;  %v1739_v23 = vadd.f32 %v1738_v4, %v7151_v29  ;;  %v1742_v4 = vadd.f32 %v1741_v20, %v7151_v29 }
 0x1fc   : > { %v1682_v37 = vpop.f32.mrf.mxu1  ;;  %v1645_v28 = vpop.f32.mrf.mxu0  ;;  %2652 = vmatpush.bf16.msra.mxu3 %v5795_v30  ;;  %v5727_v36 = vor.u32 %v6523_v55, %v5726_v35 }
 0x1fd   : > { %v1817_v43 = vmax.f32 %v1778_v41, 0.0  ;;  %v1683_v50 = vadd.f32 %v1682_v37, %v1634_v48  ;;  %v1646_v59 = vadd.f32 %v1645_v28, %v7146_v40 }
 0x1fe   : > { %2505 = vmatpush.bf16.msrb.mxu0 %v5727_v36 }
 0x1ff   : > { %v1845_v46 = vpack.c.bf16 %v1817_v43, %v1815_v52  ;;  %v1818_v17 = vmax.f32 %v1683_v50, 0.0  ;;  %v5791_v52 = vor.u32 %v6539_v47, %v5790_v38  ;;  %v5720_v50 = vld [vmem:[#allocation2 + $0x238] sm:$0xf0]  ;;  %v5710_v47 = vld [vmem:[#allocation2 + $0x220] sm:$0xf] }
 0x201   : > { %2120 = vmatmul.bf16.gmra.mxu1 %v1845_v46  ;;  %2218 = vmatmul.bf16.gmra.mxu3 %v1845_v46 }
 0x202   : > { %v1780_v53 = vpop.f32.mrf.mxu3  ;;  %v1743_v48 = vpop.f32.mrf.mxu2  ;;  %2554 = vmatpush.bf16.msrb.mxu1 %v5791_v52  ;;  %v5774_v52 = vld [vmem:[#allocation2 + $0x2a0] sm:$0xf] }
 0x203   : > { %v1781_v39 = vadd.f32 %v1780_v53, %v1732_v63 }
 0x204   : > { %v1684_v57 = vpop.f32.mrf.mxu1 }
 0x205   : > { %v1685_v58 = vadd.f32 %v1684_v57, %v1636_v56  ;;  %v1819_v13 = vmax.f32 %v1781_v39, 0.0  ;;  %v6520_v56 = vld [vmem:[#allocation2 + $0x234] sm:$0xf] }
 0x207   : > { %v1820_v0 = vmax.f32 %v1685_v58, 0.0  ;;  %v5723_v58 = vor.u32 %v6520_v56, %v5720_v50 }
 0x209   : > { %v1846_v7 = vpack.c.bf16 %v1820_v0, %v1818_v17  ;;  %2604 = vmatpush.bf16.msra.mxu2 %v5723_v58  ;;  %v6536_v0 = vld [vmem:[#allocation2 + $0x2b4] sm:$0xf] }
 0x20a   : > { %v1782_v9 = vpop.f32.mrf.mxu3  ;;  %v5787_v3 = vor.u32 %v6536_v0, %v5784_v1  ;;  %v5768_v1 = vld [vmem:[#allocation2 + $0x298] sm:$0xf0] }
 0x20b   : > { %v1783_v11 = vadd.f32 %v1782_v9, %v1734_v26  ;;  %2076 = vmatmul.bf16.gmra.mxu0 %v1846_v7  ;;  %2174 = vmatmul.bf16.gmra.mxu2 %v1846_v7  ;;  %v6521_v26 = vld [vmem:[#allocation2 + $0x234] sm:$0xf0] }
 0x20c   : > { %v1687_v12 = vpop.f32.mrf.mxu1  ;;  %2653 = vmatpush.bf16.msra.mxu3 %v5787_v3  ;;  %v5719_v7 = vor.u32 %v6521_v26, %v5718_v6  ;;  %v6537_v9 = vld [vmem:[#allocation2 + $0x2b4] sm:$0xf0]  ;;  %v5702_v3 = vld [vmem:[#allocation2 + $0x210] sm:$0xf] }
 0x20d   : > { %v1821_v14 = vmax.f32 %v1783_v11, 0.0  ;;  %v1688_v33 = vadd.f32 %v1687_v12, %v1639_v15  ;;  %v1744_v11 = vadd.f32 %v1743_v48, %v7151_v29 }
 0x20e   : > { %2506 = vmatpush.bf16.msrb.mxu0 %v5719_v7  ;;  %v6533_v7 = vld [vmem:[#allocation2 + $0x294] sm:$0xf0] }
 0x20f   : > { %v1847_v18 = vpack.c.bf16 %v1821_v14, %v1819_v13  ;;  %v1822_v32 = vmax.f32 %v1688_v33, 0.0  ;;  %v5783_v13 = vor.u32 %v6537_v9, %v5782_v8  ;;  %v5712_v33 = vld [vmem:[#allocation2 + $0x228] sm:$0xf0] }
 0x211   : > { %2125 = vmatmul.bf16.gmra.mxu1 %v1847_v18  ;;  %2223 = vmatmul.bf16.gmra.mxu3 %v1847_v18 }
 0x212   : > { %v1785_v21 = vpop.f32.mrf.mxu3  ;;  %2555 = vmatpush.bf16.msrb.mxu1 %v5783_v13 }
 0x213   : > { %v1786_v41 = vadd.f32 %v1785_v21, %v1737_v34 }
 0x214   : > { %v1689_v24 = vpop.f32.mrf.mxu1  ;;  %v1648_v51 = vpop.f32.mrf.mxu0 }
 0x215   : > { %v1690_v25 = vadd.f32 %v1689_v24, %v1641_v22  ;;  %v1823_v44 = vmax.f32 %v1786_v41, 0.0  ;;  %v1649_v10 = vadd.f32 %v1648_v51, %v7146_v40  ;;  %v6518_v22 = vld [vmem:[#allocation2 + $0x224] sm:$0xf] }
 0x216   : > { %v5715_v27 = vor.u32 %v6518_v22, %v5712_v33 }
 0x217   : > { %v1824_v16 = vmax.f32 %v1690_v25, 0.0 }
 0x218   : > { %2605 = vmatpush.bf16.msra.mxu2 %v5715_v27 }
 0x219   : > { %v1848_v37 = vpack.c.bf16 %v1824_v16, %v1822_v32  ;;  %v6534_v32 = vld [vmem:[#allocation2 + $0x2a4] sm:$0xf]  ;;  %v5776_v16 = vld [vmem:[#allocation2 + $0x2a8] sm:$0xf0] }
 0x21a   : > { %v1787_v43 = vpop.f32.mrf.mxu3  ;;  %v1746_v62 = vpop.f32.mrf.mxu2  ;;  %v5779_v35 = vor.u32 %v6534_v32, %v5776_v16  ;;  %v5760_v16 = vld [vmem:[#allocation2 + $0x288] sm:$0xf0] }
 0x21b   : > { %v1788_v46 = vadd.f32 %v1787_v43, %v1739_v23  ;;  %2081 = vmatmul.bf16.gmra.mxu0 %v1848_v37  ;;  %2179 = vmatmul.bf16.gmra.mxu2 %v1848_v37  ;;  %v1747_v55 = vadd.f32 %v1746_v62, %v7151_v29  ;;  %v6519_v23 = vld [vmem:[#allocation2 + $0x224] sm:$0xf0]  ;;  %v6532_v62 = vld [vmem:[#allocation2 + $0x294] sm:$0xf] }
 0x21c   : > { %v1692_v45 = vpop.f32.mrf.mxu1  ;;  %v1650_v39 = vpop.f32.mrf.mxu0  ;;  %2654 = vmatpush.bf16.msra.mxu3 %v5779_v35  ;;  %v5711_v37 = vor.u32 %v6519_v23, %v5710_v47  ;;  %v6535_v43 = vld [vmem:[#allocation2 + $0x2a4] sm:$0xf0]  ;;  %v5771_v6 = vor.u32 %v6532_v62, %v5768_v1  ;;  %v6560_v1 = vld [vmem:[#allocation2 + $0x374] sm:$0xf] }
 0x21d   : > { %v1825_v49 = vmax.f32 %v1788_v46, 0.0  ;;  %v1693_v61 = vadd.f32 %v1692_v45, %v1644_v54  ;;  %v1651_v60 = vadd.f32 %v1650_v39, %v7146_v40  ;;  %v5766_v39 = vld [vmem:[#allocation2 + $0x290] sm:$0xf] }
 0x21e   : > { %2507 = vmatpush.bf16.msrb.mxu0 %v5711_v37  ;;  %v5767_v9 = vor.u32 %v6533_v7, %v5766_v39 }
 0x21f   : > { %v1849_v53 = vpack.c.bf16 %v1825_v49, %v1823_v44  ;;  %v1826_v5 = vmax.f32 %v1693_v61, 0.0  ;;  %v5775_v44 = vor.u32 %v6535_v43, %v5774_v52  ;;  %v5704_v61 = vld [vmem:[#allocation2 + $0x218] sm:$0xf0]  ;;  %v5694_v43 = vld [vmem:[#allocation2 + $0x200] sm:$0xf] }
 0x220   : > { %2655 = vmatpush.bf16.msra.mxu3 %v5771_v6 }
 0x221   : > { %2130 = vmatmul.bf16.gmra.mxu1 %v1849_v53  ;;  %2228 = vmatmul.bf16.gmra.mxu3 %v1849_v53 }
 0x222   : > { %v1790_v57 = vpop.f32.mrf.mxu3  ;;  %v1748_v20 = vpop.f32.mrf.mxu2  ;;  %2556 = vmatpush.bf16.msrb.mxu1 %v5775_v44 }
 0x223   : > { %v1791_v19 = vadd.f32 %v1790_v57, %v1742_v4  ;;  %v1749_v46 = vadd.f32 %v1748_v20, %v7151_v29  ;;  %v6517_v4 = vld [vmem:[#allocation2 + $0x214] sm:$0xf0] }
 0x224   : > { %v1694_v63 = vpop.f32.mrf.mxu1  ;;  %v1653_v24 = vpop.f32.mrf.mxu0  ;;  %v5703_v26 = vor.u32 %v6517_v4, %v5702_v3  ;;  %v5881_v3 = vld [vmem:[#allocation2 + $0x378] sm:$0xf0] }
 0x225   : > { %v1695_v17 = vadd.f32 %v1694_v63, %v1646_v59  ;;  %v1827_v2 = vmax.f32 %v1791_v19, 0.0  ;;  %v1654_v58 = vadd.f32 %v1653_v24, %v7146_v40  ;;  %v6516_v59 = vld [vmem:[#allocation2 + $0x214] sm:$0xf] }
 0x226   : > { %v5707_v0 = vor.u32 %v6516_v59, %v5704_v61  ;;  %2508 = vmatpush.bf16.msrb.mxu0 %v5703_v26  ;;  %2557 = vmatpush.bf16.msrb.mxu1 %v5767_v9  ;;  %v6576_v9 = vld [vmem:[#allocation2 + $0x3f4] sm:$0xf] }
 0x227   : > { %v1828_v42 = vmax.f32 %v1695_v17, 0.0 }
 0x228   : > { %2606 = vmatpush.bf16.msra.mxu2 %v5707_v0 }
 0x229   : > { %v1850_v12 = vpack.c.bf16 %v1828_v42, %v1826_v5 }
 0x22a   : > { %v1792_v14 = vpop.f32.mrf.mxu3  ;;  %v1751_v41 = vpop.f32.mrf.mxu2 }
 0x22b   : > { %v1793_v18 = vadd.f32 %v1792_v14, %v1744_v11  ;;  %2086 = vmatmul.bf16.gmra.mxu0 %v1850_v12  ;;  %2184 = vmatmul.bf16.gmra.mxu2 %v1850_v12  ;;  %v1752_v12 = vadd.f32 %v1751_v41, %v7151_v29 }
 0x22c   : > { %v1697_v15 = vpop.f32.mrf.mxu1  ;;  %v1655_v53 = vpop.f32.mrf.mxu0 }
 0x22d   : > { %v1829_v31 = vmax.f32 %v1793_v18, 0.0  ;;  %v1698_v28 = vadd.f32 %v1697_v15, %v1649_v10  ;;  %v1656_v5 = vadd.f32 %v1655_v53, %v7146_v40  ;;  %v5758_v53 = vld [vmem:[#allocation2 + $0x280] sm:$0xf] }
 0x22f   : > { %v1851_v21 = vpack.c.bf16 %v1829_v31, %v1827_v2  ;;  %v1830_v36 = vmax.f32 %v1698_v28, 0.0  ;;  %v5696_v28 = vld [vmem:[#allocation2 + $0x208] sm:$0xf0] }
 0x231   : > { %2135 = vmatmul.bf16.gmra.mxu1 %v1851_v21  ;;  %2233 = vmatmul.bf16.gmra.mxu3 %v1851_v21 }
 0x232   : > { %v1795_v25 = vpop.f32.mrf.mxu3  ;;  %v1753_v63 = vpop.f32.mrf.mxu2 }
 0x233   : > { %v1796_v48 = vadd.f32 %v1795_v25, %v1747_v55  ;;  %v1754_v18 = vadd.f32 %v1753_v63, %v7151_v29 }
 0x234   : > { %v1699_v30 = vpop.f32.mrf.mxu1  ;;  %v1658_v19 = vpop.f32.mrf.mxu0 }
 0x235   : > { %v1700_v34 = vadd.f32 %v1699_v30, %v1651_v60  ;;  %v1831_v56 = vmax.f32 %v1796_v48, 0.0  ;;  %v1659_v27 = vadd.f32 %v1658_v19, %v7146_v40  ;;  %v6514_v60 = vld [vmem:[#allocation2 + $0x204] sm:$0xf] }
 0x236   : > { %v6530_v30 = vld [vmem:[#allocation2 + $0x284] sm:$0xf]  ;;  %v5699_v32 = vor.u32 %v6514_v60, %v5696_v28 }
 0x237   : > { %v1832_v38 = vmax.f32 %v1700_v34, 0.0 }
 0x238   : > { %2607 = vmatpush.bf16.msra.mxu2 %v5699_v32 }
 0x239   : > { %v1852_v45 = vpack.c.bf16 %v1832_v38, %v1830_v36  ;;  %v5763_v36 = vor.u32 %v6530_v30, %v5760_v16 }
 0x23a   : > { %v1797_v49 = vpop.f32.mrf.mxu3  ;;  %v1756_v21 = vpop.f32.mrf.mxu2 }
 0x23b   : > { %v1798_v51 = vadd.f32 %v1797_v49, %v1749_v46  ;;  %2091 = vmatmul.bf16.gmra.mxu0 %v1852_v45  ;;  %2189 = vmatmul.bf16.gmra.mxu2 %v1852_v45  ;;  %v1757_v41 = vadd.f32 %v1756_v21, %v7151_v29  ;;  %v6515_v46 = vld [vmem:[#allocation2 + $0x204] sm:$0xf0]  ;;  %v6577_v21 = vld [vmem:[#allocation2 + $0x3f4] sm:$0xf0] }
 0x23c   : > { %v1702_v54 = vpop.f32.mrf.mxu1  ;;  %v1660_v25 = vpop.f32.mrf.mxu0  ;;  %2656 = vmatpush.bf16.msra.mxu3 %v5763_v36  ;;  %v5695_v48 = vor.u32 %v6515_v46, %v5694_v43  ;;  %v5873_v36 = vld [vmem:[#allocation2 + $0x368] sm:$0xf0]  ;;  %v6574_v46 = vld [vmem:[#allocation2 + $0x3e4] sm:$0xf] }
 0x23d   : > { %v1833_v50 = vmax.f32 %v1798_v51, 0.0  ;;  %v1703_v42 = vadd.f32 %v1702_v54, %v1654_v58  ;;  %v1661_v35 = vadd.f32 %v1660_v25, %v7146_v40  ;;  %v6531_v54 = vld [vmem:[#allocation2 + $0x284] sm:$0xf0] }
 0x23e   : > { %2509 = vmatpush.bf16.msrb.mxu0 %v5695_v48  ;;  %v5937_v48 = vld [vmem:[#allocation2 + $0x3e8] sm:$0xf0] }
 0x23f   : > { %v1853_v57 = vpack.c.bf16 %v1833_v50, %v1831_v56  ;;  %v1834_v13 = vmax.f32 %v1703_v42, 0.0  ;;  %v5759_v56 = vor.u32 %v6531_v54, %v5758_v53  ;;  %v5871_v53 = vld [vmem:[#allocation2 + $0x360] sm:$0xf]  ;;  %v6559_v54 = vld [vmem:[#allocation2 + $0x364] sm:$0xf0] }
 0x241   : > { %2140 = vmatmul.bf16.gmra.mxu1 %v1853_v57  ;;  %2238 = vmatmul.bf16.gmra.mxu3 %v1853_v57 }
 0x242   : > { %v1800_v17 = vpop.f32.mrf.mxu3  ;;  %v1758_v23 = vpop.f32.mrf.mxu2  ;;  %2558 = vmatpush.bf16.msrb.mxu1 %v5759_v56  ;;  %v5872_v56 = vor.u32 %v6559_v54, %v5871_v53  ;;  %v5921_v53 = vld [vmem:[#allocation2 + $0x3c8] sm:$0xf0] }
 0x243   : > { %v1801_v15 = vadd.f32 %v1800_v17, %v1752_v12  ;;  %v1759_v45 = vadd.f32 %v1758_v23, %v7151_v29  ;;  %v5562_v29 = vld [vmem:[%s7686_s7 + $0x1] ss:$8 sm:$0x3] }
 0x244   : > { %v1704_v8 = vpop.f32.mrf.mxu1  ;;  %v7194_v63 = vperm.slane %v5562_v29, 0  ;;  %v7197_v6 = vperm.slane %v5562_v29, 1 }
 0x245   : > { %v1705_v11 = vadd.f32 %v1704_v8, %v1656_v5  ;;  %v1835_v22 = vmax.f32 %v1801_v15, 0.0  ;;  %v5884_v5 = vor.u32 %v6560_v1, %v5881_v3  ;;  %v5879_v15 = vld [vmem:[#allocation2 + $0x370] sm:$0xf] }
 0x247   : > { %v1836_v14 = vmax.f32 %v1705_v11, 0.0  ;;  %3044 = vmatpush.bf16.msrb.mxu2 %v5884_v5  ;;  %v5945_v11 = vld [vmem:[#allocation2 + $0x3f8] sm:$0xf0] }
 0x248   : > { %v5948_v12 = vor.u32 %v6576_v9, %v5945_v11 }
 0x249   : > { %v1854_v2 = vpack.c.bf16 %v1836_v14, %v1834_v13 }
 0x24a   : > { %v1802_v31 = vpop.f32.mrf.mxu3  ;;  %3093 = vmatpush.bf16.msrb.mxu3 %v5948_v12 }
 0x24b   : > { %v1803_v20 = vadd.f32 %v1802_v31, %v1754_v18  ;;  %2096 = vmatmul.bf16.gmra.mxu0 %v1854_v2  ;;  %2194 = vmatmul.bf16.gmra.mxu2 %v1854_v2  ;;  %v6561_v2 = vld [vmem:[#allocation2 + $0x374] sm:$0xf0] }
 0x24c   : > { %v1707_v10 = vpop.f32.mrf.mxu1  ;;  %v5880_v31 = vor.u32 %v6561_v2, %v5879_v15  ;;  %v5929_v15 = vld [vmem:[#allocation2 + $0x3d8] sm:$0xf0] }
 0x24d   : > { %v1837_v33 = vmax.f32 %v1803_v20, 0.0  ;;  %v1708_v55 = vadd.f32 %v1707_v10, %v1659_v27  ;;  %v5943_v20 = vld [vmem:[#allocation2 + $0x3f0] sm:$0xf] }
 0x24e   : > { %2946 = vmatpush.bf16.msra.mxu0 %v5880_v31 }
 0x24f   : > { %v1855_v24 = vpack.c.bf16 %v1837_v33, %v1835_v22  ;;  %v1838_v37 = vmax.f32 %v1708_v55, 0.0  ;;  %v6558_v55 = vld [vmem:[#allocation2 + $0x364] sm:$0xf] }
 0x251   : > { %2145 = vmatmul.bf16.gmra.mxu1 %v1855_v24  ;;  %2243 = vmatmul.bf16.gmra.mxu3 %v1855_v24  ;;  %v5944_v24 = vor.u32 %v6577_v21, %v5943_v20 }
 0x252   : > { %v1805_v34 = vpop.f32.mrf.mxu3  ;;  %2947 = vmatpush.bf16.msra.mxu0 %v5872_v56 }
 0x253   : > { %v1806_v44 = vadd.f32 %v1805_v34, %v1757_v41  ;;  %2995 = vmatpush.bf16.msra.mxu1 %v5944_v24 }
 0x254   : > { %v1709_v38 = vpop.f32.mrf.mxu1 }
 0x255   : > { %v1710_v47 = vadd.f32 %v1709_v38, %v1661_v35  ;;  %v1839_v50 = vmax.f32 %v1806_v44, 0.0  ;;  %v5940_v44 = vor.u32 %v6574_v46, %v5937_v48 }
 0x257   : > { %v1840_v52 = vmax.f32 %v1710_v47, 0.0  ;;  %v5876_v47 = vor.u32 %v6558_v55, %v5873_v36  ;;  %3094 = vmatpush.bf16.msrb.mxu3 %v5940_v44 }
 0x259   : > { %v1856_v49 = vpack.c.bf16 %v1840_v52, %v1838_v37  ;;  %3045 = vmatpush.bf16.msrb.mxu2 %v5876_v47 }
 0x25a   : > { %v1807_v51 = vpop.f32.mrf.mxu3 }
 0x25b   : > { %v1808_v40 = vadd.f32 %v1807_v51, %v1759_v45  ;;  %2101 = vmatmul.bf16.gmra.mxu0 %v1856_v49  ;;  %2199 = vmatmul.bf16.gmra.mxu2 %v1856_v49 }
 0x25d   : > { %v1841_v57 = vmax.f32 %v1808_v40, 0.0 }
 0x25f   : > { %v1857_v58 = vpack.c.bf16 %v1841_v57, %v1839_v50  ;;  %v5935_v50 = vld [vmem:[#allocation2 + $0x3e0] sm:$0xf]  ;;  %v6575_v57 = vld [vmem:[#allocation2 + $0x3e4] sm:$0xf0] }
 0x261   : > { %2150 = vmatmul.bf16.gmra.mxu1 %v1857_v58  ;;  %2248 = vmatmul.bf16.gmra.mxu3 %v1857_v58 }
 0x268   : > { %v2067_v59 = vpop.f32.mrf.mxu0 }
 0x269   : > { %v2068_v0 = vadd.f32 %v2067_v59, %v7194_v63 }
 0x26e   : > { %v2116_v61 = vpop.f32.mrf.mxu1  ;;  %v2165_v62 = vpop.f32.mrf.mxu2 }
 0x26f   : > { %v2117_v42 = vadd.f32 %v2116_v61, %v2068_v0  ;;  %v2166_v14 = vadd.f32 %v2165_v62, %v7197_v6  ;;  %v5936_v61 = vor.u32 %v6575_v57, %v5935_v50 }
 0x270   : > { %v2069_v17 = vpop.f32.mrf.mxu0 }
 0x271   : > { %v2070_v26 = vadd.f32 %v2069_v17, %v7194_v63  ;;  %v2254_v13 = vmax.f32 %v2117_v42, 0.0  ;;  %2996 = vmatpush.bf16.msra.mxu1 %v5936_v61 }
 0x274   : > { %v2214_v4 = vpop.f32.mrf.mxu3 }
 0x275   : > { %v2215_v10 = vadd.f32 %v2214_v4, %v2166_v14 }
 0x276   : > { %v2118_v39 = vpop.f32.mrf.mxu1  ;;  %v2167_v7 = vpop.f32.mrf.mxu2 }
 0x277   : > { %v2119_v8 = vadd.f32 %v2118_v39, %v2070_v26  ;;  %v2168_v33 = vadd.f32 %v2167_v7, %v7197_v6  ;;  %v2255_v30 = vmax.f32 %v2215_v10, 0.0  ;;  %v6556_v39 = vld [vmem:[#allocation2 + $0x354] sm:$0xf]  ;;  %v5865_v7 = vld [vmem:[#allocation2 + $0x358] sm:$0xf0] }
 0x278   : > { %v2072_v19 = vpop.f32.mrf.mxu0  ;;  %v5868_v9 = vor.u32 %v6556_v39, %v5865_v7 }
 0x279   : > { %v2256_v18 = vmax.f32 %v2119_v8, 0.0  ;;  %v2073_v35 = vadd.f32 %v2072_v19, %v7194_v63 }
 0x27a   : > { %3046 = vmatpush.bf16.msrb.mxu2 %v5868_v9 }
 0x27b   : > { %v2286_v22 = vpack.c.bf16 %v2256_v18, %v2254_v13  ;;  %v6572_v18 = vld [vmem:[#allocation2 + $0x3d4] sm:$0xf] }
 0x27c   : > { %v2216_v25 = vpop.f32.mrf.mxu3  ;;  %v5932_v31 = vor.u32 %v6572_v18, %v5929_v15 }
 0x27d   : > { %v2217_v27 = vadd.f32 %v2216_v25, %v2168_v33  ;;  %2510 = vmatmul.bf16.vlgmr.msrb.gmra.mxu0 %v2286_v22  ;;  %2608 = vmatmul.bf16.vlgmr.msra.gmra.mxu2 %v2286_v22  ;;  %v5863_v22 = vld [vmem:[#allocation2 + $0x350] sm:$0xf]  ;;  %v6557_v33 = vld [vmem:[#allocation2 + $0x354] sm:$0xf0] }
 0x27e   : > { %v2121_v60 = vpop.f32.mrf.mxu1  ;;  %v2170_v28 = vpop.f32.mrf.mxu2  ;;  %3095 = vmatpush.bf16.msrb.mxu3 %v5932_v31  ;;  %v5864_v24 = vor.u32 %v6557_v33, %v5863_v22  ;;  %v5927_v25 = vld [vmem:[#allocation2 + $0x3d0] sm:$0xf]  ;;  %v5913_v22 = vld [vmem:[#allocation2 + $0x3b8] sm:$0xf0] }
 0x27f   : > { %v2257_v34 = vmax.f32 %v2217_v27, 0.0  ;;  %v2122_v23 = vadd.f32 %v2121_v60, %v2073_v35  ;;  %v2171_v51 = vadd.f32 %v2170_v28, %v7197_v6  ;;  %v6573_v27 = vld [vmem:[#allocation2 + $0x3d4] sm:$0xf0] }
 0x280   : > { %v2074_v32 = vpop.f32.mrf.mxu0  ;;  %2948 = vmatpush.bf16.msra.mxu0 %v5864_v24 }
 0x281   : > { %v2287_v16 = vpack.c.bf16 %v2257_v34, %v2255_v30  ;;  %v2075_v41 = vadd.f32 %v2074_v32, %v7194_v63  ;;  %v2258_v49 = vmax.f32 %v2122_v23, 0.0  ;;  %v5928_v34 = vor.u32 %v6573_v27, %v5927_v25 }
 0x283   : > { %2559 = vmatmul.bf16.vlgmr.msrb.gmra.mxu1 %v2287_v16  ;;  %2657 = vmatmul.bf16.vlgmr.msra.gmra.mxu3 %v2287_v16 }
 0x284   : > { %v2219_v38 = vpop.f32.mrf.mxu3  ;;  %2997 = vmatpush.bf16.msra.mxu1 %v5928_v34 }
 0x285   : > { %v2220_v58 = vadd.f32 %v2219_v38, %v2171_v51 }
 0x286   : > { %v2123_v37 = vpop.f32.mrf.mxu1  ;;  %v2172_v52 = vpop.f32.mrf.mxu2 }
 0x287   : > { %v2124_v43 = vadd.f32 %v2123_v37, %v2075_v41  ;;  %v2173_v59 = vadd.f32 %v2172_v52, %v7197_v6  ;;  %v2259_v3 = vmax.f32 %v2220_v58, 0.0  ;;  %v6554_v37 = vld [vmem:[#allocation2 + $0x344] sm:$0xf]  ;;  %v5857_v52 = vld [vmem:[#allocation2 + $0x348] sm:$0xf0] }
 0x288   : > { %v2077_v45 = vpop.f32.mrf.mxu0  ;;  %v5860_v46 = vor.u32 %v6554_v37, %v5857_v52 }
 0x289   : > { %v2260_v40 = vmax.f32 %v2124_v43, 0.0  ;;  %v2078_v26 = vadd.f32 %v2077_v45, %v7194_v63 }
 0x28a   : > { %3047 = vmatpush.bf16.msrb.mxu2 %v5860_v46 }
 0x28b   : > { %v2288_v29 = vpack.c.bf16 %v2260_v40, %v2258_v49  ;;  %v6570_v40 = vld [vmem:[#allocation2 + $0x3c4] sm:$0xf] }
 0x28c   : > { %v2221_v62 = vpop.f32.mrf.mxu3  ;;  %v5924_v56 = vor.u32 %v6570_v40, %v5921_v53 }
 0x28d   : > { %v2222_v17 = vadd.f32 %v2221_v62, %v2173_v59  ;;  %2515 = vmatmul.bf16.gmra.mxu0 %v2288_v29  ;;  %2613 = vmatmul.bf16.gmra.mxu2 %v2288_v29  ;;  %v5855_v59 = vld [vmem:[#allocation2 + $0x340] sm:$0xf]  ;;  %v6555_v29 = vld [vmem:[#allocation2 + $0x344] sm:$0xf0] }
 0x28e   : > { %v2126_v0 = vpop.f32.mrf.mxu1  ;;  %v2175_v1 = vpop.f32.mrf.mxu2  ;;  %3096 = vmatpush.bf16.msrb.mxu3 %v5924_v56  ;;  %v5856_v61 = vor.u32 %v6555_v29, %v5855_v59  ;;  %v5919_v62 = vld [vmem:[#allocation2 + $0x3c0] sm:$0xf]  ;;  %v5905_v59 = vld [vmem:[#allocation2 + $0x3a8] sm:$0xf0] }
 0x28f   : > { %v2261_v4 = vmax.f32 %v2222_v17, 0.0  ;;  %v2127_v11 = vadd.f32 %v2126_v0, %v2078_v26  ;;  %v2176_v21 = vadd.f32 %v2175_v1, %v7197_v6  ;;  %v6571_v17 = vld [vmem:[#allocation2 + $0x3c4] sm:$0xf0] }
 0x290   : > { %v2079_v5 = vpop.f32.mrf.mxu0  ;;  %2949 = vmatpush.bf16.msra.mxu0 %v5856_v61 }
 0x291   : > { %v2289_v42 = vpack.c.bf16 %v2261_v4, %v2259_v3  ;;  %v2080_v19 = vadd.f32 %v2079_v5, %v7194_v63  ;;  %v2262_v20 = vmax.f32 %v2127_v11, 0.0  ;;  %v5920_v4 = vor.u32 %v6571_v17, %v5919_v62 }
 0x293   : > { %2564 = vmatmul.bf16.gmra.mxu1 %v2289_v42  ;;  %2662 = vmatmul.bf16.gmra.mxu3 %v2289_v42 }
 0x294   : > { %v2224_v8 = vpop.f32.mrf.mxu3  ;;  %2998 = vmatpush.bf16.msra.mxu1 %v5920_v4 }
 0x295   : > { %v2225_v60 = vadd.f32 %v2224_v8, %v2176_v21 }
 0x296   : > { %v2128_v12 = vpop.f32.mrf.mxu1  ;;  %v2177_v13 = vpop.f32.mrf.mxu2 }
 0x297   : > { %v2129_v14 = vadd.f32 %v2128_v12, %v2080_v19  ;;  %v2178_v28 = vadd.f32 %v2177_v13, %v7197_v6  ;;  %v2263_v36 = vmax.f32 %v2225_v60, 0.0  ;;  %v6552_v12 = vld [vmem:[#allocation2 + $0x334] sm:$0xf]  ;;  %v5849_v13 = vld [vmem:[#allocation2 + $0x338] sm:$0xf0] }
 0x298   : > { %v2082_v2 = vpop.f32.mrf.mxu0  ;;  %v5852_v18 = vor.u32 %v6552_v12, %v5849_v13 }
 0x299   : > { %v2264_v10 = vmax.f32 %v2129_v14, 0.0  ;;  %v2083_v41 = vadd.f32 %v2082_v2, %v7194_v63 }
 0x29a   : > { %3048 = vmatpush.bf16.msrb.mxu2 %v5852_v18 }
 0x29b   : > { %v2290_v30 = vpack.c.bf16 %v2264_v10, %v2262_v20  ;;  %v6568_v10 = vld [vmem:[#allocation2 + $0x3b4] sm:$0xf] }
 0x29c   : > { %v2226_v32 = vpop.f32.mrf.mxu3  ;;  %v5916_v24 = vor.u32 %v6568_v10, %v5913_v22 }
 0x29d   : > { %v2227_v16 = vadd.f32 %v2226_v32, %v2178_v28  ;;  %2520 = vmatmul.bf16.gmra.mxu0 %v2290_v30  ;;  %2618 = vmatmul.bf16.gmra.mxu2 %v2290_v30  ;;  %v5847_v28 = vld [vmem:[#allocation2 + $0x330] sm:$0xf]  ;;  %v6553_v30 = vld [vmem:[#allocation2 + $0x334] sm:$0xf0] }
 0x29e   : > { %v2131_v35 = vpop.f32.mrf.mxu1  ;;  %v2180_v55 = vpop.f32.mrf.mxu2  ;;  %3097 = vmatpush.bf16.msrb.mxu3 %v5916_v24  ;;  %v5848_v34 = vor.u32 %v6553_v30, %v5847_v28  ;;  %v5911_v32 = vld [vmem:[#allocation2 + $0x3b0] sm:$0xf] }
 0x29f   : > { %v2265_v38 = vmax.f32 %v2227_v16, 0.0  ;;  %v2132_v48 = vadd.f32 %v2131_v35, %v2083_v41  ;;  %v2181_v57 = vadd.f32 %v2180_v55, %v7197_v6  ;;  %v6569_v16 = vld [vmem:[#allocation2 + $0x3b4] sm:$0xf0]  ;;  %v5831_v24 = vld [vmem:[#allocation2 + $0x310] sm:$0xf] }
 0x2a0   : > { %v2084_v47 = vpop.f32.mrf.mxu0  ;;  %2950 = vmatpush.bf16.msra.mxu0 %v5848_v34  ;;  %v5895_v34 = vld [vmem:[#allocation2 + $0x390] sm:$0xf] }
 0x2a1   : > { %v2291_v23 = vpack.c.bf16 %v2265_v38, %v2263_v36  ;;  %v2085_v45 = vadd.f32 %v2084_v47, %v7194_v63  ;;  %v2266_v50 = vmax.f32 %v2132_v48, 0.0  ;;  %v5912_v38 = vor.u32 %v6569_v16, %v5911_v32  ;;  %v6565_v32 = vld [vmem:[#allocation2 + $0x394] sm:$0xf0] }
 0x2a3   : > { %2569 = vmatmul.bf16.gmra.mxu1 %v2291_v23  ;;  %2667 = vmatmul.bf16.gmra.mxu3 %v2291_v23 }
 0x2a4   : > { %v2229_v43 = vpop.f32.mrf.mxu3  ;;  %2999 = vmatpush.bf16.msra.mxu1 %v5912_v38 }
 0x2a5   : > { %v2230_v0 = vadd.f32 %v2229_v43, %v2181_v57 }
 0x2a6   : > { %v2133_v44 = vpop.f32.mrf.mxu1  ;;  %v2182_v49 = vpop.f32.mrf.mxu2 }
 0x2a7   : > { %v2134_v51 = vadd.f32 %v2133_v44, %v2085_v45  ;;  %v2183_v1 = vadd.f32 %v2182_v49, %v7197_v6  ;;  %v2267_v7 = vmax.f32 %v2230_v0, 0.0  ;;  %v6550_v44 = vld [vmem:[#allocation2 + $0x324] sm:$0xf]  ;;  %v5841_v49 = vld [vmem:[#allocation2 + $0x328] sm:$0xf0] }
 0x2a8   : > { %v2087_v54 = vpop.f32.mrf.mxu0  ;;  %v5844_v40 = vor.u32 %v6550_v44, %v5841_v49 }
 0x2a9   : > { %v2268_v58 = vmax.f32 %v2134_v51, 0.0  ;;  %v2088_v19 = vadd.f32 %v2087_v54, %v7194_v63 }
 0x2aa   : > { %3049 = vmatpush.bf16.msrb.mxu2 %v5844_v40 }
 0x2ab   : > { %v2292_v3 = vpack.c.bf16 %v2268_v58, %v2266_v50  ;;  %v6566_v58 = vld [vmem:[#allocation2 + $0x3a4] sm:$0xf] }
 0x2ac   : > { %v2231_v5 = vpop.f32.mrf.mxu3  ;;  %v5908_v61 = vor.u32 %v6566_v58, %v5905_v59 }
 0x2ad   : > { %v2232_v42 = vadd.f32 %v2231_v5, %v2183_v1  ;;  %2525 = vmatmul.bf16.gmra.mxu0 %v2292_v3  ;;  %2623 = vmatmul.bf16.gmra.mxu2 %v2292_v3  ;;  %v5839_v1 = vld [vmem:[#allocation2 + $0x320] sm:$0xf]  ;;  %v6551_v3 = vld [vmem:[#allocation2 + $0x324] sm:$0xf0] }
 0x2ae   : > { %v2136_v26 = vpop.f32.mrf.mxu1  ;;  %v2185_v39 = vpop.f32.mrf.mxu2  ;;  %3098 = vmatpush.bf16.msrb.mxu3 %v5908_v61  ;;  %v5840_v4 = vor.u32 %v6551_v3, %v5839_v1  ;;  %v5903_v5 = vld [vmem:[#allocation2 + $0x3a0] sm:$0xf] }
 0x2af   : > { %v2269_v8 = vmax.f32 %v2232_v42, 0.0  ;;  %v2137_v15 = vadd.f32 %v2136_v26, %v2088_v19  ;;  %v2186_v27 = vadd.f32 %v2185_v39, %v7197_v6  ;;  %v6567_v42 = vld [vmem:[#allocation2 + $0x3a4] sm:$0xf0] }
 0x2b0   : > { %v2089_v9 = vpop.f32.mrf.mxu0  ;;  %2951 = vmatpush.bf16.msra.mxu0 %v5840_v4 }
 0x2b1   : > { %v2293_v11 = vpack.c.bf16 %v2269_v8, %v2267_v7  ;;  %v2090_v2 = vadd.f32 %v2089_v9, %v7194_v63  ;;  %v2270_v25 = vmax.f32 %v2137_v15, 0.0  ;;  %v5904_v8 = vor.u32 %v6567_v42, %v5903_v5 }
 0x2b3   : > { %2574 = vmatmul.bf16.gmra.mxu1 %v2293_v11  ;;  %2672 = vmatmul.bf16.gmra.mxu3 %v2293_v11 }
 0x2b4   : > { %v2234_v14 = vpop.f32.mrf.mxu3  ;;  %3000 = vmatpush.bf16.msra.mxu1 %v5904_v8 }
 0x2b5   : > { %v2235_v35 = vadd.f32 %v2234_v14, %v2186_v27 }
 0x2b6   : > { %v2138_v31 = vpop.f32.mrf.mxu1  ;;  %v2187_v20 = vpop.f32.mrf.mxu2 }
 0x2b7   : > { %v2139_v21 = vadd.f32 %v2138_v31, %v2090_v2  ;;  %v2188_v55 = vadd.f32 %v2187_v20, %v7197_v6  ;;  %v2271_v52 = vmax.f32 %v2235_v35, 0.0  ;;  %v6548_v31 = vld [vmem:[#allocation2 + $0x314] sm:$0xf]  ;;  %v5833_v20 = vld [vmem:[#allocation2 + $0x318] sm:$0xf0] }
 0x2b8   : > { %v2092_v33 = vpop.f32.mrf.mxu0  ;;  %v5836_v22 = vor.u32 %v6548_v31, %v5833_v20 }
 0x2b9   : > { %v2272_v60 = vmax.f32 %v2139_v21, 0.0  ;;  %v2093_v45 = vadd.f32 %v2092_v33, %v7194_v63  ;;  %v6564_v21 = vld [vmem:[#allocation2 + $0x394] sm:$0xf]  ;;  %v5897_v33 = vld [vmem:[#allocation2 + $0x398] sm:$0xf0] }
 0x2ba   : > { %v5900_v28 = vor.u32 %v6564_v21, %v5897_v33  ;;  %3050 = vmatpush.bf16.msrb.mxu2 %v5836_v22 }
 0x2bb   : > { %v2294_v36 = vpack.c.bf16 %v2272_v60, %v2270_v25  ;;  %v6549_v25 = vld [vmem:[#allocation2 + $0x314] sm:$0xf0] }
 0x2bc   : > { %v2236_v47 = vpop.f32.mrf.mxu3  ;;  %v5832_v30 = vor.u32 %v6549_v25, %v5831_v24  ;;  %3099 = vmatpush.bf16.msrb.mxu3 %v5900_v28  ;;  %v6592_v24 = vld [vmem:[#allocation2 + $0x474] sm:$0xf]  ;;  %v6010_v25 = vld [vmem:[#allocation2 + $0x478] sm:$0xf0] }
 0x2bd   : > { %v2237_v23 = vadd.f32 %v2236_v47, %v2188_v55  ;;  %2530 = vmatmul.bf16.gmra.mxu0 %v2294_v36  ;;  %2628 = vmatmul.bf16.gmra.mxu2 %v2294_v36  ;;  %v5896_v55 = vor.u32 %v6565_v32, %v5895_v34 }
 0x2be   : > { %v2141_v41 = vpop.f32.mrf.mxu1  ;;  %v2190_v37 = vpop.f32.mrf.mxu2  ;;  %2952 = vmatpush.bf16.msra.mxu0 %v5832_v30 }
 0x2bf   : > { %v2273_v43 = vmax.f32 %v2237_v23, 0.0  ;;  %v2142_v53 = vadd.f32 %v2141_v41, %v2093_v45  ;;  %v2191_v17 = vadd.f32 %v2190_v37, %v7197_v6  ;;  %3001 = vmatpush.bf16.msra.mxu1 %v5896_v55  ;;  %v6608_v55 = vld [vmem:[#allocation2 + $0x4f4] sm:$0xf] }
 0x2c0   : > { %v2094_v46 = vpop.f32.mrf.mxu0 }
 0x2c1   : > { %v2295_v48 = vpack.c.bf16 %v2273_v43, %v2271_v52  ;;  %v2095_v54 = vadd.f32 %v2094_v46, %v7194_v63  ;;  %v2274_v62 = vmax.f32 %v2142_v53, 0.0 }
 0x2c3   : > { %2579 = vmatmul.bf16.gmra.mxu1 %v2295_v48  ;;  %2677 = vmatmul.bf16.gmra.mxu3 %v2295_v48 }
 0x2c4   : > { %v2239_v51 = vpop.f32.mrf.mxu3 }
 0x2c5   : > { %v2240_v26 = vadd.f32 %v2239_v51, %v2191_v17 }
 0x2c6   : > { %v2143_v56 = vpop.f32.mrf.mxu1  ;;  %v2192_v50 = vpop.f32.mrf.mxu2 }
 0x2c7   : > { %v2144_v57 = vadd.f32 %v2143_v56, %v2095_v54  ;;  %v2193_v39 = vadd.f32 %v2192_v50, %v7197_v6  ;;  %v2275_v13 = vmax.f32 %v2240_v26, 0.0  ;;  %v6546_v56 = vld [vmem:[#allocation2 + $0x304] sm:$0xf]  ;;  %v5825_v50 = vld [vmem:[#allocation2 + $0x308] sm:$0xf0] }
 0x2c8   : > { %v2097_v29 = vpop.f32.mrf.mxu0  ;;  %v5828_v59 = vor.u32 %v6546_v56, %v5825_v50  ;;  %v5823_v26 = vld [vmem:[#allocation2 + $0x300] sm:$0xf] }
 0x2c9   : > { %v2276_v0 = vmax.f32 %v2144_v57, 0.0  ;;  %v2098_v2 = vadd.f32 %v2097_v29, %v7194_v63  ;;  %v6562_v57 = vld [vmem:[#allocation2 + $0x384] sm:$0xf]  ;;  %v5889_v29 = vld [vmem:[#allocation2 + $0x388] sm:$0xf0] }
 0x2ca   : > { %v5892_v17 = vor.u32 %v6562_v57, %v5889_v29  ;;  %3051 = vmatpush.bf16.msrb.mxu2 %v5828_v59 }
 0x2cb   : > { %v2296_v7 = vpack.c.bf16 %v2276_v0, %v2274_v62 }
 0x2cc   : > { %v2241_v9 = vpop.f32.mrf.mxu3  ;;  %3100 = vmatpush.bf16.msrb.mxu3 %v5892_v17  ;;  %v6002_v17 = vld [vmem:[#allocation2 + $0x468] sm:$0xf0] }
 0x2cd   : > { %v2242_v11 = vadd.f32 %v2241_v9, %v2193_v39  ;;  %2535 = vmatmul.bf16.gmra.mxu0 %v2296_v7  ;;  %2633 = vmatmul.bf16.gmra.mxu2 %v2296_v7  ;;  %v6547_v39 = vld [vmem:[#allocation2 + $0x304] sm:$0xf0] }
 0x2ce   : > { %v2146_v19 = vpop.f32.mrf.mxu1  ;;  %v2195_v12 = vpop.f32.mrf.mxu2  ;;  %v5824_v7 = vor.u32 %v6547_v39, %v5823_v26  ;;  %v6606_v39 = vld [vmem:[#allocation2 + $0x4e4] sm:$0xf] }
 0x2cf   : > { %v2277_v14 = vmax.f32 %v2242_v11, 0.0  ;;  %v2147_v27 = vadd.f32 %v2146_v19, %v2098_v2  ;;  %v2196_v23 = vadd.f32 %v2195_v12, %v7197_v6  ;;  %v5887_v12 = vld [vmem:[#allocation2 + $0x380] sm:$0xf] }
 0x2d0   : > { %v2099_v18 = vpop.f32.mrf.mxu0  ;;  %2953 = vmatpush.bf16.msra.mxu0 %v5824_v7  ;;  %v6066_v7 = vld [vmem:[#allocation2 + $0x4e8] sm:$0xf0] }
 0x2d1   : > { %v2297_v15 = vpack.c.bf16 %v2277_v14, %v2275_v13  ;;  %v2100_v60 = vadd.f32 %v2099_v18, %v7194_v63  ;;  %v2278_v47 = vmax.f32 %v2147_v27, 0.0  ;;  %v6563_v13 = vld [vmem:[#allocation2 + $0x384] sm:$0xf0] }
 0x2d2   : > { %v5888_v14 = vor.u32 %v6563_v13, %v5887_v12  ;;  %v6000_v12 = vld [vmem:[#allocation2 + $0x460] sm:$0xf]  ;;  %v6591_v13 = vld [vmem:[#allocation2 + $0x464] sm:$0xf0] }
 0x2d3   : > { %2584 = vmatmul.bf16.gmra.mxu1 %v2297_v15  ;;  %2682 = vmatmul.bf16.gmra.mxu3 %v2297_v15 }
 0x2d4   : > { %v2244_v10 = vpop.f32.mrf.mxu3  ;;  %3002 = vmatpush.bf16.msra.mxu1 %v5888_v14  ;;  %v6001_v14 = vor.u32 %v6591_v13, %v6000_v12  ;;  %v6050_v12 = vld [vmem:[#allocation2 + $0x4c8] sm:$0xf0] }
 0x2d5   : > { %v2245_v37 = vadd.f32 %v2244_v10, %v2196_v23 }
 0x2d6   : > { %v2148_v16 = vpop.f32.mrf.mxu1  ;;  %v2197_v35 = vpop.f32.mrf.mxu2 }
 0x2d7   : > { %v2149_v36 = vadd.f32 %v2148_v16, %v2100_v60  ;;  %v2198_v52 = vadd.f32 %v2197_v35, %v7197_v6  ;;  %v2279_v49 = vmax.f32 %v2245_v37, 0.0  ;;  %v6013_v60 = vor.u32 %v6592_v24, %v6010_v25 }
 0x2d8   : > { %v2102_v38 = vpop.f32.mrf.mxu0 }
 0x2d9   : > { %v2280_v41 = vmax.f32 %v2149_v36, 0.0  ;;  %v2103_v54 = vadd.f32 %v2102_v38, %v7194_v63  ;;  %3488 = vmatpush.bf16.msra.mxu2 %v6013_v60  ;;  %v6074_v36 = vld [vmem:[#allocation2 + $0x4f8] sm:$0xf0] }
 0x2db   : > { %v2298_v43 = vpack.c.bf16 %v2280_v41, %v2278_v47  ;;  %v6077_v47 = vor.u32 %v6608_v55, %v6074_v36 }
 0x2dc   : > { %v2246_v46 = vpop.f32.mrf.mxu3 }
 0x2dd   : > { %v2247_v48 = vadd.f32 %v2246_v46, %v2198_v52  ;;  %2540 = vmatmul.bf16.gmra.mxu0 %v2298_v43  ;;  %2638 = vmatmul.bf16.gmra.mxu2 %v2298_v43  ;;  %v6008_v52 = vld [vmem:[#allocation2 + $0x470] sm:$0xf]  ;;  %v6593_v43 = vld [vmem:[#allocation2 + $0x474] sm:$0xf0] }
 0x2de   : > { %v2151_v45 = vpop.f32.mrf.mxu1  ;;  %v2200_v44 = vpop.f32.mrf.mxu2  ;;  %3537 = vmatpush.bf16.msra.mxu3 %v6077_v47  ;;  %v6009_v46 = vor.u32 %v6593_v43, %v6008_v52  ;;  %v6058_v52 = vld [vmem:[#allocation2 + $0x4d8] sm:$0xf0] }
 0x2df   : > { %v2281_v51 = vmax.f32 %v2247_v48, 0.0  ;;  %v2152_v61 = vadd.f32 %v2151_v45, %v2103_v54  ;;  %v2201_v5 = vadd.f32 %v2200_v44, %v7197_v6  ;;  %v6072_v48 = vld [vmem:[#allocation2 + $0x4f0] sm:$0xf]  ;;  %v6609_v45 = vld [vmem:[#allocation2 + $0x4f4] sm:$0xf0] }
 0x2e0   : > { %v2104_v53 = vpop.f32.mrf.mxu0  ;;  %3390 = vmatpush.bf16.msrb.mxu0 %v6009_v46 }
 0x2e1   : > { %v2299_v40 = vpack.c.bf16 %v2281_v51, %v2279_v49  ;;  %v2105_v62 = vadd.f32 %v2104_v53, %v7194_v63  ;;  %v2282_v4 = vmax.f32 %v2152_v61, 0.0 }
 0x2e3   : > { %2589 = vmatmul.bf16.gmra.mxu1 %v2299_v40  ;;  %2687 = vmatmul.bf16.gmra.mxu3 %v2299_v40  ;;  %v6073_v40 = vor.u32 %v6609_v45, %v6072_v48 }
 0x2e4   : > { %v2249_v58 = vpop.f32.mrf.mxu3  ;;  %3391 = vmatpush.bf16.msrb.mxu0 %v6001_v14 }
 0x2e5   : > { %v2250_v8 = vadd.f32 %v2249_v58, %v2201_v5  ;;  %3439 = vmatpush.bf16.msrb.mxu1 %v6073_v40 }
 0x2e6   : > { %v2153_v0 = vpop.f32.mrf.mxu1  ;;  %v2202_v3 = vpop.f32.mrf.mxu2 }
 0x2e7   : > { %v2154_v1 = vadd.f32 %v2153_v0, %v2105_v62  ;;  %v2203_v9 = vadd.f32 %v2202_v3, %v7197_v6  ;;  %v2283_v18 = vmax.f32 %v2250_v8, 0.0  ;;  %v5691_v6 = vld [vmem:[%s7686_s7 + $0x2] ss:$8 sm:$0x3]  ;;  %v6590_v62 = vld [vmem:[#allocation2 + $0x464] sm:$0xf] }
 0x2e8   : > { %v7233_v10 = vperm.slane %v5691_v6, 0  ;;  %v7236_v30 = vperm.slane %v5691_v6, 1 }
 0x2e9   : > { %v2284_v42 = vmax.f32 %v2154_v1, 0.0  ;;  %v6005_v1 = vor.u32 %v6590_v62, %v6002_v17 }
 0x2eb   : > { %v2300_v11 = vpack.c.bf16 %v2284_v42, %v2282_v4  ;;  %3489 = vmatpush.bf16.msra.mxu2 %v6005_v1 }
 0x2ec   : > { %v2251_v19 = vpop.f32.mrf.mxu3 }
 0x2ed   : > { %v2252_v63 = vadd.f32 %v2251_v19, %v2203_v9  ;;  %2545 = vmatmul.bf16.gmra.mxu0 %v2300_v11  ;;  %2643 = vmatmul.bf16.gmra.mxu2 %v2300_v11  ;;  %v6069_v9 = vor.u32 %v6606_v39, %v6066_v7 }
 0x2ef   : > { %v2285_v15 = vmax.f32 %v2252_v63, 0.0  ;;  %3538 = vmatpush.bf16.msra.mxu3 %v6069_v9 }
 0x2f1   : > { %v2301_v2 = vpack.c.bf16 %v2285_v15, %v2283_v18  ;;  %v6064_v18 = vld [vmem:[#allocation2 + $0x4e0] sm:$0xf]  ;;  %v6607_v15 = vld [vmem:[#allocation2 + $0x4e4] sm:$0xf0] }
 0x2f3   : > { %2594 = vmatmul.bf16.gmra.mxu1 %v2301_v2  ;;  %2692 = vmatmul.bf16.gmra.mxu3 %v2301_v2 }
 0x2fa   : > { %v2511_v31 = vpop.f32.mrf.mxu0 }
 0x2fb   : > { %v2512_v33 = vadd.f32 %v2511_v31, %v7233_v10 }
 0x300   : > { %v2560_v20 = vpop.f32.mrf.mxu1  ;;  %v2609_v21 = vpop.f32.mrf.mxu2 }
 0x301   : > { %v2561_v28 = vadd.f32 %v2560_v20, %v2512_v33  ;;  %v2610_v41 = vadd.f32 %v2609_v21, %v7236_v30  ;;  %v6065_v20 = vor.u32 %v6607_v15, %v6064_v18 }
 0x302   : > { %v2513_v22 = vpop.f32.mrf.mxu0 }
 0x303   : > { %v2514_v34 = vadd.f32 %v2513_v22, %v7233_v10  ;;  %v2698_v23 = vmax.f32 %v2561_v28, 0.0  ;;  %3440 = vmatpush.bf16.msrb.mxu1 %v6065_v20 }
 0x306   : > { %v2658_v27 = vpop.f32.mrf.mxu3 }
 0x307   : > { %v2659_v44 = vadd.f32 %v2658_v27, %v2610_v41 }
 0x308   : > { %v2562_v32 = vpop.f32.mrf.mxu1  ;;  %v2611_v16 = vpop.f32.mrf.mxu2 }
 0x309   : > { %v2563_v35 = vadd.f32 %v2562_v32, %v2514_v34  ;;  %v2612_v51 = vadd.f32 %v2611_v16, %v7236_v30  ;;  %v2699_v57 = vmax.f32 %v2659_v44, 0.0  ;;  %v6588_v32 = vld [vmem:[#allocation2 + $0x454] sm:$0xf]  ;;  %v5994_v16 = vld [vmem:[#allocation2 + $0x458] sm:$0xf0] }
 0x30a   : > { %v2516_v38 = vpop.f32.mrf.mxu0  ;;  %v5997_v55 = vor.u32 %v6588_v32, %v5994_v16 }
 0x30b   : > { %v2700_v37 = vmax.f32 %v2563_v35, 0.0  ;;  %v2517_v61 = vadd.f32 %v2516_v38, %v7233_v10 }
 0x30c   : > { %3490 = vmatpush.bf16.msra.mxu2 %v5997_v55 }
 0x30d   : > { %v2730_v49 = vpack.c.bf16 %v2700_v37, %v2698_v23  ;;  %v6604_v37 = vld [vmem:[#allocation2 + $0x4d4] sm:$0xf] }
 0x30e   : > { %v2660_v53 = vpop.f32.mrf.mxu3  ;;  %v6061_v46 = vor.u32 %v6604_v37, %v6058_v52 }
 0x30f   : > { %v2661_v54 = vadd.f32 %v2660_v53, %v2612_v51  ;;  %2954 = vmatmul.bf16.vlgmr.msra.gmra.mxu0 %v2730_v49  ;;  %3052 = vmatmul.bf16.vlgmr.msrb.gmra.mxu2 %v2730_v49  ;;  %v5992_v49 = vld [vmem:[#allocation2 + $0x450] sm:$0xf]  ;;  %v6589_v51 = vld [vmem:[#allocation2 + $0x454] sm:$0xf0] }
 0x310   : > { %v2565_v56 = vpop.f32.mrf.mxu1  ;;  %v2614_v50 = vpop.f32.mrf.mxu2  ;;  %3539 = vmatpush.bf16.msra.mxu3 %v6061_v46  ;;  %v5993_v40 = vor.u32 %v6589_v51, %v5992_v49  ;;  %v6056_v53 = vld [vmem:[#allocation2 + $0x4d0] sm:$0xf]  ;;  %v6042_v49 = vld [vmem:[#allocation2 + $0x4b8] sm:$0xf0] }
 0x311   : > { %v2701_v58 = vmax.f32 %v2661_v54, 0.0  ;;  %v2566_v3 = vadd.f32 %v2565_v56, %v2517_v61  ;;  %v2615_v19 = vadd.f32 %v2614_v50, %v7236_v30  ;;  %v6605_v54 = vld [vmem:[#allocation2 + $0x4d4] sm:$0xf0] }
 0x312   : > { %v2518_v59 = vpop.f32.mrf.mxu0  ;;  %3392 = vmatpush.bf16.msrb.mxu0 %v5993_v40 }
 0x313   : > { %v2731_v29 = vpack.c.bf16 %v2701_v58, %v2699_v57  ;;  %v2519_v4 = vadd.f32 %v2518_v59, %v7233_v10  ;;  %v2702_v11 = vmax.f32 %v2566_v3, 0.0  ;;  %v6057_v58 = vor.u32 %v6605_v54, %v6056_v53 }
 0x315   : > { %3003 = vmatmul.bf16.vlgmr.msra.gmra.mxu1 %v2731_v29  ;;  %3101 = vmatmul.bf16.vlgmr.msrb.gmra.mxu3 %v2731_v29 }
 0x316   : > { %v2663_v0 = vpop.f32.mrf.mxu3  ;;  %3441 = vmatpush.bf16.msrb.mxu1 %v6057_v58 }
 0x317   : > { %v2664_v2 = vadd.f32 %v2663_v0, %v2615_v19 }
 0x318   : > { %v2567_v5 = vpop.f32.mrf.mxu1  ;;  %v2616_v42 = vpop.f32.mrf.mxu2 }
 0x319   : > { %v2568_v26 = vadd.f32 %v2567_v5, %v2519_v4  ;;  %v2617_v31 = vadd.f32 %v2616_v42, %v7236_v30  ;;  %v2703_v25 = vmax.f32 %v2664_v2, 0.0  ;;  %v6586_v5 = vld [vmem:[#allocation2 + $0x444] sm:$0xf]  ;;  %v5986_v42 = vld [vmem:[#allocation2 + $0x448] sm:$0xf0] }
 0x31a   : > { %v2521_v8 = vpop.f32.mrf.mxu0  ;;  %v5989_v39 = vor.u32 %v6586_v5, %v5986_v42 }
 0x31b   : > { %v2704_v63 = vmax.f32 %v2568_v26, 0.0  ;;  %v2522_v34 = vadd.f32 %v2521_v8, %v7233_v10 }
 0x31c   : > { %3491 = vmatpush.bf16.msra.mxu2 %v5989_v39 }
 0x31d   : > { %v2732_v6 = vpack.c.bf16 %v2704_v63, %v2702_v11  ;;  %v6602_v63 = vld [vmem:[#allocation2 + $0x4c4] sm:$0xf] }
 0x31e   : > { %v2665_v21 = vpop.f32.mrf.mxu3  ;;  %v6053_v14 = vor.u32 %v6602_v63, %v6050_v12 }
 0x31f   : > { %v2666_v22 = vadd.f32 %v2665_v21, %v2617_v31  ;;  %2959 = vmatmul.bf16.gmra.mxu0 %v2732_v6  ;;  %3057 = vmatmul.bf16.gmra.mxu2 %v2732_v6  ;;  %v5984_v31 = vld [vmem:[#allocation2 + $0x440] sm:$0xf]  ;;  %v6587_v6 = vld [vmem:[#allocation2 + $0x444] sm:$0xf0] }
 0x320   : > { %v2570_v33 = vpop.f32.mrf.mxu1  ;;  %v2619_v24 = vpop.f32.mrf.mxu2  ;;  %3540 = vmatpush.bf16.msra.mxu3 %v6053_v14  ;;  %v5985_v20 = vor.u32 %v6587_v6, %v5984_v31  ;;  %v6048_v21 = vld [vmem:[#allocation2 + $0x4c0] sm:$0xf]  ;;  %v6034_v31 = vld [vmem:[#allocation2 + $0x4a8] sm:$0xf0] }
 0x321   : > { %v2705_v27 = vmax.f32 %v2666_v22, 0.0  ;;  %v2571_v36 = vadd.f32 %v2570_v33, %v2522_v34  ;;  %v2620_v45 = vadd.f32 %v2619_v24, %v7236_v30  ;;  %v6603_v22 = vld [vmem:[#allocation2 + $0x4c4] sm:$0xf0] }
 0x322   : > { %v2523_v60 = vpop.f32.mrf.mxu0  ;;  %3393 = vmatpush.bf16.msrb.mxu0 %v5985_v20 }
 0x323   : > { %v2733_v28 = vpack.c.bf16 %v2705_v27, %v2703_v25  ;;  %v2524_v38 = vadd.f32 %v2523_v60, %v7233_v10  ;;  %v2706_v48 = vmax.f32 %v2571_v36, 0.0  ;;  %v6049_v27 = vor.u32 %v6603_v22, %v6048_v21 }
 0x325   : > { %3008 = vmatmul.bf16.gmra.mxu1 %v2733_v28  ;;  %3106 = vmatmul.bf16.gmra.mxu3 %v2733_v28 }
 0x326   : > { %v2668_v35 = vpop.f32.mrf.mxu3  ;;  %3442 = vmatpush.bf16.msrb.mxu1 %v6049_v27 }
 0x327   : > { %v2669_v56 = vadd.f32 %v2668_v35, %v2620_v45 }
 0x328   : > { %v2572_v47 = vpop.f32.mrf.mxu1  ;;  %v2621_v23 = vpop.f32.mrf.mxu2 }
 0x329   : > { %v2573_v41 = vadd.f32 %v2572_v47, %v2524_v38  ;;  %v2622_v50 = vadd.f32 %v2621_v23, %v7236_v30  ;;  %v2707_v17 = vmax.f32 %v2669_v56, 0.0  ;;  %v6584_v47 = vld [vmem:[#allocation2 + $0x434] sm:$0xf]  ;;  %v5978_v23 = vld [vmem:[#allocation2 + $0x438] sm:$0xf0] }
 0x32a   : > { %v2526_v43 = vpop.f32.mrf.mxu0  ;;  %v5981_v37 = vor.u32 %v6584_v47, %v5978_v23 }
 0x32b   : > { %v2708_v44 = vmax.f32 %v2573_v41, 0.0  ;;  %v2527_v4 = vadd.f32 %v2526_v43, %v7233_v10 }
 0x32c   : > { %3492 = vmatpush.bf16.msra.mxu2 %v5981_v37 }
 0x32d   : > { %v2734_v57 = vpack.c.bf16 %v2708_v44, %v2706_v48  ;;  %v6600_v44 = vld [vmem:[#allocation2 + $0x4b4] sm:$0xf] }
 0x32e   : > { %v2670_v59 = vpop.f32.mrf.mxu3  ;;  %v6045_v40 = vor.u32 %v6600_v44, %v6042_v49 }
 0x32f   : > { %v2671_v29 = vadd.f32 %v2670_v59, %v2622_v50  ;;  %2964 = vmatmul.bf16.gmra.mxu0 %v2734_v57  ;;  %3062 = vmatmul.bf16.gmra.mxu2 %v2734_v57  ;;  %v5976_v50 = vld [vmem:[#allocation2 + $0x430] sm:$0xf]  ;;  %v6585_v57 = vld [vmem:[#allocation2 + $0x434] sm:$0xf0] }
 0x330   : > { %v2575_v61 = vpop.f32.mrf.mxu1  ;;  %v2624_v62 = vpop.f32.mrf.mxu2  ;;  %3541 = vmatpush.bf16.msra.mxu3 %v6045_v40  ;;  %v5977_v58 = vor.u32 %v6585_v57, %v5976_v50  ;;  %v6040_v59 = vld [vmem:[#allocation2 + $0x4b0] sm:$0xf] }
 0x331   : > { %v2709_v0 = vmax.f32 %v2671_v29, 0.0  ;;  %v2576_v7 = vadd.f32 %v2575_v61, %v2527_v4  ;;  %v2625_v15 = vadd.f32 %v2624_v62, %v7236_v30  ;;  %v6601_v29 = vld [vmem:[#allocation2 + $0x4b4] sm:$0xf0]  ;;  %v5960_v40 = vld [vmem:[#allocation2 + $0x410] sm:$0xf] }
 0x332   : > { %v2528_v1 = vpop.f32.mrf.mxu0  ;;  %3394 = vmatpush.bf16.msrb.mxu0 %v5977_v58  ;;  %v6024_v58 = vld [vmem:[#allocation2 + $0x490] sm:$0xf] }
 0x333   : > { %v2735_v3 = vpack.c.bf16 %v2709_v0, %v2707_v17  ;;  %v2529_v8 = vadd.f32 %v2528_v1, %v7233_v10  ;;  %v2710_v18 = vmax.f32 %v2576_v7, 0.0  ;;  %v6041_v0 = vor.u32 %v6601_v29, %v6040_v59  ;;  %v6597_v59 = vld [vmem:[#allocation2 + $0x494] sm:$0xf0] }
 0x335   : > { %3013 = vmatmul.bf16.gmra.mxu1 %v2735_v3  ;;  %3111 = vmatmul.bf16.gmra.mxu3 %v2735_v3 }
 0x336   : > { %v2673_v26 = vpop.f32.mrf.mxu3  ;;  %3443 = vmatpush.bf16.msrb.mxu1 %v6041_v0 }
 0x337   : > { %v2674_v33 = vadd.f32 %v2673_v26, %v2625_v15 }
 0x338   : > { %v2577_v9 = vpop.f32.mrf.mxu1  ;;  %v2626_v11 = vpop.f32.mrf.mxu2 }
 0x339   : > { %v2578_v19 = vadd.f32 %v2577_v9, %v2529_v8  ;;  %v2627_v24 = vadd.f32 %v2626_v11, %v7236_v30  ;;  %v2711_v16 = vmax.f32 %v2674_v33, 0.0  ;;  %v6582_v9 = vld [vmem:[#allocation2 + $0x424] sm:$0xf]  ;;  %v5970_v11 = vld [vmem:[#allocation2 + $0x428] sm:$0xf0] }
 0x33a   : > { %v2531_v13 = vpop.f32.mrf.mxu0  ;;  %v5973_v63 = vor.u32 %v6582_v9, %v5970_v11 }
 0x33b   : > { %v2712_v2 = vmax.f32 %v2578_v19, 0.0  ;;  %v2532_v38 = vadd.f32 %v2531_v13, %v7233_v10 }
 0x33c   : > { %3493 = vmatpush.bf16.msra.mxu2 %v5973_v63 }
 0x33d   : > { %v2736_v25 = vpack.c.bf16 %v2712_v2, %v2710_v18  ;;  %v6598_v2 = vld [vmem:[#allocation2 + $0x4a4] sm:$0xf] }
 0x33e   : > { %v2675_v60 = vpop.f32.mrf.mxu3  ;;  %v6037_v20 = vor.u32 %v6598_v2, %v6034_v31 }
 0x33f   : > { %v2676_v28 = vadd.f32 %v2675_v60, %v2627_v24  ;;  %2969 = vmatmul.bf16.gmra.mxu0 %v2736_v25  ;;  %3067 = vmatmul.bf16.gmra.mxu2 %v2736_v25  ;;  %v5968_v24 = vld [vmem:[#allocation2 + $0x420] sm:$0xf]  ;;  %v6583_v25 = vld [vmem:[#allocation2 + $0x424] sm:$0xf0] }
 0x340   : > { %v2580_v34 = vpop.f32.mrf.mxu1  ;;  %v2629_v32 = vpop.f32.mrf.mxu2  ;;  %3542 = vmatpush.bf16.msra.mxu3 %v6037_v20  ;;  %v5969_v27 = vor.u32 %v6583_v25, %v5968_v24  ;;  %v6032_v60 = vld [vmem:[#allocation2 + $0x4a0] sm:$0xf] }
 0x341   : > { %v2713_v35 = vmax.f32 %v2676_v28, 0.0  ;;  %v2581_v52 = vadd.f32 %v2580_v34, %v2532_v38  ;;  %v2630_v54 = vadd.f32 %v2629_v32, %v7236_v30  ;;  %v6599_v28 = vld [vmem:[#allocation2 + $0x4a4] sm:$0xf0] }
 0x342   : > { %v2533_v55 = vpop.f32.mrf.mxu0  ;;  %3395 = vmatpush.bf16.msrb.mxu0 %v5969_v27 }
 0x343   : > { %v2737_v36 = vpack.c.bf16 %v2713_v35, %v2711_v16  ;;  %v2534_v43 = vadd.f32 %v2533_v55, %v7233_v10  ;;  %v2714_v53 = vmax.f32 %v2581_v52, 0.0  ;;  %v6033_v35 = vor.u32 %v6599_v28, %v6032_v60 }
 0x345   : > { %3018 = vmatmul.bf16.gmra.mxu1 %v2737_v36  ;;  %3116 = vmatmul.bf16.gmra.mxu3 %v2737_v36 }
 0x346   : > { %v2678_v41 = vpop.f32.mrf.mxu3  ;;  %3444 = vmatpush.bf16.msrb.mxu1 %v6033_v35 }
 0x347   : > { %v2679_v61 = vadd.f32 %v2678_v41, %v2630_v54 }
 0x348   : > { %v2582_v46 = vpop.f32.mrf.mxu1  ;;  %v2631_v48 = vpop.f32.mrf.mxu2 }
 0x349   : > { %v2583_v45 = vadd.f32 %v2582_v46, %v2534_v43  ;;  %v2632_v62 = vadd.f32 %v2631_v48, %v7236_v30  ;;  %v2715_v42 = vmax.f32 %v2679_v61, 0.0  ;;  %v6580_v46 = vld [vmem:[#allocation2 + $0x414] sm:$0xf]  ;;  %v5962_v48 = vld [vmem:[#allocation2 + $0x418] sm:$0xf0] }
 0x34a   : > { %v2536_v51 = vpop.f32.mrf.mxu0  ;;  %v5965_v49 = vor.u32 %v6580_v46, %v5962_v48 }
 0x34b   : > { %v2716_v56 = vmax.f32 %v2583_v45, 0.0  ;;  %v2537_v8 = vadd.f32 %v2536_v51, %v7233_v10  ;;  %v6596_v45 = vld [vmem:[#allocation2 + $0x494] sm:$0xf]  ;;  %v6026_v51 = vld [vmem:[#allocation2 + $0x498] sm:$0xf0] }
 0x34c   : > { %v6029_v50 = vor.u32 %v6596_v45, %v6026_v51  ;;  %3494 = vmatpush.bf16.msra.mxu2 %v5965_v49 }
 0x34d   : > { %v2738_v17 = vpack.c.bf16 %v2716_v56, %v2714_v53  ;;  %v6581_v53 = vld [vmem:[#allocation2 + $0x414] sm:$0xf0] }
 0x34e   : > { %v2680_v1 = vpop.f32.mrf.mxu3  ;;  %v5961_v57 = vor.u32 %v6581_v53, %v5960_v40  ;;  %3543 = vmatpush.bf16.msra.mxu3 %v6029_v50  ;;  %v6624_v40 = vld [vmem:[#allocation2 + $0x574] sm:$0xf]  ;;  %v6139_v53 = vld [vmem:[#allocation2 + $0x578] sm:$0xf0] }
 0x34f   : > { %v2681_v3 = vadd.f32 %v2680_v1, %v2632_v62  ;;  %2974 = vmatmul.bf16.gmra.mxu0 %v2738_v17  ;;  %3072 = vmatmul.bf16.gmra.mxu2 %v2738_v17  ;;  %v6025_v62 = vor.u32 %v6597_v59, %v6024_v58 }
 0x350   : > { %v2585_v4 = vpop.f32.mrf.mxu1  ;;  %v2634_v5 = vpop.f32.mrf.mxu2  ;;  %3396 = vmatpush.bf16.msrb.mxu0 %v5961_v57 }
 0x351   : > { %v2717_v26 = vmax.f32 %v2681_v3, 0.0  ;;  %v2586_v12 = vadd.f32 %v2585_v4, %v2537_v8  ;;  %v2635_v22 = vadd.f32 %v2634_v5, %v7236_v30  ;;  %3445 = vmatpush.bf16.msrb.mxu1 %v6025_v62  ;;  %v6640_v62 = vld [vmem:[#allocation2 + $0x5f4] sm:$0xf] }
 0x352   : > { %v2538_v39 = vpop.f32.mrf.mxu0 }
 0x353   : > { %v2739_v7 = vpack.c.bf16 %v2717_v26, %v2715_v42  ;;  %v2539_v13 = vadd.f32 %v2538_v39, %v7233_v10  ;;  %v2718_v21 = vmax.f32 %v2586_v12, 0.0 }
 0x355   : > { %3023 = vmatmul.bf16.gmra.mxu1 %v2739_v7  ;;  %3121 = vmatmul.bf16.gmra.mxu3 %v2739_v7 }
 0x356   : > { %v2683_v19 = vpop.f32.mrf.mxu3 }
 0x357   : > { %v2684_v34 = vadd.f32 %v2683_v19, %v2635_v22 }
 0x358   : > { %v2587_v14 = vpop.f32.mrf.mxu1  ;;  %v2636_v18 = vpop.f32.mrf.mxu2 }
 0x359   : > { %v2588_v15 = vadd.f32 %v2587_v14, %v2539_v13  ;;  %v2637_v32 = vadd.f32 %v2636_v18, %v7236_v30  ;;  %v2719_v23 = vmax.f32 %v2684_v34, 0.0  ;;  %v6578_v14 = vld [vmem:[#allocation2 + $0x404] sm:$0xf]  ;;  %v5954_v18 = vld [vmem:[#allocation2 + $0x408] sm:$0xf0] }
 0x35a   : > { %v2541_v6 = vpop.f32.mrf.mxu0  ;;  %v5957_v31 = vor.u32 %v6578_v14, %v5954_v18  ;;  %v5952_v34 = vld [vmem:[#allocation2 + $0x400] sm:$0xf] }
 0x35b   : > { %v2720_v33 = vmax.f32 %v2588_v15, 0.0  ;;  %v2542_v43 = vadd.f32 %v2541_v6, %v7233_v10  ;;  %v6594_v15 = vld [vmem:[#allocation2 + $0x484] sm:$0xf]  ;;  %v6018_v6 = vld [vmem:[#allocation2 + $0x488] sm:$0xf0] }
 0x35c   : > { %v6021_v22 = vor.u32 %v6594_v15, %v6018_v6  ;;  %3495 = vmatpush.bf16.msra.mxu2 %v5957_v31 }
 0x35d   : > { %v2740_v16 = vpack.c.bf16 %v2720_v33, %v2718_v21 }
 0x35e   : > { %v2685_v55 = vpop.f32.mrf.mxu3  ;;  %3544 = vmatpush.bf16.msra.mxu3 %v6021_v22  ;;  %v6131_v22 = vld [vmem:[#allocation2 + $0x568] sm:$0xf0] }
 0x35f   : > { %v2686_v36 = vadd.f32 %v2685_v55, %v2637_v32  ;;  %2979 = vmatmul.bf16.gmra.mxu0 %v2740_v16  ;;  %3077 = vmatmul.bf16.gmra.mxu2 %v2740_v16  ;;  %v6579_v32 = vld [vmem:[#allocation2 + $0x404] sm:$0xf0] }
 0x360   : > { %v2590_v38 = vpop.f32.mrf.mxu1  ;;  %v2639_v47 = vpop.f32.mrf.mxu2  ;;  %v5953_v16 = vor.u32 %v6579_v32, %v5952_v34  ;;  %v6638_v32 = vld [vmem:[#allocation2 + $0x5e4] sm:$0xf] }
 0x361   : > { %v2721_v41 = vmax.f32 %v2686_v36, 0.0  ;;  %v2591_v54 = vadd.f32 %v2590_v38, %v2542_v43  ;;  %v2640_v3 = vadd.f32 %v2639_v47, %v7236_v30  ;;  %v6016_v47 = vld [vmem:[#allocation2 + $0x480] sm:$0xf] }
 0x362   : > { %v2543_v37 = vpop.f32.mrf.mxu0  ;;  %3397 = vmatpush.bf16.msrb.mxu0 %v5953_v16  ;;  %v6195_v16 = vld [vmem:[#allocation2 + $0x5e8] sm:$0xf0] }
 0x363   : > { %v2741_v52 = vpack.c.bf16 %v2721_v41, %v2719_v23  ;;  %v2544_v56 = vadd.f32 %v2543_v37, %v7233_v10  ;;  %v2722_v1 = vmax.f32 %v2591_v54, 0.0  ;;  %v6595_v23 = vld [vmem:[#allocation2 + $0x484] sm:$0xf0] }
 0x364   : > { %v6017_v41 = vor.u32 %v6595_v23, %v6016_v47  ;;  %v6129_v47 = vld [vmem:[#allocation2 + $0x560] sm:$0xf]  ;;  %v6623_v23 = vld [vmem:[#allocation2 + $0x564] sm:$0xf0] }
 0x365   : > { %3028 = vmatmul.bf16.gmra.mxu1 %v2741_v52  ;;  %3126 = vmatmul.bf16.gmra.mxu3 %v2741_v52 }
 0x366   : > { %v2688_v44 = vpop.f32.mrf.mxu3  ;;  %3446 = vmatpush.bf16.msrb.mxu1 %v6017_v41  ;;  %v6130_v41 = vor.u32 %v6623_v23, %v6129_v47  ;;  %v6179_v47 = vld [vmem:[#allocation2 + $0x5c8] sm:$0xf0] }
 0x367   : > { %v2689_v5 = vadd.f32 %v2688_v44, %v2640_v3 }
 0x368   : > { %v2592_v29 = vpop.f32.mrf.mxu1  ;;  %v2641_v61 = vpop.f32.mrf.mxu2 }
 0x369   : > { %v2593_v17 = vadd.f32 %v2592_v29, %v2544_v56  ;;  %v2642_v42 = vadd.f32 %v2641_v61, %v7236_v30  ;;  %v2723_v11 = vmax.f32 %v2689_v5, 0.0  ;;  %v6142_v56 = vor.u32 %v6624_v40, %v6139_v53 }
 0x36a   : > { %v2546_v0 = vpop.f32.mrf.mxu0 }
 0x36b   : > { %v2724_v4 = vmax.f32 %v2593_v17, 0.0  ;;  %v2547_v13 = vadd.f32 %v2546_v0, %v7233_v10  ;;  %3932 = vmatpush.bf16.msrb.mxu2 %v6142_v56  ;;  %v6203_v17 = vld [vmem:[#allocation2 + $0x5f8] sm:$0xf0] }
 0x36d   : > { %v2742_v26 = vpack.c.bf16 %v2724_v4, %v2722_v1  ;;  %v6206_v1 = vor.u32 %v6640_v62, %v6203_v17 }
 0x36e   : > { %v2690_v39 = vpop.f32.mrf.mxu3 }
 0x36f   : > { %v2691_v7 = vadd.f32 %v2690_v39, %v2642_v42  ;;  %2984 = vmatmul.bf16.gmra.mxu0 %v2742_v26  ;;  %3082 = vmatmul.bf16.gmra.mxu2 %v2742_v26  ;;  %v6137_v42 = vld [vmem:[#allocation2 + $0x570] sm:$0xf]  ;;  %v6625_v26 = vld [vmem:[#allocation2 + $0x574] sm:$0xf0] }
 0x370   : > { %v2595_v8 = vpop.f32.mrf.mxu1  ;;  %v2644_v9 = vpop.f32.mrf.mxu2  ;;  %3981 = vmatpush.bf16.msrb.mxu3 %v6206_v1  ;;  %v6138_v39 = vor.u32 %v6625_v26, %v6137_v42  ;;  %v6187_v42 = vld [vmem:[#allocation2 + $0x5d8] sm:$0xf0] }
 0x371   : > { %v2725_v19 = vmax.f32 %v2691_v7, 0.0  ;;  %v2596_v20 = vadd.f32 %v2595_v8, %v2547_v13  ;;  %v2645_v60 = vadd.f32 %v2644_v9, %v7236_v30  ;;  %v6201_v7 = vld [vmem:[#allocation2 + $0x5f0] sm:$0xf]  ;;  %v6641_v8 = vld [vmem:[#allocation2 + $0x5f4] sm:$0xf0] }
 0x372   : > { %v2548_v12 = vpop.f32.mrf.mxu0  ;;  %3834 = vmatpush.bf16.msra.mxu0 %v6138_v39 }
 0x373   : > { %v2743_v63 = vpack.c.bf16 %v2725_v19, %v2723_v11  ;;  %v2549_v21 = vadd.f32 %v2548_v12, %v7233_v10  ;;  %v2726_v27 = vmax.f32 %v2596_v20, 0.0 }
 0x375   : > { %3033 = vmatmul.bf16.gmra.mxu1 %v2743_v63  ;;  %3131 = vmatmul.bf16.gmra.mxu3 %v2743_v63  ;;  %v6202_v63 = vor.u32 %v6641_v8, %v6201_v7 }
 0x376   : > { %v2693_v2 = vpop.f32.mrf.mxu3  ;;  %3835 = vmatpush.bf16.msra.mxu0 %v6130_v41 }
 0x377   : > { %v2694_v35 = vadd.f32 %v2693_v2, %v2645_v60  ;;  %3883 = vmatpush.bf16.msra.mxu1 %v6202_v63 }
 0x378   : > { %v2597_v33 = vpop.f32.mrf.mxu1  ;;  %v2646_v25 = vpop.f32.mrf.mxu2 }
 0x379   : > { %v2598_v24 = vadd.f32 %v2597_v33, %v2549_v21  ;;  %v2647_v55 = vadd.f32 %v2646_v25, %v7236_v30  ;;  %v2727_v37 = vmax.f32 %v2694_v35, 0.0  ;;  %v5820_v30 = vld [vmem:[%s7686_s7 + $0x3] ss:$8 sm:$0x3]  ;;  %v6622_v21 = vld [vmem:[#allocation2 + $0x564] sm:$0xf] }
 0x37a   : > { %v7272_v44 = vperm.slane %v5820_v30, 0  ;;  %v7275_v57 = vperm.slane %v5820_v30, 1 }
 0x37b   : > { %v2728_v28 = vmax.f32 %v2598_v24, 0.0  ;;  %v6134_v24 = vor.u32 %v6622_v21, %v6131_v22 }
 0x37d   : > { %v2744_v36 = vpack.c.bf16 %v2728_v28, %v2726_v27  ;;  %3933 = vmatpush.bf16.msrb.mxu2 %v6134_v24 }
 0x37e   : > { %v2695_v38 = vpop.f32.mrf.mxu3 }
 0x37f   : > { %v2696_v10 = vadd.f32 %v2695_v38, %v2647_v55  ;;  %2989 = vmatmul.bf16.gmra.mxu0 %v2744_v36  ;;  %3087 = vmatmul.bf16.gmra.mxu2 %v2744_v36  ;;  %v6198_v55 = vor.u32 %v6638_v32, %v6195_v16 }
 0x381   : > { %v2729_v52 = vmax.f32 %v2696_v10, 0.0  ;;  %3982 = vmatpush.bf16.msrb.mxu3 %v6198_v55 }
 0x383   : > { %v2745_v43 = vpack.c.bf16 %v2729_v52, %v2727_v37  ;;  %v6193_v37 = vld [vmem:[#allocation2 + $0x5e0] sm:$0xf]  ;;  %v6639_v52 = vld [vmem:[#allocation2 + $0x5e4] sm:$0xf0] }
 0x385   : > { %3038 = vmatmul.bf16.gmra.mxu1 %v2745_v43  ;;  %3136 = vmatmul.bf16.gmra.mxu3 %v2745_v43 }
 0x38c   : > { %v2955_v46 = vpop.f32.mrf.mxu0 }
 0x38d   : > { %v2956_v51 = vadd.f32 %v2955_v46, %v7272_v44 }
 0x392   : > { %v3004_v48 = vpop.f32.mrf.mxu1  ;;  %v3053_v45 = vpop.f32.mrf.mxu2 }
 0x393   : > { %v3005_v50 = vadd.f32 %v3004_v48, %v2956_v51  ;;  %v3054_v4 = vadd.f32 %v3053_v45, %v7275_v57  ;;  %v6194_v48 = vor.u32 %v6639_v52, %v6193_v37 }
 0x394   : > { %v2957_v49 = vpop.f32.mrf.mxu0 }
 0x395   : > { %v2958_v58 = vadd.f32 %v2957_v49, %v7272_v44  ;;  %v3142_v3 = vmax.f32 %v3005_v50, 0.0  ;;  %3884 = vmatpush.bf16.msra.mxu1 %v6194_v48 }
 0x398   : > { %v3102_v54 = vpop.f32.mrf.mxu3 }
 0x399   : > { %v3103_v9 = vadd.f32 %v3102_v54, %v3054_v4 }
 0x39a   : > { %v3006_v59 = vpop.f32.mrf.mxu1  ;;  %v3055_v29 = vpop.f32.mrf.mxu2 }
 0x39b   : > { %v3007_v61 = vadd.f32 %v3006_v59, %v2958_v58  ;;  %v3056_v19 = vadd.f32 %v3055_v29, %v7275_v57  ;;  %v3143_v15 = vmax.f32 %v3103_v9, 0.0  ;;  %v6620_v59 = vld [vmem:[#allocation2 + $0x554] sm:$0xf]  ;;  %v6123_v29 = vld [vmem:[#allocation2 + $0x558] sm:$0xf0] }
 0x39c   : > { %v2960_v0 = vpop.f32.mrf.mxu0  ;;  %v6126_v62 = vor.u32 %v6620_v59, %v6123_v29 }
 0x39d   : > { %v3144_v5 = vmax.f32 %v3007_v61, 0.0  ;;  %v2961_v20 = vadd.f32 %v2960_v0, %v7272_v44 }
 0x39e   : > { %3934 = vmatpush.bf16.msrb.mxu2 %v6126_v62 }
 0x39f   : > { %v3174_v11 = vpack.c.bf16 %v3144_v5, %v3142_v3  ;;  %v6636_v5 = vld [vmem:[#allocation2 + $0x5d4] sm:$0xf] }
 0x3a0   : > { %v3104_v12 = vpop.f32.mrf.mxu3  ;;  %v6190_v39 = vor.u32 %v6636_v5, %v6187_v42 }
 0x3a1   : > { %v3105_v13 = vadd.f32 %v3104_v12, %v3056_v19  ;;  %3398 = vmatmul.bf16.vlgmr.msrb.gmra.mxu0 %v3174_v11  ;;  %3496 = vmatmul.bf16.vlgmr.msra.gmra.mxu2 %v3174_v11  ;;  %v6121_v11 = vld [vmem:[#allocation2 + $0x550] sm:$0xf]  ;;  %v6621_v19 = vld [vmem:[#allocation2 + $0x554] sm:$0xf0] }
 0x3a2   : > { %v3009_v14 = vpop.f32.mrf.mxu1  ;;  %v3058_v18 = vpop.f32.mrf.mxu2  ;;  %3983 = vmatpush.bf16.msrb.mxu3 %v6190_v39  ;;  %v6122_v63 = vor.u32 %v6621_v19, %v6121_v11  ;;  %v6185_v12 = vld [vmem:[#allocation2 + $0x5d0] sm:$0xf]  ;;  %v6171_v11 = vld [vmem:[#allocation2 + $0x5b8] sm:$0xf0] }
 0x3a3   : > { %v3145_v2 = vmax.f32 %v3105_v13, 0.0  ;;  %v3010_v25 = vadd.f32 %v3009_v14, %v2961_v20  ;;  %v3059_v38 = vadd.f32 %v3058_v18, %v7275_v57  ;;  %v6637_v13 = vld [vmem:[#allocation2 + $0x5d4] sm:$0xf0] }
 0x3a4   : > { %v2962_v31 = vpop.f32.mrf.mxu0  ;;  %3836 = vmatpush.bf16.msra.mxu0 %v6122_v63 }
 0x3a5   : > { %v3175_v6 = vpack.c.bf16 %v3145_v2, %v3143_v15  ;;  %v2963_v27 = vadd.f32 %v2962_v31, %v7272_v44  ;;  %v3146_v36 = vmax.f32 %v3010_v25, 0.0  ;;  %v6186_v2 = vor.u32 %v6637_v13, %v6185_v12 }
 0x3a7   : > { %3447 = vmatmul.bf16.vlgmr.msrb.gmra.mxu1 %v3175_v6  ;;  %3545 = vmatmul.bf16.vlgmr.msra.gmra.mxu3 %v3175_v6 }
 0x3a8   : > { %v3107_v33 = vpop.f32.mrf.mxu3  ;;  %3885 = vmatpush.bf16.msra.mxu1 %v6186_v2 }
 0x3a9   : > { %v3108_v43 = vadd.f32 %v3107_v33, %v3059_v38 }
 0x3aa   : > { %v3011_v60 = vpop.f32.mrf.mxu1  ;;  %v3060_v28 = vpop.f32.mrf.mxu2 }
 0x3ab   : > { %v3012_v34 = vadd.f32 %v3011_v60, %v2963_v27  ;;  %v3061_v46 = vadd.f32 %v3060_v28, %v7275_v57  ;;  %v3147_v53 = vmax.f32 %v3108_v43, 0.0  ;;  %v6618_v60 = vld [vmem:[#allocation2 + $0x544] sm:$0xf]  ;;  %v6115_v28 = vld [vmem:[#allocation2 + $0x548] sm:$0xf0] }
 0x3ac   : > { %v2965_v35 = vpop.f32.mrf.mxu0  ;;  %v6118_v32 = vor.u32 %v6618_v60, %v6115_v28 }
 0x3ad   : > { %v3148_v10 = vmax.f32 %v3012_v34, 0.0  ;;  %v2966_v58 = vadd.f32 %v2965_v35, %v7272_v44 }
 0x3ae   : > { %3935 = vmatpush.bf16.msrb.mxu2 %v6118_v32 }
 0x3af   : > { %v3176_v30 = vpack.c.bf16 %v3148_v10, %v3146_v36  ;;  %v6634_v10 = vld [vmem:[#allocation2 + $0x5c4] sm:$0xf] }
 0x3b0   : > { %v3109_v45 = vpop.f32.mrf.mxu3  ;;  %v6182_v41 = vor.u32 %v6634_v10, %v6179_v47 }
 0x3b1   : > { %v3110_v49 = vadd.f32 %v3109_v45, %v3061_v46  ;;  %3403 = vmatmul.bf16.gmra.mxu0 %v3176_v30  ;;  %3501 = vmatmul.bf16.gmra.mxu2 %v3176_v30  ;;  %v6113_v46 = vld [vmem:[#allocation2 + $0x540] sm:$0xf]  ;;  %v6619_v30 = vld [vmem:[#allocation2 + $0x544] sm:$0xf0] }
 0x3b2   : > { %v3014_v51 = vpop.f32.mrf.mxu1  ;;  %v3063_v40 = vpop.f32.mrf.mxu2  ;;  %3984 = vmatpush.bf16.msrb.mxu3 %v6182_v41  ;;  %v6114_v48 = vor.u32 %v6619_v30, %v6113_v46  ;;  %v6177_v45 = vld [vmem:[#allocation2 + $0x5c0] sm:$0xf]  ;;  %v6163_v46 = vld [vmem:[#allocation2 + $0x5a8] sm:$0xf0] }
 0x3b3   : > { %v3149_v54 = vmax.f32 %v3110_v49, 0.0  ;;  %v3015_v17 = vadd.f32 %v3014_v51, %v2966_v58  ;;  %v3064_v8 = vadd.f32 %v3063_v40, %v7275_v57  ;;  %v6635_v49 = vld [vmem:[#allocation2 + $0x5c4] sm:$0xf0] }
 0x3b4   : > { %v2967_v56 = vpop.f32.mrf.mxu0  ;;  %3837 = vmatpush.bf16.msra.mxu0 %v6114_v48 }
 0x3b5   : > { %v3177_v50 = vpack.c.bf16 %v3149_v54, %v3147_v53  ;;  %v2968_v0 = vadd.f32 %v2967_v56, %v7272_v44  ;;  %v3150_v7 = vmax.f32 %v3015_v17, 0.0  ;;  %v6178_v54 = vor.u32 %v6635_v49, %v6177_v45 }
 0x3b7   : > { %3452 = vmatmul.bf16.gmra.mxu1 %v3177_v50  ;;  %3550 = vmatmul.bf16.gmra.mxu3 %v3177_v50 }
 0x3b8   : > { %v3112_v61 = vpop.f32.mrf.mxu3  ;;  %3886 = vmatpush.bf16.msra.mxu1 %v6178_v54 }
 0x3b9   : > { %v3113_v14 = vadd.f32 %v3112_v61, %v3064_v8 }
 0x3ba   : > { %v3016_v1 = vpop.f32.mrf.mxu1  ;;  %v3065_v3 = vpop.f32.mrf.mxu2 }
 0x3bb   : > { %v3017_v4 = vadd.f32 %v3016_v1, %v2968_v0  ;;  %v3066_v18 = vadd.f32 %v3065_v3, %v7275_v57  ;;  %v3151_v22 = vmax.f32 %v3113_v14, 0.0  ;;  %v6616_v1 = vld [vmem:[#allocation2 + $0x534] sm:$0xf]  ;;  %v6107_v3 = vld [vmem:[#allocation2 + $0x538] sm:$0xf0] }
 0x3bc   : > { %v2970_v26 = vpop.f32.mrf.mxu0  ;;  %v6110_v5 = vor.u32 %v6616_v1, %v6107_v3 }
 0x3bd   : > { %v3152_v9 = vmax.f32 %v3017_v4, 0.0  ;;  %v2971_v27 = vadd.f32 %v2970_v26, %v7272_v44 }
 0x3be   : > { %3936 = vmatpush.bf16.msrb.mxu2 %v6110_v5 }
 0x3bf   : > { %v3178_v15 = vpack.c.bf16 %v3152_v9, %v3150_v7  ;;  %v6632_v9 = vld [vmem:[#allocation2 + $0x5b4] sm:$0xf] }
 0x3c0   : > { %v3114_v31 = vpop.f32.mrf.mxu3  ;;  %v6174_v63 = vor.u32 %v6632_v9, %v6171_v11 }
 0x3c1   : > { %v3115_v6 = vadd.f32 %v3114_v31, %v3066_v18  ;;  %3408 = vmatmul.bf16.gmra.mxu0 %v3178_v15  ;;  %3506 = vmatmul.bf16.gmra.mxu2 %v3178_v15  ;;  %v6105_v18 = vld [vmem:[#allocation2 + $0x530] sm:$0xf]  ;;  %v6617_v15 = vld [vmem:[#allocation2 + $0x534] sm:$0xf0] }
 0x3c2   : > { %v3019_v20 = vpop.f32.mrf.mxu1  ;;  %v3068_v21 = vpop.f32.mrf.mxu2  ;;  %3985 = vmatpush.bf16.msrb.mxu3 %v6174_v63  ;;  %v6106_v2 = vor.u32 %v6617_v15, %v6105_v18  ;;  %v6169_v31 = vld [vmem:[#allocation2 + $0x5b0] sm:$0xf] }
 0x3c3   : > { %v3153_v33 = vmax.f32 %v3115_v6, 0.0  ;;  %v3020_v16 = vadd.f32 %v3019_v20, %v2971_v27  ;;  %v3069_v52 = vadd.f32 %v3068_v21, %v7275_v57  ;;  %v6633_v6 = vld [vmem:[#allocation2 + $0x5b4] sm:$0xf0]  ;;  %v6089_v63 = vld [vmem:[#allocation2 + $0x510] sm:$0xf] }
 0x3c4   : > { %v2972_v24 = vpop.f32.mrf.mxu0  ;;  %3838 = vmatpush.bf16.msra.mxu0 %v6106_v2  ;;  %v6153_v2 = vld [vmem:[#allocation2 + $0x590] sm:$0xf] }
 0x3c5   : > { %v3179_v25 = vpack.c.bf16 %v3153_v33, %v3151_v22  ;;  %v2973_v35 = vadd.f32 %v2972_v24, %v7272_v44  ;;  %v3154_v37 = vmax.f32 %v3020_v16, 0.0  ;;  %v6170_v33 = vor.u32 %v6633_v6, %v6169_v31  ;;  %v6629_v31 = vld [vmem:[#allocation2 + $0x594] sm:$0xf0] }
 0x3c7   : > { %3457 = vmatmul.bf16.gmra.mxu1 %v3179_v25  ;;  %3555 = vmatmul.bf16.gmra.mxu3 %v3179_v25 }
 0x3c8   : > { %v3117_v34 = vpop.f32.mrf.mxu3  ;;  %3887 = vmatpush.bf16.msra.mxu1 %v6170_v33 }
 0x3c9   : > { %v3118_v51 = vadd.f32 %v3117_v34, %v3069_v52 }
 0x3ca   : > { %v3021_v55 = vpop.f32.mrf.mxu1  ;;  %v3070_v36 = vpop.f32.mrf.mxu2 }
 0x3cb   : > { %v3022_v38 = vadd.f32 %v3021_v55, %v2973_v35  ;;  %v3071_v40 = vadd.f32 %v3070_v36, %v7275_v57  ;;  %v3155_v29 = vmax.f32 %v3118_v51, 0.0  ;;  %v6614_v55 = vld [vmem:[#allocation2 + $0x524] sm:$0xf]  ;;  %v6099_v36 = vld [vmem:[#allocation2 + $0x528] sm:$0xf0] }
 0x3cc   : > { %v2975_v23 = vpop.f32.mrf.mxu0  ;;  %v6102_v10 = vor.u32 %v6614_v55, %v6099_v36 }
 0x3cd   : > { %v3156_v43 = vmax.f32 %v3022_v38, 0.0  ;;  %v2976_v0 = vadd.f32 %v2975_v23, %v7272_v44 }
 0x3ce   : > { %3937 = vmatpush.bf16.msrb.mxu2 %v6102_v10 }
 0x3cf   : > { %v3180_v53 = vpack.c.bf16 %v3156_v43, %v3154_v37  ;;  %v6630_v43 = vld [vmem:[#allocation2 + $0x5a4] sm:$0xf] }
 0x3d0   : > { %v3119_v56 = vpop.f32.mrf.mxu3  ;;  %v6166_v48 = vor.u32 %v6630_v43, %v6163_v46 }
 0x3d1   : > { %v3120_v50 = vadd.f32 %v3119_v56, %v3071_v40  ;;  %3413 = vmatmul.bf16.gmra.mxu0 %v3180_v53  ;;  %3511 = vmatmul.bf16.gmra.mxu2 %v3180_v53  ;;  %v6097_v40 = vld [vmem:[#allocation2 + $0x520] sm:$0xf]  ;;  %v6615_v53 = vld [vmem:[#allocation2 + $0x524] sm:$0xf0] }
 0x3d2   : > { %v3024_v58 = vpop.f32.mrf.mxu1  ;;  %v3073_v59 = vpop.f32.mrf.mxu2  ;;  %3986 = vmatpush.bf16.msrb.mxu3 %v6166_v48  ;;  %v6098_v54 = vor.u32 %v6615_v53, %v6097_v40  ;;  %v6161_v56 = vld [vmem:[#allocation2 + $0x5a0] sm:$0xf] }
 0x3d3   : > { %v3157_v61 = vmax.f32 %v3120_v50, 0.0  ;;  %v3025_v42 = vadd.f32 %v3024_v58, %v2976_v0  ;;  %v3074_v13 = vadd.f32 %v3073_v59, %v7275_v57  ;;  %v6631_v50 = vld [vmem:[#allocation2 + $0x5a4] sm:$0xf0] }
 0x3d4   : > { %v2977_v62 = vpop.f32.mrf.mxu0  ;;  %3839 = vmatpush.bf16.msra.mxu0 %v6098_v54 }
 0x3d5   : > { %v3181_v17 = vpack.c.bf16 %v3157_v61, %v3155_v29  ;;  %v2978_v26 = vadd.f32 %v2977_v62, %v7272_v44  ;;  %v3158_v12 = vmax.f32 %v3025_v42, 0.0  ;;  %v6162_v61 = vor.u32 %v6631_v50, %v6161_v56 }
 0x3d7   : > { %3462 = vmatmul.bf16.gmra.mxu1 %v3181_v17  ;;  %3560 = vmatmul.bf16.gmra.mxu3 %v3181_v17 }
 0x3d8   : > { %v3122_v4 = vpop.f32.mrf.mxu3  ;;  %3888 = vmatpush.bf16.msra.mxu1 %v6162_v61 }
 0x3d9   : > { %v3123_v20 = vadd.f32 %v3122_v4, %v3074_v13 }
 0x3da   : > { %v3026_v39 = vpop.f32.mrf.mxu1  ;;  %v3075_v7 = vpop.f32.mrf.mxu2 }
 0x3db   : > { %v3027_v8 = vadd.f32 %v3026_v39, %v2978_v26  ;;  %v3076_v21 = vadd.f32 %v3075_v7, %v7275_v57  ;;  %v3159_v28 = vmax.f32 %v3123_v20, 0.0  ;;  %v6612_v39 = vld [vmem:[#allocation2 + $0x514] sm:$0xf]  ;;  %v6091_v7 = vld [vmem:[#allocation2 + $0x518] sm:$0xf0] }
 0x3dc   : > { %v2980_v19 = vpop.f32.mrf.mxu0  ;;  %v6094_v11 = vor.u32 %v6612_v39, %v6091_v7 }
 0x3dd   : > { %v3160_v14 = vmax.f32 %v3027_v8, 0.0  ;;  %v2981_v35 = vadd.f32 %v2980_v19, %v7272_v44  ;;  %v6628_v8 = vld [vmem:[#allocation2 + $0x594] sm:$0xf]  ;;  %v6155_v19 = vld [vmem:[#allocation2 + $0x598] sm:$0xf0] }
 0x3de   : > { %v6158_v18 = vor.u32 %v6628_v8, %v6155_v19  ;;  %3938 = vmatpush.bf16.msrb.mxu2 %v6094_v11 }
 0x3df   : > { %v3182_v22 = vpack.c.bf16 %v3160_v14, %v3158_v12  ;;  %v6613_v12 = vld [vmem:[#allocation2 + $0x514] sm:$0xf0] }
 0x3e0   : > { %v3124_v24 = vpop.f32.mrf.mxu3  ;;  %v6090_v15 = vor.u32 %v6613_v12, %v6089_v63  ;;  %3987 = vmatpush.bf16.msrb.mxu3 %v6158_v18  ;;  %v6656_v63 = vld [vmem:[#allocation2 + $0x674] sm:$0xf]  ;;  %v6268_v12 = vld [vmem:[#allocation2 + $0x678] sm:$0xf0] }
 0x3e1   : > { %v3125_v25 = vadd.f32 %v3124_v24, %v3076_v21  ;;  %3418 = vmatmul.bf16.gmra.mxu0 %v3182_v22  ;;  %3516 = vmatmul.bf16.gmra.mxu2 %v3182_v22  ;;  %v6154_v21 = vor.u32 %v6629_v31, %v6153_v2 }
 0x3e2   : > { %v3029_v27 = vpop.f32.mrf.mxu1  ;;  %v3078_v60 = vpop.f32.mrf.mxu2  ;;  %3840 = vmatpush.bf16.msra.mxu0 %v6090_v15 }
 0x3e3   : > { %v3161_v34 = vmax.f32 %v3125_v25, 0.0  ;;  %v3030_v47 = vadd.f32 %v3029_v27, %v2981_v35  ;;  %v3079_v49 = vadd.f32 %v3078_v60, %v7275_v57  ;;  %3889 = vmatpush.bf16.msra.mxu1 %v6154_v21  ;;  %v6672_v21 = vld [vmem:[#allocation2 + $0x6f4] sm:$0xf] }
 0x3e4   : > { %v2982_v32 = vpop.f32.mrf.mxu0 }
 0x3e5   : > { %v3183_v16 = vpack.c.bf16 %v3161_v34, %v3159_v28  ;;  %v2983_v23 = vadd.f32 %v2982_v32, %v7272_v44  ;;  %v3162_v45 = vmax.f32 %v3030_v47, 0.0 }
 0x3e7   : > { %3467 = vmatmul.bf16.gmra.mxu1 %v3183_v16  ;;  %3565 = vmatmul.bf16.gmra.mxu3 %v3183_v16 }
 0x3e8   : > { %v3127_v38 = vpop.f32.mrf.mxu3 }
 0x3e9   : > { %v3128_v58 = vadd.f32 %v3127_v38, %v3079_v49 }
 0x3ea   : > { %v3031_v41 = vpop.f32.mrf.mxu1  ;;  %v3080_v37 = vpop.f32.mrf.mxu2 }
 0x3eb   : > { %v3032_v52 = vadd.f32 %v3031_v41, %v2983_v23  ;;  %v3081_v59 = vadd.f32 %v3080_v37, %v7275_v57  ;;  %v3163_v3 = vmax.f32 %v3128_v58, 0.0  ;;  %v6610_v41 = vld [vmem:[#allocation2 + $0x504] sm:$0xf]  ;;  %v6083_v37 = vld [vmem:[#allocation2 + $0x508] sm:$0xf0] }
 0x3ec   : > { %v2985_v30 = vpop.f32.mrf.mxu0  ;;  %v6086_v46 = vor.u32 %v6610_v41, %v6083_v37  ;;  %v6081_v58 = vld [vmem:[#allocation2 + $0x500] sm:$0xf] }
 0x3ed   : > { %v3164_v51 = vmax.f32 %v3032_v52, 0.0  ;;  %v2986_v26 = vadd.f32 %v2985_v30, %v7272_v44  ;;  %v6626_v52 = vld [vmem:[#allocation2 + $0x584] sm:$0xf]  ;;  %v6147_v30 = vld [vmem:[#allocation2 + $0x588] sm:$0xf0] }
 0x3ee   : > { %v6150_v49 = vor.u32 %v6626_v52, %v6147_v30  ;;  %3939 = vmatpush.bf16.msrb.mxu2 %v6086_v46 }
 0x3ef   : > { %v3184_v29 = vpack.c.bf16 %v3164_v51, %v3162_v45 }
 0x3f0   : > { %v3129_v62 = vpop.f32.mrf.mxu3  ;;  %3988 = vmatpush.bf16.msrb.mxu3 %v6150_v49  ;;  %v6260_v49 = vld [vmem:[#allocation2 + $0x668] sm:$0xf0] }
 0x3f1   : > { %v3130_v17 = vadd.f32 %v3129_v62, %v3081_v59  ;;  %3423 = vmatmul.bf16.gmra.mxu0 %v3184_v29  ;;  %3521 = vmatmul.bf16.gmra.mxu2 %v3184_v29  ;;  %v6611_v59 = vld [vmem:[#allocation2 + $0x504] sm:$0xf0] }
 0x3f2   : > { %v3034_v0 = vpop.f32.mrf.mxu1  ;;  %v3083_v1 = vpop.f32.mrf.mxu2  ;;  %v6082_v29 = vor.u32 %v6611_v59, %v6081_v58  ;;  %v6670_v59 = vld [vmem:[#allocation2 + $0x6e4] sm:$0xf] }
 0x3f3   : > { %v3165_v4 = vmax.f32 %v3130_v17, 0.0  ;;  %v3035_v13 = vadd.f32 %v3034_v0, %v2986_v26  ;;  %v3084_v25 = vadd.f32 %v3083_v1, %v7275_v57  ;;  %v6145_v1 = vld [vmem:[#allocation2 + $0x580] sm:$0xf] }
 0x3f4   : > { %v2987_v5 = vpop.f32.mrf.mxu0  ;;  %3841 = vmatpush.bf16.msra.mxu0 %v6082_v29  ;;  %v6324_v29 = vld [vmem:[#allocation2 + $0x6e8] sm:$0xf0] }
 0x3f5   : > { %v3185_v42 = vpack.c.bf16 %v3165_v4, %v3163_v3  ;;  %v2988_v14 = vadd.f32 %v2987_v5, %v7272_v44  ;;  %v3166_v24 = vmax.f32 %v3035_v13, 0.0  ;;  %v6627_v3 = vld [vmem:[#allocation2 + $0x584] sm:$0xf0] }
 0x3f6   : > { %v6146_v4 = vor.u32 %v6627_v3, %v6145_v1  ;;  %v6258_v1 = vld [vmem:[#allocation2 + $0x660] sm:$0xf]  ;;  %v6655_v3 = vld [vmem:[#allocation2 + $0x664] sm:$0xf0] }
 0x3f7   : > { %3472 = vmatmul.bf16.gmra.mxu1 %v3185_v42  ;;  %3570 = vmatmul.bf16.gmra.mxu3 %v3185_v42 }
 0x3f8   : > { %v3132_v9 = vpop.f32.mrf.mxu3  ;;  %3890 = vmatpush.bf16.msra.mxu1 %v6146_v4  ;;  %v6259_v4 = vor.u32 %v6655_v3, %v6258_v1  ;;  %v6308_v1 = vld [vmem:[#allocation2 + $0x6c8] sm:$0xf0] }
 0x3f9   : > { %v3133_v60 = vadd.f32 %v3132_v9, %v3084_v25 }
 0x3fa   : > { %v3036_v6 = vpop.f32.mrf.mxu1  ;;  %v3085_v20 = vpop.f32.mrf.mxu2 }
 0x3fb   : > { %v3037_v22 = vadd.f32 %v3036_v6, %v2988_v14  ;;  %v3086_v28 = vadd.f32 %v3085_v20, %v7275_v57  ;;  %v3167_v36 = vmax.f32 %v3133_v60, 0.0  ;;  %v6271_v14 = vor.u32 %v6656_v63, %v6268_v12 }
 0x3fc   : > { %v2990_v33 = vpop.f32.mrf.mxu0 }
 0x3fd   : > { %v3168_v27 = vmax.f32 %v3037_v22, 0.0  ;;  %v2991_v23 = vadd.f32 %v2990_v33, %v7272_v44  ;;  %4376 = vmatpush.bf16.msra.mxu2 %v6271_v14  ;;  %v6332_v22 = vld [vmem:[#allocation2 + $0x6f8] sm:$0xf0] }
 0x3ff   : > { %v3186_v34 = vpack.c.bf16 %v3168_v27, %v3166_v24  ;;  %v6335_v24 = vor.u32 %v6672_v21, %v6332_v22 }
 0x400   : > { %v3134_v32 = vpop.f32.mrf.mxu3 }
 0x401   : > { %v3135_v16 = vadd.f32 %v3134_v32, %v3086_v28  ;;  %3428 = vmatmul.bf16.gmra.mxu0 %v3186_v34  ;;  %3526 = vmatmul.bf16.gmra.mxu2 %v3186_v34  ;;  %v6266_v28 = vld [vmem:[#allocation2 + $0x670] sm:$0xf]  ;;  %v6657_v34 = vld [vmem:[#allocation2 + $0x674] sm:$0xf0] }
 0x402   : > { %v3039_v35 = vpop.f32.mrf.mxu1  ;;  %v3088_v55 = vpop.f32.mrf.mxu2  ;;  %4425 = vmatpush.bf16.msra.mxu3 %v6335_v24  ;;  %v6267_v32 = vor.u32 %v6657_v34, %v6266_v28  ;;  %v6316_v28 = vld [vmem:[#allocation2 + $0x6d8] sm:$0xf0] }
 0x403   : > { %v3169_v38 = vmax.f32 %v3135_v16, 0.0  ;;  %v3040_v48 = vadd.f32 %v3039_v35, %v2991_v23  ;;  %v3089_v56 = vadd.f32 %v3088_v55, %v7275_v57  ;;  %v6330_v16 = vld [vmem:[#allocation2 + $0x6f0] sm:$0xf]  ;;  %v6673_v35 = vld [vmem:[#allocation2 + $0x6f4] sm:$0xf0] }
 0x404   : > { %v2992_v47 = vpop.f32.mrf.mxu0  ;;  %4278 = vmatpush.bf16.msrb.mxu0 %v6267_v32 }
 0x405   : > { %v3187_v10 = vpack.c.bf16 %v3169_v38, %v3167_v36  ;;  %v2993_v45 = vadd.f32 %v2992_v47, %v7272_v44  ;;  %v3170_v54 = vmax.f32 %v3040_v48, 0.0 }
 0x407   : > { %3477 = vmatmul.bf16.gmra.mxu1 %v3187_v10  ;;  %3575 = vmatmul.bf16.gmra.mxu3 %v3187_v10  ;;  %v6331_v10 = vor.u32 %v6673_v35, %v6330_v16 }
 0x408   : > { %v3137_v43 = vpop.f32.mrf.mxu3  ;;  %4279 = vmatpush.bf16.msrb.mxu0 %v6259_v4 }
 0x409   : > { %v3138_v61 = vadd.f32 %v3137_v43, %v3089_v56  ;;  %4327 = vmatpush.bf16.msrb.mxu1 %v6331_v10 }
 0x40a   : > { %v3041_v51 = vpop.f32.mrf.mxu1  ;;  %v3090_v53 = vpop.f32.mrf.mxu2 }
 0x40b   : > { %v3042_v40 = vadd.f32 %v3041_v51, %v2993_v45  ;;  %v3091_v62 = vadd.f32 %v3090_v53, %v7275_v57  ;;  %v3171_v5 = vmax.f32 %v3138_v61, 0.0  ;;  %v5949_v57 = vld [vmem:[%s7686_s7 + $0x4] ss:$8 sm:$0x3] }
 0x40c   : > { %v7311_v9 = vperm.slane %v5949_v57, 0  ;;  %v7314_v15 = vperm.slane %v5949_v57, 1  ;;  %v6654_v45 = vld [vmem:[#allocation2 + $0x664] sm:$0xf] }
 0x40d   : > { %v3172_v50 = vmax.f32 %v3042_v40, 0.0  ;;  %v6263_v40 = vor.u32 %v6654_v45, %v6260_v49 }
 0x40f   : > { %v3188_v17 = vpack.c.bf16 %v3172_v50, %v3170_v54  ;;  %4377 = vmatpush.bf16.msra.mxu2 %v6263_v40 }
 0x410   : > { %v3139_v0 = vpop.f32.mrf.mxu3 }
 0x411   : > { %v3140_v44 = vadd.f32 %v3139_v0, %v3091_v62  ;;  %3433 = vmatmul.bf16.gmra.mxu0 %v3188_v17  ;;  %3531 = vmatmul.bf16.gmra.mxu2 %v3188_v17  ;;  %v6327_v62 = vor.u32 %v6670_v59, %v6324_v29 }
 0x413   : > { %v3173_v42 = vmax.f32 %v3140_v44, 0.0  ;;  %4426 = vmatpush.bf16.msra.mxu3 %v6327_v62 }
 0x415   : > { %v3189_v26 = vpack.c.bf16 %v3173_v42, %v3171_v5  ;;  %v6322_v5 = vld [vmem:[#allocation2 + $0x6e0] sm:$0xf]  ;;  %v6671_v42 = vld [vmem:[#allocation2 + $0x6e4] sm:$0xf0] }
 0x417   : > { %3482 = vmatmul.bf16.gmra.mxu1 %v3189_v26  ;;  %3580 = vmatmul.bf16.gmra.mxu3 %v3189_v26 }
 0x41e   : > { %v3399_v39 = vpop.f32.mrf.mxu0 }
 0x41f   : > { %v3400_v19 = vadd.f32 %v3399_v39, %v7311_v9 }
 0x424   : > { %v3448_v7 = vpop.f32.mrf.mxu1  ;;  %v3497_v8 = vpop.f32.mrf.mxu2 }
 0x425   : > { %v3449_v18 = vadd.f32 %v3448_v7, %v3400_v19  ;;  %v3498_v27 = vadd.f32 %v3497_v8, %v7314_v15  ;;  %v6323_v7 = vor.u32 %v6671_v42, %v6322_v5 }
 0x426   : > { %v3401_v11 = vpop.f32.mrf.mxu0 }
 0x427   : > { %v3402_v2 = vadd.f32 %v3401_v11, %v7311_v9  ;;  %v3586_v25 = vmax.f32 %v3449_v18, 0.0  ;;  %4328 = vmatpush.bf16.msrb.mxu1 %v6323_v7 }
 0x42a   : > { %v3546_v13 = vpop.f32.mrf.mxu3 }
 0x42b   : > { %v3547_v55 = vadd.f32 %v3546_v13, %v3498_v27 }
 0x42c   : > { %v3450_v31 = vpop.f32.mrf.mxu1  ;;  %v3499_v6 = vpop.f32.mrf.mxu2 }
 0x42d   : > { %v3451_v20 = vadd.f32 %v3450_v31, %v3402_v2  ;;  %v3500_v38 = vadd.f32 %v3499_v6, %v7314_v15  ;;  %v3587_v52 = vmax.f32 %v3547_v55, 0.0  ;;  %v6652_v31 = vld [vmem:[#allocation2 + $0x654] sm:$0xf]  ;;  %v6252_v6 = vld [vmem:[#allocation2 + $0x658] sm:$0xf0] }
 0x42e   : > { %v3404_v33 = vpop.f32.mrf.mxu0  ;;  %v6255_v21 = vor.u32 %v6652_v31, %v6252_v6 }
 0x42f   : > { %v3588_v60 = vmax.f32 %v3451_v20, 0.0  ;;  %v3405_v48 = vadd.f32 %v3404_v33, %v7311_v9 }
 0x430   : > { %4378 = vmatpush.bf16.msra.mxu2 %v6255_v21 }
 0x431   : > { %v3618_v36 = vpack.c.bf16 %v3588_v60, %v3586_v25  ;;  %v6668_v60 = vld [vmem:[#allocation2 + $0x6d4] sm:$0xf] }
 0x432   : > { %v3548_v47 = vpop.f32.mrf.mxu3  ;;  %v6319_v32 = vor.u32 %v6668_v60, %v6316_v28 }
 0x433   : > { %v3549_v23 = vadd.f32 %v3548_v47, %v3500_v38  ;;  %3842 = vmatmul.bf16.vlgmr.msra.gmra.mxu0 %v3618_v36  ;;  %3940 = vmatmul.bf16.vlgmr.msrb.gmra.mxu2 %v3618_v36  ;;  %v6250_v36 = vld [vmem:[#allocation2 + $0x650] sm:$0xf]  ;;  %v6653_v38 = vld [vmem:[#allocation2 + $0x654] sm:$0xf0] }
 0x434   : > { %v3453_v41 = vpop.f32.mrf.mxu1  ;;  %v3502_v37 = vpop.f32.mrf.mxu2  ;;  %4427 = vmatpush.bf16.msra.mxu3 %v6319_v32  ;;  %v6251_v10 = vor.u32 %v6653_v38, %v6250_v36  ;;  %v6314_v47 = vld [vmem:[#allocation2 + $0x6d0] sm:$0xf]  ;;  %v6300_v36 = vld [vmem:[#allocation2 + $0x6b8] sm:$0xf0] }
 0x435   : > { %v3589_v43 = vmax.f32 %v3549_v23, 0.0  ;;  %v3454_v53 = vadd.f32 %v3453_v41, %v3405_v48  ;;  %v3503_v0 = vadd.f32 %v3502_v37, %v7314_v15  ;;  %v6669_v23 = vld [vmem:[#allocation2 + $0x6d4] sm:$0xf0] }
 0x436   : > { %v3406_v46 = vpop.f32.mrf.mxu0  ;;  %4280 = vmatpush.bf16.msrb.mxu0 %v6251_v10 }
 0x437   : > { %v3619_v30 = vpack.c.bf16 %v3589_v43, %v3587_v52  ;;  %v3407_v54 = vadd.f32 %v3406_v46, %v7311_v9  ;;  %v3590_v17 = vmax.f32 %v3454_v53, 0.0  ;;  %v6315_v43 = vor.u32 %v6669_v23, %v6314_v47 }
 0x439   : > { %3891 = vmatmul.bf16.vlgmr.msra.gmra.mxu1 %v3619_v30  ;;  %3989 = vmatmul.bf16.vlgmr.msrb.gmra.mxu3 %v3619_v30 }
 0x43a   : > { %v3551_v51 = vpop.f32.mrf.mxu3  ;;  %4329 = vmatpush.bf16.msrb.mxu1 %v6315_v43 }
 0x43b   : > { %v3552_v26 = vadd.f32 %v3551_v51, %v3503_v0 }
 0x43c   : > { %v3455_v56 = vpop.f32.mrf.mxu1  ;;  %v3504_v50 = vpop.f32.mrf.mxu2 }
 0x43d   : > { %v3456_v58 = vadd.f32 %v3455_v56, %v3407_v54  ;;  %v3505_v39 = vadd.f32 %v3504_v50, %v7314_v15  ;;  %v3591_v12 = vmax.f32 %v3552_v26, 0.0  ;;  %v6650_v56 = vld [vmem:[#allocation2 + $0x644] sm:$0xf]  ;;  %v6244_v50 = vld [vmem:[#allocation2 + $0x648] sm:$0xf0] }
 0x43e   : > { %v3409_v61 = vpop.f32.mrf.mxu0  ;;  %v6247_v59 = vor.u32 %v6650_v56, %v6244_v50 }
 0x43f   : > { %v3592_v44 = vmax.f32 %v3456_v58, 0.0  ;;  %v3410_v2 = vadd.f32 %v3409_v61, %v7311_v9 }
 0x440   : > { %4379 = vmatpush.bf16.msra.mxu2 %v6247_v59 }
 0x441   : > { %v3620_v57 = vpack.c.bf16 %v3592_v44, %v3590_v17  ;;  %v6666_v44 = vld [vmem:[#allocation2 + $0x6c4] sm:$0xf] }
 0x442   : > { %v3553_v8 = vpop.f32.mrf.mxu3  ;;  %v6311_v4 = vor.u32 %v6666_v44, %v6308_v1 }
 0x443   : > { %v3554_v11 = vadd.f32 %v3553_v8, %v3505_v39  ;;  %3847 = vmatmul.bf16.gmra.mxu0 %v3620_v57  ;;  %3945 = vmatmul.bf16.gmra.mxu2 %v3620_v57  ;;  %v6242_v39 = vld [vmem:[#allocation2 + $0x640] sm:$0xf]  ;;  %v6651_v57 = vld [vmem:[#allocation2 + $0x644] sm:$0xf0] }
 0x444   : > { %v3458_v19 = vpop.f32.mrf.mxu1  ;;  %v3507_v63 = vpop.f32.mrf.mxu2  ;;  %4428 = vmatpush.bf16.msra.mxu3 %v6311_v4  ;;  %v6243_v7 = vor.u32 %v6651_v57, %v6242_v39  ;;  %v6306_v8 = vld [vmem:[#allocation2 + $0x6c0] sm:$0xf]  ;;  %v6292_v39 = vld [vmem:[#allocation2 + $0x6a8] sm:$0xf0] }
 0x445   : > { %v3593_v13 = vmax.f32 %v3554_v11, 0.0  ;;  %v3459_v22 = vadd.f32 %v3458_v19, %v3410_v2  ;;  %v3508_v35 = vadd.f32 %v3507_v63, %v7314_v15  ;;  %v6667_v11 = vld [vmem:[#allocation2 + $0x6c4] sm:$0xf0] }
 0x446   : > { %v3411_v14 = vpop.f32.mrf.mxu0  ;;  %4281 = vmatpush.bf16.msrb.mxu0 %v6243_v7 }
 0x447   : > { %v3621_v18 = vpack.c.bf16 %v3593_v13, %v3591_v12  ;;  %v3412_v33 = vadd.f32 %v3411_v14, %v7311_v9  ;;  %v3594_v16 = vmax.f32 %v3459_v22, 0.0  ;;  %v6307_v13 = vor.u32 %v6667_v11, %v6306_v8 }
 0x449   : > { %3896 = vmatmul.bf16.gmra.mxu1 %v3621_v18  ;;  %3994 = vmatmul.bf16.gmra.mxu3 %v3621_v18 }
 0x44a   : > { %v3556_v20 = vpop.f32.mrf.mxu3  ;;  %4330 = vmatpush.bf16.msrb.mxu1 %v6307_v13 }
 0x44b   : > { %v3557_v41 = vadd.f32 %v3556_v20, %v3508_v35 }
 0x44c   : > { %v3460_v24 = vpop.f32.mrf.mxu1  ;;  %v3509_v25 = vpop.f32.mrf.mxu2 }
 0x44d   : > { %v3461_v27 = vadd.f32 %v3460_v24, %v3412_v33  ;;  %v3510_v37 = vadd.f32 %v3509_v25, %v7314_v15  ;;  %v3595_v49 = vmax.f32 %v3557_v41, 0.0  ;;  %v6648_v24 = vld [vmem:[#allocation2 + $0x634] sm:$0xf]  ;;  %v6236_v25 = vld [vmem:[#allocation2 + $0x638] sm:$0xf0] }
 0x44e   : > { %v3414_v34 = vpop.f32.mrf.mxu0  ;;  %v6239_v60 = vor.u32 %v6648_v24, %v6236_v25 }
 0x44f   : > { %v3596_v55 = vmax.f32 %v3461_v27, 0.0  ;;  %v3415_v54 = vadd.f32 %v3414_v34, %v7311_v9 }
 0x450   : > { %4380 = vmatpush.bf16.msra.mxu2 %v6239_v60 }
 0x451   : > { %v3622_v52 = vpack.c.bf16 %v3596_v55, %v3594_v16  ;;  %v6664_v55 = vld [vmem:[#allocation2 + $0x6b4] sm:$0xf] }
 0x452   : > { %v3558_v46 = vpop.f32.mrf.mxu3  ;;  %v6303_v10 = vor.u32 %v6664_v55, %v6300_v36 }
 0x453   : > { %v3559_v30 = vadd.f32 %v3558_v46, %v3510_v37  ;;  %3852 = vmatmul.bf16.gmra.mxu0 %v3622_v52  ;;  %3950 = vmatmul.bf16.gmra.mxu2 %v3622_v52  ;;  %v6234_v37 = vld [vmem:[#allocation2 + $0x630] sm:$0xf]  ;;  %v6649_v52 = vld [vmem:[#allocation2 + $0x634] sm:$0xf0] }
 0x454   : > { %v3463_v48 = vpop.f32.mrf.mxu1  ;;  %v3512_v45 = vpop.f32.mrf.mxu2  ;;  %4429 = vmatpush.bf16.msra.mxu3 %v6303_v10  ;;  %v6235_v43 = vor.u32 %v6649_v52, %v6234_v37  ;;  %v6298_v46 = vld [vmem:[#allocation2 + $0x6b0] sm:$0xf] }
 0x455   : > { %v3597_v51 = vmax.f32 %v3559_v30, 0.0  ;;  %v3464_v29 = vadd.f32 %v3463_v48, %v3415_v54  ;;  %v3513_v42 = vadd.f32 %v3512_v45, %v7314_v15  ;;  %v6665_v30 = vld [vmem:[#allocation2 + $0x6b4] sm:$0xf0]  ;;  %v6218_v10 = vld [vmem:[#allocation2 + $0x610] sm:$0xf] }
 0x456   : > { %v3416_v40 = vpop.f32.mrf.mxu0  ;;  %4282 = vmatpush.bf16.msrb.mxu0 %v6235_v43  ;;  %v6282_v43 = vld [vmem:[#allocation2 + $0x690] sm:$0xf] }
 0x457   : > { %v3623_v53 = vpack.c.bf16 %v3597_v51, %v3595_v49  ;;  %v3417_v61 = vadd.f32 %v3416_v40, %v7311_v9  ;;  %v3598_v5 = vmax.f32 %v3464_v29, 0.0  ;;  %v6299_v51 = vor.u32 %v6665_v30, %v6298_v46  ;;  %v6661_v46 = vld [vmem:[#allocation2 + $0x694] sm:$0xf0] }
 0x459   : > { %3901 = vmatmul.bf16.gmra.mxu1 %v3623_v53  ;;  %3999 = vmatmul.bf16.gmra.mxu3 %v3623_v53 }
 0x45a   : > { %v3561_v58 = vpop.f32.mrf.mxu3  ;;  %4331 = vmatpush.bf16.msrb.mxu1 %v6299_v51 }
 0x45b   : > { %v3562_v19 = vadd.f32 %v3561_v58, %v3513_v42 }
 0x45c   : > { %v3465_v62 = vpop.f32.mrf.mxu1  ;;  %v3514_v17 = vpop.f32.mrf.mxu2 }
 0x45d   : > { %v3466_v0 = vadd.f32 %v3465_v62, %v3417_v61  ;;  %v3515_v63 = vadd.f32 %v3514_v17, %v7314_v15  ;;  %v3599_v6 = vmax.f32 %v3562_v19, 0.0  ;;  %v6646_v62 = vld [vmem:[#allocation2 + $0x624] sm:$0xf]  ;;  %v6228_v17 = vld [vmem:[#allocation2 + $0x628] sm:$0xf0] }
 0x45e   : > { %v3419_v3 = vpop.f32.mrf.mxu0  ;;  %v6231_v44 = vor.u32 %v6646_v62, %v6228_v17 }
 0x45f   : > { %v3600_v26 = vmax.f32 %v3466_v0, 0.0  ;;  %v3420_v33 = vadd.f32 %v3419_v3, %v7311_v9 }
 0x460   : > { %4381 = vmatpush.bf16.msra.mxu2 %v6231_v44 }
 0x461   : > { %v3624_v12 = vpack.c.bf16 %v3600_v26, %v3598_v5  ;;  %v6662_v26 = vld [vmem:[#allocation2 + $0x6a4] sm:$0xf] }
 0x462   : > { %v3563_v14 = vpop.f32.mrf.mxu3  ;;  %v6295_v7 = vor.u32 %v6662_v26, %v6292_v39 }
 0x463   : > { %v3564_v18 = vadd.f32 %v3563_v14, %v3515_v63  ;;  %3857 = vmatmul.bf16.gmra.mxu0 %v3624_v12  ;;  %3955 = vmatmul.bf16.gmra.mxu2 %v3624_v12  ;;  %v6226_v63 = vld [vmem:[#allocation2 + $0x620] sm:$0xf]  ;;  %v6647_v12 = vld [vmem:[#allocation2 + $0x624] sm:$0xf0] }
 0x464   : > { %v3468_v2 = vpop.f32.mrf.mxu1  ;;  %v3517_v31 = vpop.f32.mrf.mxu2  ;;  %4430 = vmatpush.bf16.msra.mxu3 %v6295_v7  ;;  %v6227_v13 = vor.u32 %v6647_v12, %v6226_v63  ;;  %v6290_v14 = vld [vmem:[#allocation2 + $0x6a0] sm:$0xf] }
 0x465   : > { %v3601_v20 = vmax.f32 %v3564_v18, 0.0  ;;  %v3469_v28 = vadd.f32 %v3468_v2, %v3420_v33  ;;  %v3518_v23 = vadd.f32 %v3517_v31, %v7314_v15  ;;  %v6663_v18 = vld [vmem:[#allocation2 + $0x6a4] sm:$0xf0] }
 0x466   : > { %v3421_v21 = vpop.f32.mrf.mxu0  ;;  %4283 = vmatpush.bf16.msrb.mxu0 %v6227_v13 }
 0x467   : > { %v3625_v22 = vpack.c.bf16 %v3601_v20, %v3599_v6  ;;  %v3422_v34 = vadd.f32 %v3421_v21, %v7311_v9  ;;  %v3602_v47 = vmax.f32 %v3469_v28, 0.0  ;;  %v6291_v20 = vor.u32 %v6663_v18, %v6290_v14 }
 0x469   : > { %3906 = vmatmul.bf16.gmra.mxu1 %v3625_v22  ;;  %4004 = vmatmul.bf16.gmra.mxu3 %v3625_v22 }
 0x46a   : > { %v3566_v27 = vpop.f32.mrf.mxu3  ;;  %4332 = vmatpush.bf16.msrb.mxu1 %v6291_v20 }
 0x46b   : > { %v3567_v48 = vadd.f32 %v3566_v27, %v3518_v23 }
 0x46c   : > { %v3470_v32 = vpop.f32.mrf.mxu1  ;;  %v3519_v16 = vpop.f32.mrf.mxu2 }
 0x46d   : > { %v3471_v35 = vadd.f32 %v3470_v32, %v3422_v34  ;;  %v3520_v45 = vadd.f32 %v3519_v16, %v7314_v15  ;;  %v3603_v50 = vmax.f32 %v3567_v48, 0.0  ;;  %v6644_v32 = vld [vmem:[#allocation2 + $0x614] sm:$0xf]  ;;  %v6220_v16 = vld [vmem:[#allocation2 + $0x618] sm:$0xf0] }
 0x46e   : > { %v3424_v38 = vpop.f32.mrf.mxu0  ;;  %v6223_v36 = vor.u32 %v6644_v32, %v6220_v16 }
 0x46f   : > { %v3604_v41 = vmax.f32 %v3471_v35, 0.0  ;;  %v3425_v61 = vadd.f32 %v3424_v38, %v7311_v9  ;;  %v6660_v35 = vld [vmem:[#allocation2 + $0x694] sm:$0xf]  ;;  %v6284_v38 = vld [vmem:[#allocation2 + $0x698] sm:$0xf0] }
 0x470   : > { %v6287_v37 = vor.u32 %v6660_v35, %v6284_v38  ;;  %4382 = vmatpush.bf16.msra.mxu2 %v6223_v36 }
 0x471   : > { %v3626_v49 = vpack.c.bf16 %v3604_v41, %v3602_v47  ;;  %v6645_v47 = vld [vmem:[#allocation2 + $0x614] sm:$0xf0] }
 0x472   : > { %v3568_v40 = vpop.f32.mrf.mxu3  ;;  %v6219_v52 = vor.u32 %v6645_v47, %v6218_v10  ;;  %4431 = vmatpush.bf16.msra.mxu3 %v6287_v37  ;;  %v6681_v10 = vld [vmem:[%s7687_s8 + $0x38] sm:$0xff] }
 0x473   : > { %v3569_v53 = vadd.f32 %v3568_v40, %v3520_v45  ;;  %3862 = vmatmul.bf16.gmra.mxu0 %v3626_v49  ;;  %3960 = vmatmul.bf16.gmra.mxu2 %v3626_v49  ;;  %v6283_v45 = vor.u32 %v6661_v46, %v6282_v43 }
 0x474   : > { %v3473_v54 = vpop.f32.mrf.mxu1  ;;  %v3522_v56 = vpop.f32.mrf.mxu2  ;;  %4284 = vmatpush.bf16.msrb.mxu0 %v6219_v52 }
 0x475   : > { %v3605_v58 = vmax.f32 %v3569_v53, 0.0  ;;  %v3474_v1 = vadd.f32 %v3473_v54, %v3425_v61  ;;  %v3523_v11 = vadd.f32 %v3522_v56, %v7314_v15  ;;  %4333 = vmatpush.bf16.msrb.mxu1 %v6283_v45 }
 0x476   : > { %v3426_v59 = vpop.f32.mrf.mxu0 }
 0x477   : > { %v3627_v29 = vpack.c.bf16 %v3605_v58, %v3603_v50  ;;  %v3427_v3 = vadd.f32 %v3426_v59, %v7311_v9  ;;  %v3606_v8 = vmax.f32 %v3474_v1, 0.0 }
 0x479   : > { %3911 = vmatmul.bf16.gmra.mxu1 %v3627_v29  ;;  %4009 = vmatmul.bf16.gmra.mxu3 %v3627_v29 }
 0x47a   : > { %v3571_v0 = vpop.f32.mrf.mxu3 }
 0x47b   : > { %v3572_v2 = vadd.f32 %v3571_v0, %v3523_v11 }
 0x47c   : > { %v3475_v4 = vpop.f32.mrf.mxu1  ;;  %v3524_v5 = vpop.f32.mrf.mxu2 }
 0x47d   : > { %v3476_v42 = vadd.f32 %v3475_v4, %v3427_v3  ;;  %v3525_v31 = vadd.f32 %v3524_v5, %v7314_v15  ;;  %v3607_v25 = vmax.f32 %v3572_v2, 0.0  ;;  %v6642_v4 = vld [vmem:[#allocation2 + $0x604] sm:$0xf]  ;;  %v6212_v5 = vld [vmem:[#allocation2 + $0x608] sm:$0xf0] }
 0x47e   : > { %v3429_v57 = vpop.f32.mrf.mxu0  ;;  %v6215_v39 = vor.u32 %v6642_v4, %v6212_v5  ;;  %v6210_v2 = vld [vmem:[#allocation2 + $0x600] sm:$0xf] }
 0x47f   : > { %v3608_v19 = vmax.f32 %v3476_v42, 0.0  ;;  %v3430_v34 = vadd.f32 %v3429_v57, %v7311_v9  ;;  %v6658_v42 = vld [vmem:[#allocation2 + $0x684] sm:$0xf]  ;;  %v6276_v57 = vld [vmem:[#allocation2 + $0x688] sm:$0xf0] }
 0x480   : > { %v6279_v11 = vor.u32 %v6658_v42, %v6276_v57  ;;  %4383 = vmatpush.bf16.msra.mxu2 %v6215_v39  ;;  %v6688_v39 = vld [vmem:[%s7687_s8 + $0x70] sm:$0xff] }
 0x481   : > { %v3628_v6 = vpack.c.bf16 %v3608_v19, %v3606_v8 }
 0x482   : > { %v3573_v21 = vpop.f32.mrf.mxu3  ;;  %4432 = vmatpush.bf16.msra.mxu3 %v6279_v11 }
 0x483   : > { %v3574_v22 = vadd.f32 %v3573_v21, %v3525_v31  ;;  %3867 = vmatmul.bf16.gmra.mxu0 %v3628_v6  ;;  %3965 = vmatmul.bf16.gmra.mxu2 %v3628_v6  ;;  %v6643_v31 = vld [vmem:[#allocation2 + $0x604] sm:$0xf0] }
 0x484   : > { %v3478_v33 = vpop.f32.mrf.mxu1  ;;  %v3527_v24 = vpop.f32.mrf.mxu2  ;;  %v6211_v6 = vor.u32 %v6643_v31, %v6210_v2 }
 0x485   : > { %v3609_v27 = vmax.f32 %v3574_v22, 0.0  ;;  %v3479_v23 = vadd.f32 %v3478_v33, %v3430_v34  ;;  %v3528_v53 = vadd.f32 %v3527_v24, %v7314_v15  ;;  %v6274_v24 = vld [vmem:[#allocation2 + $0x680] sm:$0xf] }
 0x486   : > { %v3431_v60 = vpop.f32.mrf.mxu0  ;;  %4285 = vmatpush.bf16.msrb.mxu0 %v6211_v6 }
 0x487   : > { %v3629_v28 = vpack.c.bf16 %v3609_v27, %v3607_v25  ;;  %v3432_v41 = vadd.f32 %v3431_v60, %v7311_v9  ;;  %v3610_v40 = vmax.f32 %v3479_v23, 0.0  ;;  %v6659_v25 = vld [vmem:[#allocation2 + $0x684] sm:$0xf0] }
 0x488   : > { %v6275_v27 = vor.u32 %v6659_v25, %v6274_v24 }
 0x489   : > { %3916 = vmatmul.bf16.gmra.mxu1 %v3629_v28  ;;  %4014 = vmatmul.bf16.gmra.mxu3 %v3629_v28 }
 0x48a   : > { %v3576_v55 = vpop.f32.mrf.mxu3  ;;  %4334 = vmatpush.bf16.msrb.mxu1 %v6275_v27  ;;  %4654 = vmatpush.bf16.msra.mxu0 %v6681_v10 }
 0x48b   : > { %v3577_v56 = vadd.f32 %v3576_v55, %v3528_v53 }
 0x48c   : > { %v3480_v30 = vpop.f32.mrf.mxu1  ;;  %v3529_v48 = vpop.f32.mrf.mxu2 }
 0x48d   : > { %v3481_v49 = vadd.f32 %v3480_v30, %v3432_v41  ;;  %v3530_v50 = vadd.f32 %v3529_v48, %v7314_v15  ;;  %v3611_v17 = vmax.f32 %v3577_v56, 0.0  ;;  %v6689_v30 = vld [vmem:[%s7687_s8 + $0x78] sm:$0xff] }
 0x48e   : > { %v3434_v51 = vpop.f32.mrf.mxu0  ;;  %4703 = vmatpush.bf16.msra.mxu1 %v6689_v30 }
 0x48f   : > { %v3612_v54 = vmax.f32 %v3481_v49, 0.0  ;;  %v3435_v3 = vadd.f32 %v3434_v51, %v7311_v9 }
 0x491   : > { %v3630_v58 = vpack.c.bf16 %v3612_v54, %v3610_v40 }
 0x492   : > { %v3578_v59 = vpop.f32.mrf.mxu3  ;;  %4704 = vmatpush.bf16.msra.mxu1 %v6688_v39 }
 0x493   : > { %v3579_v29 = vadd.f32 %v3578_v59, %v3530_v50  ;;  %3872 = vmatmul.bf16.gmra.mxu0 %v3630_v58  ;;  %3970 = vmatmul.bf16.gmra.mxu2 %v3630_v58 }
 0x494   : > { %v3483_v61 = vpop.f32.mrf.mxu1  ;;  %v3532_v62 = vpop.f32.mrf.mxu2 }
 0x495   : > { %v3613_v0 = vmax.f32 %v3579_v29, 0.0  ;;  %v3484_v7 = vadd.f32 %v3483_v61, %v3435_v3  ;;  %v3533_v14 = vadd.f32 %v3532_v62, %v7314_v15 }
 0x496   : > { %v3436_v1 = vpop.f32.mrf.mxu0 }
 0x497   : > { %v3631_v44 = vpack.c.bf16 %v3613_v0, %v3611_v17  ;;  %v3437_v8 = vadd.f32 %v3436_v1, %v7311_v9  ;;  %v3614_v13 = vmax.f32 %v3484_v7, 0.0 }
 0x499   : > { %3921 = vmatmul.bf16.gmra.mxu1 %v3631_v44  ;;  %4019 = vmatmul.bf16.gmra.mxu3 %v3631_v44  ;;  %v6680_v44 = vld [vmem:[%s7687_s8 + $0x30] sm:$0xff] }
 0x49a   : > { %v3581_v26 = vpop.f32.mrf.mxu3  ;;  %4655 = vmatpush.bf16.msra.mxu0 %v6680_v44 }
 0x49b   : > { %v3582_v20 = vadd.f32 %v3581_v26, %v3533_v14 }
 0x49c   : > { %v3485_v19 = vpop.f32.mrf.mxu1  ;;  %v3534_v12 = vpop.f32.mrf.mxu2 }
 0x49d   : > { %v3486_v63 = vadd.f32 %v3485_v19, %v3437_v8  ;;  %v3535_v21 = vadd.f32 %v3534_v12, %v7314_v15  ;;  %v3615_v60 = vmax.f32 %v3582_v20, 0.0  ;;  %v6078_v15 = vld [vmem:[%s7686_s7 + $0x5] ss:$8 sm:$0x3] }
 0x49e   : > { %v7350_v55 = vperm.slane %v6078_v15, 0  ;;  %v7356_v41 = vperm.slane %v6078_v15, 1 }
 0x49f   : > { %v3616_v18 = vmax.f32 %v3486_v63, 0.0 }
 0x4a1   : > { %v3632_v22 = vpack.c.bf16 %v3616_v18, %v3614_v13 }
 0x4a2   : > { %v3583_v33 = vpop.f32.mrf.mxu3 }
 0x4a3   : > { %v3584_v9 = vadd.f32 %v3583_v33, %v3535_v21  ;;  %3877 = vmatmul.bf16.gmra.mxu0 %v3632_v22  ;;  %3975 = vmatmul.bf16.gmra.mxu2 %v3632_v22  ;;  %v6679_v33 = vld [vmem:[%s7687_s8 + $0x28] sm:$0xff] }
 0x4a4   : > { %4656 = vmatpush.bf16.msra.mxu0 %v6679_v33 }
 0x4a5   : > { %v3617_v28 = vmax.f32 %v3584_v9, 0.0 }
 0x4a7   : > { %v3633_v34 = vpack.c.bf16 %v3617_v28, %v3615_v60 }
 0x4a9   : > { %3926 = vmatmul.bf16.gmra.mxu1 %v3633_v34  ;;  %4024 = vmatmul.bf16.gmra.mxu3 %v3633_v34  ;;  %v6687_v34 = vld [vmem:[%s7687_s8 + $0x68] sm:$0xff] }
 0x4aa   : > { %4705 = vmatpush.bf16.msra.mxu1 %v6687_v34 }
 0x4b0   : > { %v3843_v32 = vpop.f32.mrf.mxu0 }
 0x4b1   : > { %v3844_v38 = vadd.f32 %v3843_v32, %v7350_v55 }
 0x4b6   : > { %v3892_v16 = vpop.f32.mrf.mxu1  ;;  %v3941_v35 = vpop.f32.mrf.mxu2 }
 0x4b7   : > { %v3893_v23 = vadd.f32 %v3892_v16, %v3844_v38  ;;  %v3942_v49 = vadd.f32 %v3941_v35, %v7356_v41 }
 0x4b8   : > { %v3845_v36 = vpop.f32.mrf.mxu0 }
 0x4b9   : > { %v3846_v37 = vadd.f32 %v3845_v36, %v7350_v55  ;;  %v4030_v45 = vmax.f32 %v3893_v23, 0.0 }
 0x4bc   : > { %v3990_v47 = vpop.f32.mrf.mxu3 }
 0x4bd   : > { %v3991_v40 = vadd.f32 %v3990_v47, %v3942_v49  ;;  %v6678_v49 = vld [vmem:[%s7687_s8 + $0x20] sm:$0xff] }
 0x4be   : > { %v3894_v52 = vpop.f32.mrf.mxu1  ;;  %v3943_v43 = vpop.f32.mrf.mxu2  ;;  %4657 = vmatpush.bf16.msra.mxu0 %v6678_v49 }
 0x4bf   : > { %v3895_v46 = vadd.f32 %v3894_v52, %v3846_v37  ;;  %v3944_v54 = vadd.f32 %v3943_v43, %v7356_v41  ;;  %v4031_v29 = vmax.f32 %v3991_v40, 0.0 }
 0x4c0   : > { %v3848_v48 = vpop.f32.mrf.mxu0 }
 0x4c1   : > { %v4032_v51 = vmax.f32 %v3895_v46, 0.0  ;;  %v3849_v0 = vadd.f32 %v3848_v48, %v7350_v55 }
 0x4c3   : > { %v4062_v53 = vpack.c.bf16 %v4032_v51, %v4030_v45 }
 0x4c4   : > { %v3992_v56 = vpop.f32.mrf.mxu3 }
 0x4c5   : > { %v3993_v50 = vadd.f32 %v3992_v56, %v3944_v54  ;;  %4286 = vmatmul.bf16.vlgmr.msrb.gmra.mxu0 %v4062_v53  ;;  %4384 = vmatmul.bf16.vlgmr.msra.gmra.mxu2 %v4062_v53 }
 0x4c6   : > { %v3897_v58 = vpop.f32.mrf.mxu1  ;;  %v3946_v59 = vpop.f32.mrf.mxu2 }
 0x4c7   : > { %v4033_v61 = vmax.f32 %v3993_v50, 0.0  ;;  %v3898_v3 = vadd.f32 %v3897_v58, %v3849_v0  ;;  %v3947_v8 = vadd.f32 %v3946_v59, %v7356_v41  ;;  %v6686_v58 = vld [vmem:[%s7687_s8 + $0x60] sm:$0xff] }
 0x4c8   : > { %v3850_v62 = vpop.f32.mrf.mxu0  ;;  %4706 = vmatpush.bf16.msra.mxu1 %v6686_v58 }
 0x4c9   : > { %v4063_v17 = vpack.c.bf16 %v4033_v61, %v4031_v29  ;;  %v3851_v4 = vadd.f32 %v3850_v62, %v7350_v55  ;;  %v4034_v7 = vmax.f32 %v3898_v3, 0.0 }
 0x4cb   : > { %4335 = vmatmul.bf16.vlgmr.msrb.gmra.mxu1 %v4063_v17  ;;  %4433 = vmatmul.bf16.vlgmr.msra.gmra.mxu3 %v4063_v17 }
 0x4cc   : > { %v3995_v1 = vpop.f32.mrf.mxu3 }
 0x4cd   : > { %v3996_v19 = vadd.f32 %v3995_v1, %v3947_v8  ;;  %v6677_v8 = vld [vmem:[%s7687_s8 + $0x18] sm:$0xff] }
 0x4ce   : > { %v3899_v5 = vpop.f32.mrf.mxu1  ;;  %v3948_v42 = vpop.f32.mrf.mxu2  ;;  %4658 = vmatpush.bf16.msra.mxu0 %v6677_v8 }
 0x4cf   : > { %v3900_v26 = vadd.f32 %v3899_v5, %v3851_v4  ;;  %v3949_v63 = vadd.f32 %v3948_v42, %v7356_v41  ;;  %v4035_v31 = vmax.f32 %v3996_v19, 0.0 }
 0x4d0   : > { %v3853_v57 = vpop.f32.mrf.mxu0 }
 0x4d1   : > { %v4036_v11 = vmax.f32 %v3900_v26, 0.0  ;;  %v3854_v22 = vadd.f32 %v3853_v57, %v7350_v55 }
 0x4d3   : > { %v4064_v12 = vpack.c.bf16 %v4036_v11, %v4034_v7 }
 0x4d4   : > { %v3997_v13 = vpop.f32.mrf.mxu3 }
 0x4d5   : > { %v3998_v14 = vadd.f32 %v3997_v13, %v3949_v63  ;;  %4291 = vmatmul.bf16.gmra.mxu0 %v4064_v12  ;;  %4389 = vmatmul.bf16.gmra.mxu2 %v4064_v12 }
 0x4d6   : > { %v3902_v18 = vpop.f32.mrf.mxu1  ;;  %v3951_v2 = vpop.f32.mrf.mxu2 }
 0x4d7   : > { %v4037_v6 = vmax.f32 %v3998_v14, 0.0  ;;  %v3903_v24 = vadd.f32 %v3902_v18, %v3854_v22  ;;  %v3952_v16 = vadd.f32 %v3951_v2, %v7356_v41  ;;  %v6685_v18 = vld [vmem:[%s7687_s8 + $0x58] sm:$0xff] }
 0x4d8   : > { %v3855_v20 = vpop.f32.mrf.mxu0  ;;  %4707 = vmatpush.bf16.msra.mxu1 %v6685_v18 }
 0x4d9   : > { %v4065_v21 = vpack.c.bf16 %v4037_v6, %v4035_v31  ;;  %v3856_v25 = vadd.f32 %v3855_v20, %v7350_v55  ;;  %v4038_v15 = vmax.f32 %v3903_v24, 0.0 }
 0x4db   : > { %4340 = vmatmul.bf16.gmra.mxu1 %v4065_v21  ;;  %4438 = vmatmul.bf16.gmra.mxu3 %v4065_v21 }
 0x4dc   : > { %v4000_v9 = vpop.f32.mrf.mxu3 }
 0x4dd   : > { %v4001_v36 = vadd.f32 %v4000_v9, %v3952_v16  ;;  %v6676_v16 = vld [vmem:[%s7687_s8 + $0x10] sm:$0xff] }
 0x4de   : > { %v3904_v27 = vpop.f32.mrf.mxu1  ;;  %v3953_v60 = vpop.f32.mrf.mxu2  ;;  %4659 = vmatpush.bf16.msra.mxu0 %v6676_v16 }
 0x4df   : > { %v3905_v28 = vadd.f32 %v3904_v27, %v3856_v25  ;;  %v3954_v38 = vadd.f32 %v3953_v60, %v7356_v41  ;;  %v4039_v43 = vmax.f32 %v4001_v36, 0.0 }
 0x4e0   : > { %v3858_v32 = vpop.f32.mrf.mxu0 }
 0x4e1   : > { %v4040_v35 = vmax.f32 %v3905_v28, 0.0  ;;  %v3859_v45 = vadd.f32 %v3858_v32, %v7350_v55 }
 0x4e3   : > { %v4066_v10 = vpack.c.bf16 %v4040_v35, %v4038_v15 }
 0x4e4   : > { %v4002_v47 = vpop.f32.mrf.mxu3 }
 0x4e5   : > { %v4003_v23 = vadd.f32 %v4002_v47, %v3954_v38  ;;  %4296 = vmatmul.bf16.gmra.mxu0 %v4066_v10  ;;  %4394 = vmatmul.bf16.gmra.mxu2 %v4066_v10 }
 0x4e6   : > { %v3907_v37 = vpop.f32.mrf.mxu1  ;;  %v3956_v52 = vpop.f32.mrf.mxu2 }
 0x4e7   : > { %v4041_v46 = vmax.f32 %v4003_v23, 0.0  ;;  %v3908_v40 = vadd.f32 %v3907_v37, %v3859_v45  ;;  %v3957_v61 = vadd.f32 %v3956_v52, %v7356_v41  ;;  %v6684_v37 = vld [vmem:[%s7687_s8 + $0x50] sm:$0xff] }
 0x4e8   : > { %v3860_v30 = vpop.f32.mrf.mxu0  ;;  %4708 = vmatpush.bf16.msra.mxu1 %v6684_v37 }
 0x4e9   : > { %v4067_v48 = vpack.c.bf16 %v4041_v46, %v4039_v43  ;;  %v3861_v53 = vadd.f32 %v3860_v30, %v7350_v55  ;;  %v4042_v29 = vmax.f32 %v3908_v40, 0.0 }
 0x4eb   : > { %4345 = vmatmul.bf16.gmra.mxu1 %v4067_v48  ;;  %4443 = vmatmul.bf16.gmra.mxu3 %v4067_v48 }
 0x4ec   : > { %v4005_v51 = vpop.f32.mrf.mxu3 }
 0x4ed   : > { %v4006_v17 = vadd.f32 %v4005_v51, %v3957_v61  ;;  %v6675_v61 = vld [vmem:[%s7687_s8 + $0x8] sm:$0xff] }
 0x4ee   : > { %v3909_v54 = vpop.f32.mrf.mxu1  ;;  %v3958_v56 = vpop.f32.mrf.mxu2  ;;  %4660 = vmatpush.bf16.msra.mxu0 %v6675_v61 }
 0x4ef   : > { %v3910_v50 = vadd.f32 %v3909_v54, %v3861_v53  ;;  %v3959_v0 = vadd.f32 %v3958_v56, %v7356_v41  ;;  %v4043_v42 = vmax.f32 %v4006_v17, 0.0 }
 0x4f0   : > { %v3863_v59 = vpop.f32.mrf.mxu0 }
 0x4f1   : > { %v4044_v62 = vmax.f32 %v3910_v50, 0.0  ;;  %v3864_v7 = vadd.f32 %v3863_v59, %v7350_v55 }
 0x4f3   : > { %v4068_v44 = vpack.c.bf16 %v4044_v62, %v4042_v29  ;;  %v6683_v62 = vld [vmem:[%s7687_s8 + $0x48] sm:$0xff] }
 0x4f4   : > { %v4007_v1 = vpop.f32.mrf.mxu3  ;;  %4709 = vmatpush.bf16.msra.mxu1 %v6683_v62 }
 0x4f5   : > { %v4008_v3 = vadd.f32 %v4007_v1, %v3959_v0  ;;  %4301 = vmatmul.bf16.gmra.mxu0 %v4068_v44  ;;  %4399 = vmatmul.bf16.gmra.mxu2 %v4068_v44 }
 0x4f6   : > { %v3912_v4 = vpop.f32.mrf.mxu1  ;;  %v3961_v5 = vpop.f32.mrf.mxu2 }
 0x4f7   : > { %v4045_v26 = vmax.f32 %v4008_v3, 0.0  ;;  %v3913_v19 = vadd.f32 %v3912_v4, %v3864_v7  ;;  %v3962_v6 = vadd.f32 %v3961_v5, %v7356_v41 }
 0x4f8   : > { %v3865_v39 = vpop.f32.mrf.mxu0 }
 0x4f9   : > { %v4069_v57 = vpack.c.bf16 %v4045_v26, %v4043_v42  ;;  %v3866_v63 = vadd.f32 %v3865_v39, %v7350_v55  ;;  %v4046_v31 = vmax.f32 %v3913_v19, 0.0 }
 0x4fb   : > { %4350 = vmatmul.bf16.gmra.mxu1 %v4069_v57  ;;  %4448 = vmatmul.bf16.gmra.mxu3 %v4069_v57 }
 0x4fc   : > { %v4010_v11 = vpop.f32.mrf.mxu3 }
 0x4fd   : > { %v4011_v21 = vadd.f32 %v4010_v11, %v3962_v6  ;;  %v6674_v6 = vld [vmem:[%s7687_s8] sm:$0xff] }
 0x4fe   : > { %v3914_v12 = vpop.f32.mrf.mxu1  ;;  %v3963_v13 = vpop.f32.mrf.mxu2  ;;  %4661 = vmatpush.bf16.msra.mxu0 %v6674_v6 }
 0x4ff   : > { %v3915_v14 = vadd.f32 %v3914_v12, %v3866_v63  ;;  %v3964_v22 = vadd.f32 %v3963_v13, %v7356_v41  ;;  %v4047_v60 = vmax.f32 %v4011_v21, 0.0 }
 0x500   : > { %v3868_v2 = vpop.f32.mrf.mxu0 }
 0x501   : > { %v4048_v20 = vmax.f32 %v3915_v14, 0.0  ;;  %v3869_v15 = vadd.f32 %v3868_v2, %v7350_v55 }
 0x503   : > { %v4070_v33 = vpack.c.bf16 %v4048_v20, %v4046_v31  ;;  %v6682_v20 = vld [vmem:[%s7687_s8 + $0x40] sm:$0xff] }
 0x504   : > { %v4012_v9 = vpop.f32.mrf.mxu3  ;;  %4710 = vmatpush.bf16.msra.mxu1 %v6682_v20 }
 0x505   : > { %v4013_v24 = vadd.f32 %v4012_v9, %v3964_v22  ;;  %4306 = vmatmul.bf16.gmra.mxu0 %v4070_v33  ;;  %4404 = vmatmul.bf16.gmra.mxu2 %v4070_v33 }
 0x506   : > { %v3917_v25 = vpop.f32.mrf.mxu1  ;;  %v3966_v27 = vpop.f32.mrf.mxu2 }
 0x507   : > { %v4049_v28 = vmax.f32 %v4013_v24, 0.0  ;;  %v3918_v36 = vadd.f32 %v3917_v25, %v3869_v15  ;;  %v3967_v46 = vadd.f32 %v3966_v27, %v7356_v41 }
 0x508   : > { %v3870_v34 = vpop.f32.mrf.mxu0 }
 0x509   : > { %v4071_v32 = vpack.c.bf16 %v4049_v28, %v4047_v60  ;;  %v3871_v38 = vadd.f32 %v3870_v34, %v7350_v55  ;;  %v4050_v43 = vmax.f32 %v3918_v36, 0.0 }
 0x50b   : > { %4355 = vmatmul.bf16.gmra.mxu1 %v4071_v32  ;;  %4453 = vmatmul.bf16.gmra.mxu3 %v4071_v32 }
 0x50c   : > { %v4015_v35 = vpop.f32.mrf.mxu3 }
 0x50d   : > { %v4016_v48 = vadd.f32 %v4015_v35, %v3967_v46 }
 0x50e   : > { %v3919_v10 = vpop.f32.mrf.mxu1  ;;  %v3968_v47 = vpop.f32.mrf.mxu2 }
 0x50f   : > { %v3920_v23 = vadd.f32 %v3919_v10, %v3871_v38  ;;  %v3969_v45 = vadd.f32 %v3968_v47, %v7356_v41  ;;  %v4051_v56 = vmax.f32 %v4016_v48, 0.0  ;;  %v6207_v47 = vld [vmem:[%s7686_s7 + $0x6] ss:$8 sm:$0x3] }
 0x510   : > { %v3873_v52 = vpop.f32.mrf.mxu0  ;;  %v7440_v48 = vperm.slane %v6207_v47, 1 }
 0x511   : > { %v4052_v30 = vmax.f32 %v3920_v23, 0.0  ;;  %v3874_v29 = vadd.f32 %v3873_v52, %v7350_v55  ;;  %v7437_v52 = vperm.slane %v6207_v47, 0 }
 0x513   : > { %v4072_v49 = vpack.c.bf16 %v4052_v30, %v4050_v43 }
 0x514   : > { %v4017_v51 = vpop.f32.mrf.mxu3 }
 0x515   : > { %v4018_v40 = vadd.f32 %v4017_v51, %v3969_v45  ;;  %4311 = vmatmul.bf16.gmra.mxu0 %v4072_v49  ;;  %4409 = vmatmul.bf16.gmra.mxu2 %v4072_v49 }
 0x516   : > { %v3922_v53 = vpop.f32.mrf.mxu1  ;;  %v3971_v54 = vpop.f32.mrf.mxu2 }
 0x517   : > { %v4053_v50 = vmax.f32 %v4018_v40, 0.0  ;;  %v3923_v0 = vadd.f32 %v3922_v53, %v3874_v29  ;;  %v3972_v26 = vadd.f32 %v3971_v54, %v7356_v41 }
 0x518   : > { %v3875_v58 = vpop.f32.mrf.mxu0 }
 0x519   : > { %v4073_v59 = vpack.c.bf16 %v4053_v50, %v4051_v56  ;;  %v3876_v44 = vadd.f32 %v3875_v58, %v7350_v55  ;;  %v4054_v42 = vmax.f32 %v3923_v0, 0.0 }
 0x51b   : > { %4360 = vmatmul.bf16.gmra.mxu1 %v4073_v59  ;;  %4458 = vmatmul.bf16.gmra.mxu3 %v4073_v59 }
 0x51c   : > { %v4020_v17 = vpop.f32.mrf.mxu3 }
 0x51d   : > { %v4021_v57 = vadd.f32 %v4020_v17, %v3972_v26 }
 0x51e   : > { %v3924_v1 = vpop.f32.mrf.mxu1  ;;  %v3973_v3 = vpop.f32.mrf.mxu2 }
 0x51f   : > { %v3925_v4 = vadd.f32 %v3924_v1, %v3876_v44  ;;  %v3974_v7 = vadd.f32 %v3973_v3, %v7356_v41  ;;  %v4055_v13 = vmax.f32 %v4021_v57, 0.0 }
 0x520   : > { %v3878_v5 = vpop.f32.mrf.mxu0 }
 0x521   : > { %v4056_v39 = vmax.f32 %v3925_v4, 0.0  ;;  %v3879_v31 = vadd.f32 %v3878_v5, %v7350_v55 }
 0x523   : > { %v4074_v8 = vpack.c.bf16 %v4056_v39, %v4054_v42 }
 0x524   : > { %v4022_v11 = vpop.f32.mrf.mxu3 }
 0x525   : > { %v4023_v19 = vadd.f32 %v4022_v11, %v3974_v7  ;;  %4316 = vmatmul.bf16.gmra.mxu0 %v4074_v8  ;;  %4414 = vmatmul.bf16.gmra.mxu2 %v4074_v8 }
 0x526   : > { %v3927_v63 = vpop.f32.mrf.mxu1  ;;  %v3976_v12 = vpop.f32.mrf.mxu2 }
 0x527   : > { %v4057_v14 = vmax.f32 %v4023_v19, 0.0  ;;  %v3928_v22 = vadd.f32 %v3927_v63, %v3879_v31  ;;  %v3977_v60 = vadd.f32 %v3976_v12, %v7356_v41 }
 0x528   : > { %v3880_v2 = vpop.f32.mrf.mxu0 }
 0x529   : > { %v4075_v18 = vpack.c.bf16 %v4057_v14, %v4055_v13  ;;  %v3881_v33 = vadd.f32 %v3880_v2, %v7350_v55  ;;  %v4058_v27 = vmax.f32 %v3928_v22, 0.0 }
 0x52b   : > { %4365 = vmatmul.bf16.gmra.mxu1 %v4075_v18  ;;  %4463 = vmatmul.bf16.gmra.mxu3 %v4075_v18 }
 0x52c   : > { %v4025_v21 = vpop.f32.mrf.mxu3 }
 0x52d   : > { %v4026_v34 = vadd.f32 %v4025_v21, %v3977_v60 }
 0x52e   : > { %v3929_v9 = vpop.f32.mrf.mxu1  ;;  %v3978_v25 = vpop.f32.mrf.mxu2 }
 0x52f   : > { %v3930_v24 = vadd.f32 %v3929_v9, %v3881_v33  ;;  %v3979_v32 = vadd.f32 %v3978_v25, %v7356_v41  ;;  %v4059_v36 = vmax.f32 %v4026_v34, 0.0 }
 0x531   : > { %v4060_v28 = vmax.f32 %v3930_v24, 0.0 }
 0x533   : > { %v4076_v15 = vpack.c.bf16 %v4060_v28, %v4058_v27 }
 0x534   : > { %v4027_v16 = vpop.f32.mrf.mxu3 }
 0x535   : > { %v4028_v35 = vadd.f32 %v4027_v16, %v3979_v32  ;;  %4321 = vmatmul.bf16.gmra.mxu0 %v4076_v15  ;;  %4419 = vmatmul.bf16.gmra.mxu2 %v4076_v15 }
 0x537   : > { %v4061_v38 = vmax.f32 %v4028_v35, 0.0 }
 0x539   : > { %v4077_v55 = vpack.c.bf16 %v4061_v38, %v4059_v36 }
 0x53b   : > { %4370 = vmatmul.bf16.gmra.mxu1 %v4077_v55  ;;  %4468 = vmatmul.bf16.gmra.mxu3 %v4077_v55 }
 0x542   : > { %v4287_v10 = vpop.f32.mrf.mxu0 }
 0x543   : > { %v4288_v43 = vadd.f32 %v4287_v10, %v7437_v52 }
 0x548   : > { %v4336_v23 = vpop.f32.mrf.mxu1  ;;  %v4385_v37 = vpop.f32.mrf.mxu2 }
 0x549   : > { %v4337_v30 = vadd.f32 %v4336_v23, %v4288_v43  ;;  %v4386_v56 = vadd.f32 %v4385_v37, %v7440_v48 }
 0x54a   : > { %v4289_v41 = vpop.f32.mrf.mxu0 }
 0x54b   : > { %v4290_v45 = vadd.f32 %v4289_v41, %v7437_v52  ;;  %v4474_v54 = vmax.f32 %v4337_v30, 0.0 }
 0x54e   : > { %v4434_v46 = vpop.f32.mrf.mxu3 }
 0x54f   : > { %v4435_v58 = vadd.f32 %v4434_v46, %v4386_v56 }
 0x550   : > { %v4338_v49 = vpop.f32.mrf.mxu1  ;;  %v4387_v51 = vpop.f32.mrf.mxu2 }
 0x551   : > { %v4339_v40 = vadd.f32 %v4338_v49, %v4290_v45  ;;  %v4388_v29 = vadd.f32 %v4387_v51, %v7440_v48  ;;  %v4475_v44 = vmax.f32 %v4435_v58, 0.0 }
 0x552   : > { %v4292_v53 = vpop.f32.mrf.mxu0 }
 0x553   : > { %v4476_v50 = vmax.f32 %v4339_v40, 0.0  ;;  %v4293_v5 = vadd.f32 %v4292_v53, %v7437_v52 }
 0x555   : > { %v4506_v59 = vpack.c.bf16 %v4476_v50, %v4474_v54 }
 0x556   : > { %v4436_v61 = vpop.f32.mrf.mxu3 }
 0x557   : > { %v4437_v62 = vadd.f32 %v4436_v61, %v4388_v29  ;;  %4662 = vmatmul.bf16.vlgmr.msra.gmra.mxu0 %v4506_v59 }
 0x558   : > { %v4341_v17 = vpop.f32.mrf.mxu1  ;;  %v4390_v0 = vpop.f32.mrf.mxu2 }
 0x559   : > { %v4477_v1 = vmax.f32 %v4437_v62, 0.0  ;;  %v4342_v26 = vadd.f32 %v4341_v17, %v4293_v5  ;;  %v4391_v63 = vadd.f32 %v4390_v0, %v7440_v48 }
 0x55a   : > { %v4294_v3 = vpop.f32.mrf.mxu0 }
 0x55b   : > { %v4507_v4 = vpack.c.bf16 %v4477_v1, %v4475_v44  ;;  %v4295_v39 = vadd.f32 %v4294_v3, %v7437_v52  ;;  %v4478_v19 = vmax.f32 %v4342_v26, 0.0 }
 0x55d   : > { %4711 = vmatmul.bf16.vlgmr.msra.gmra.mxu1 %v4507_v4 }
 0x55e   : > { %v4439_v42 = vpop.f32.mrf.mxu3 }
 0x55f   : > { %v4440_v13 = vadd.f32 %v4439_v42, %v4391_v63 }
 0x560   : > { %v4343_v57 = vpop.f32.mrf.mxu1  ;;  %v4392_v7 = vpop.f32.mrf.mxu2 }
 0x561   : > { %v4344_v8 = vadd.f32 %v4343_v57, %v4295_v39  ;;  %v4393_v14 = vadd.f32 %v4392_v7, %v7440_v48  ;;  %v4479_v21 = vmax.f32 %v4440_v13, 0.0 }
 0x562   : > { %v4297_v11 = vpop.f32.mrf.mxu0 }
 0x563   : > { %v4480_v12 = vmax.f32 %v4344_v8, 0.0  ;;  %v4298_v24 = vadd.f32 %v4297_v11, %v7437_v52 }
 0x565   : > { %v4508_v18 = vpack.c.bf16 %v4480_v12, %v4478_v19 }
 0x566   : > { %v4441_v2 = vpop.f32.mrf.mxu3 }
 0x567   : > { %v4442_v31 = vadd.f32 %v4441_v2, %v4393_v14  ;;  %4667 = vmatmul.bf16.gmra.mxu0 %v4508_v18 }
 0x568   : > { %v4346_v6 = vpop.f32.mrf.mxu1  ;;  %v4395_v20 = vpop.f32.mrf.mxu2 }
 0x569   : > { %v4481_v22 = vmax.f32 %v4442_v31, 0.0  ;;  %v4347_v27 = vadd.f32 %v4346_v6, %v4298_v24  ;;  %v4396_v35 = vadd.f32 %v4395_v20, %v7440_v48 }
 0x56a   : > { %v4299_v33 = vpop.f32.mrf.mxu0 }
 0x56b   : > { %v4509_v9 = vpack.c.bf16 %v4481_v22, %v4479_v21  ;;  %v4300_v60 = vadd.f32 %v4299_v33, %v7437_v52  ;;  %v4482_v16 = vmax.f32 %v4347_v27, 0.0 }
 0x56d   : > { %4716 = vmatmul.bf16.gmra.mxu1 %v4509_v9 }
 0x56e   : > { %v4444_v25 = vpop.f32.mrf.mxu3 }
 0x56f   : > { %v4445_v38 = vadd.f32 %v4444_v25, %v4396_v35 }
 0x570   : > { %v4348_v28 = vpop.f32.mrf.mxu1  ;;  %v4397_v34 = vpop.f32.mrf.mxu2 }
 0x571   : > { %v4349_v32 = vadd.f32 %v4348_v28, %v4300_v60  ;;  %v4398_v55 = vadd.f32 %v4397_v34, %v7440_v48  ;;  %v4483_v43 = vmax.f32 %v4445_v38, 0.0 }
 0x572   : > { %v4302_v15 = vpop.f32.mrf.mxu0 }
 0x573   : > { %v4484_v36 = vmax.f32 %v4349_v32, 0.0  ;;  %v4303_v49 = vadd.f32 %v4302_v15, %v7437_v52 }
 0x575   : > { %v4510_v10 = vpack.c.bf16 %v4484_v36, %v4482_v16 }
 0x576   : > { %v4446_v47 = vpop.f32.mrf.mxu3 }
 0x577   : > { %v4447_v23 = vadd.f32 %v4446_v47, %v4398_v55  ;;  %4672 = vmatmul.bf16.gmra.mxu0 %v4510_v10 }
 0x578   : > { %v4351_v37 = vpop.f32.mrf.mxu1  ;;  %v4400_v41 = vpop.f32.mrf.mxu2 }
 0x579   : > { %v4485_v46 = vmax.f32 %v4447_v23, 0.0  ;;  %v4352_v40 = vadd.f32 %v4351_v37, %v4303_v49  ;;  %v4401_v29 = vadd.f32 %v4400_v41, %v7440_v48 }
 0x57a   : > { %v4304_v30 = vpop.f32.mrf.mxu0 }
 0x57b   : > { %v4511_v45 = vpack.c.bf16 %v4485_v46, %v4483_v43  ;;  %v4305_v53 = vadd.f32 %v4304_v30, %v7437_v52  ;;  %v4486_v59 = vmax.f32 %v4352_v40, 0.0 }
 0x57d   : > { %4721 = vmatmul.bf16.gmra.mxu1 %v4511_v45 }
 0x57e   : > { %v4449_v51 = vpop.f32.mrf.mxu3 }
 0x57f   : > { %v4450_v62 = vadd.f32 %v4449_v51, %v4401_v29 }
 0x580   : > { %v4353_v54 = vpop.f32.mrf.mxu1  ;;  %v4402_v56 = vpop.f32.mrf.mxu2 }
 0x581   : > { %v4354_v50 = vadd.f32 %v4353_v54, %v4305_v53  ;;  %v4403_v17 = vadd.f32 %v4402_v56, %v7440_v48  ;;  %v4487_v5 = vmax.f32 %v4450_v62, 0.0 }
 0x582   : > { %v4307_v58 = vpop.f32.mrf.mxu0 }
 0x583   : > { %v4488_v61 = vmax.f32 %v4354_v50, 0.0  ;;  %v4308_v57 = vadd.f32 %v4307_v58, %v7437_v52 }
 0x585   : > { %v4512_v0 = vpack.c.bf16 %v4488_v61, %v4486_v59 }
 0x586   : > { %v4451_v44 = vpop.f32.mrf.mxu3 }
 0x587   : > { %v4452_v1 = vadd.f32 %v4451_v44, %v4403_v17  ;;  %4677 = vmatmul.bf16.gmra.mxu0 %v4512_v0 }
 0x588   : > { %v4356_v3 = vpop.f32.mrf.mxu1  ;;  %v4405_v4 = vpop.f32.mrf.mxu2 }
 0x589   : > { %v4489_v42 = vmax.f32 %v4452_v1, 0.0  ;;  %v4357_v8 = vadd.f32 %v4356_v3, %v4308_v57  ;;  %v4406_v18 = vadd.f32 %v4405_v4, %v7440_v48 }
 0x58a   : > { %v4309_v26 = vpop.f32.mrf.mxu0 }
 0x58b   : > { %v4513_v39 = vpack.c.bf16 %v4489_v42, %v4487_v5  ;;  %v4310_v11 = vadd.f32 %v4309_v26, %v7437_v52  ;;  %v4490_v14 = vmax.f32 %v4357_v8, 0.0 }
 0x58d   : > { %4726 = vmatmul.bf16.gmra.mxu1 %v4513_v39 }
 0x58e   : > { %v4454_v7 = vpop.f32.mrf.mxu3 }
 0x58f   : > { %v4455_v31 = vadd.f32 %v4454_v7, %v4406_v18 }
 0x590   : > { %v4358_v19 = vpop.f32.mrf.mxu1  ;;  %v4407_v63 = vpop.f32.mrf.mxu2 }
 0x591   : > { %v4359_v12 = vadd.f32 %v4358_v19, %v4310_v11  ;;  %v4408_v20 = vadd.f32 %v4407_v63, %v7440_v48  ;;  %v4491_v24 = vmax.f32 %v4455_v31, 0.0 }
 0x592   : > { %v4312_v13 = vpop.f32.mrf.mxu0 }
 0x593   : > { %v4492_v2 = vmax.f32 %v4359_v12, 0.0  ;;  %v4313_v28 = vadd.f32 %v4312_v13, %v7437_v52 }
 0x595   : > { %v4514_v6 = vpack.c.bf16 %v4492_v2, %v4490_v14 }
 0x596   : > { %v4456_v21 = vpop.f32.mrf.mxu3 }
 0x597   : > { %v4457_v22 = vadd.f32 %v4456_v21, %v4408_v20  ;;  %4682 = vmatmul.bf16.gmra.mxu0 %v4514_v6 }
 0x598   : > { %v4361_v33 = vpop.f32.mrf.mxu1  ;;  %v4410_v9 = vpop.f32.mrf.mxu2 }
 0x599   : > { %v4493_v25 = vmax.f32 %v4457_v22, 0.0  ;;  %v4362_v32 = vadd.f32 %v4361_v33, %v4313_v28  ;;  %v4411_v10 = vadd.f32 %v4410_v9, %v7440_v48 }
 0x59a   : > { %v4314_v27 = vpop.f32.mrf.mxu0 }
 0x59b   : > { %v4515_v60 = vpack.c.bf16 %v4493_v25, %v4491_v24  ;;  %v4315_v15 = vadd.f32 %v4314_v27, %v7437_v52  ;;  %v4494_v55 = vmax.f32 %v4362_v32, 0.0 }
 0x59d   : > { %4731 = vmatmul.bf16.gmra.mxu1 %v4515_v60 }
 0x59e   : > { %v4459_v34 = vpop.f32.mrf.mxu3 }
 0x59f   : > { %v4460_v23 = vadd.f32 %v4459_v34, %v4411_v10 }
 0x5a0   : > { %v4363_v16 = vpop.f32.mrf.mxu1  ;;  %v4412_v35 = vpop.f32.mrf.mxu2 }
 0x5a1   : > { %v4364_v36 = vadd.f32 %v4363_v16, %v4315_v15  ;;  %v4413_v41 = vadd.f32 %v4412_v35, %v7440_v48  ;;  %v4495_v49 = vmax.f32 %v4460_v23, 0.0 }
 0x5a2   : > { %v4317_v38 = vpop.f32.mrf.mxu0 }
 0x5a3   : > { %v4496_v47 = vmax.f32 %v4364_v36, 0.0  ;;  %v4318_v54 = vadd.f32 %v4317_v38, %v7437_v52 }
 0x5a5   : > { %v4516_v37 = vpack.c.bf16 %v4496_v47, %v4494_v55 }
 0x5a6   : > { %v4461_v43 = vpop.f32.mrf.mxu3 }
 0x5a7   : > { %v4462_v46 = vadd.f32 %v4461_v43, %v4413_v41  ;;  %4687 = vmatmul.bf16.gmra.mxu0 %v4516_v37 }
 0x5a8   : > { %v4366_v30 = vpop.f32.mrf.mxu1  ;;  %v4415_v45 = vpop.f32.mrf.mxu2 }
 0x5a9   : > { %v4497_v51 = vmax.f32 %v4462_v46, 0.0  ;;  %v4367_v50 = vadd.f32 %v4366_v30, %v4318_v54  ;;  %v4416_v0 = vadd.f32 %v4415_v45, %v7440_v48 }
 0x5aa   : > { %v4319_v40 = vpop.f32.mrf.mxu0 }
 0x5ab   : > { %v4517_v53 = vpack.c.bf16 %v4497_v51, %v4495_v49  ;;  %v4320_v58 = vadd.f32 %v4319_v40, %v7437_v52  ;;  %v4498_v17 = vmax.f32 %v4367_v50, 0.0 }
 0x5ad   : > { %4736 = vmatmul.bf16.gmra.mxu1 %v4517_v53 }
 0x5ae   : > { %v4464_v56 = vpop.f32.mrf.mxu3 }
 0x5af   : > { %v4465_v1 = vadd.f32 %v4464_v56, %v4416_v0 }
 0x5b0   : > { %v4368_v59 = vpop.f32.mrf.mxu1  ;;  %v4417_v29 = vpop.f32.mrf.mxu2 }
 0x5b1   : > { %v4369_v61 = vadd.f32 %v4368_v59, %v4320_v58  ;;  %v4418_v4 = vadd.f32 %v4417_v29, %v7440_v48  ;;  %v4499_v57 = vmax.f32 %v4465_v1, 0.0 }
 0x5b2   : > { %v4322_v62 = vpop.f32.mrf.mxu0 }
 0x5b3   : > { %v4500_v44 = vmax.f32 %v4369_v61, 0.0  ;;  %v4323_v19 = vadd.f32 %v4322_v62, %v7437_v52 }
 0x5b5   : > { %v4518_v3 = vpack.c.bf16 %v4500_v44, %v4498_v17 }
 0x5b6   : > { %v4466_v5 = vpop.f32.mrf.mxu3 }
 0x5b7   : > { %v4467_v42 = vadd.f32 %v4466_v5, %v4418_v4  ;;  %4692 = vmatmul.bf16.gmra.mxu0 %v4518_v3 }
 0x5b8   : > { %v4371_v26 = vpop.f32.mrf.mxu1  ;;  %v4420_v39 = vpop.f32.mrf.mxu2 }
 0x5b9   : > { %v4501_v7 = vmax.f32 %v4467_v42, 0.0  ;;  %v4372_v12 = vadd.f32 %v4371_v26, %v4323_v19  ;;  %v4421_v6 = vadd.f32 %v4420_v39, %v7440_v48 }
 0x5ba   : > { %v4324_v11 = vpop.f32.mrf.mxu0 }
 0x5bb   : > { %v4519_v8 = vpack.c.bf16 %v4501_v7, %v4499_v57  ;;  %v4325_v13 = vadd.f32 %v4324_v11, %v7437_v52  ;;  %v4502_v31 = vmax.f32 %v4372_v12, 0.0  ;;  %v7476_v52 = vld [vmem:[%s7688_s9] ss:$0 sm:$0xff] }
 0x5bd   : > { %4741 = vmatmul.bf16.gmra.mxu1 %v4519_v8 }
 0x5be   : > { %v4469_v63 = vpop.f32.mrf.mxu3 }
 0x5bf   : > { %v4470_v21 = vadd.f32 %v4469_v63, %v4421_v6 }
 0x5c0   : > { %v4373_v14 = vpop.f32.mrf.mxu1  ;;  %v4422_v2 = vpop.f32.mrf.mxu2 }
 0x5c1   : > { %v4374_v18 = vadd.f32 %v4373_v14, %v4325_v13  ;;  %v4423_v33 = vadd.f32 %v4422_v2, %v7440_v48  ;;  %v4503_v25 = vmax.f32 %v4470_v21, 0.0 }
 0x5c3   : > { %v4504_v20 = vmax.f32 %v4374_v18, 0.0 }
 0x5c5   : > { %v4520_v22 = vpack.c.bf16 %v4504_v20, %v4502_v31 }
 0x5c6   : > { %v4471_v9 = vpop.f32.mrf.mxu3 }
 0x5c7   : > { %v4472_v24 = vadd.f32 %v4471_v9, %v4423_v33  ;;  %4697 = vmatmul.bf16.gmra.mxu0 %v4520_v22 }
 0x5c9   : > { %v4505_v27 = vmax.f32 %v4472_v24, 0.0 }
 0x5cb   : > { %v4521_v60 = vpack.c.bf16 %v4505_v27, %v4503_v25 }
 0x5cd   : > { %4746 = vmatmul.bf16.gmra.mxu1 %v4521_v60 }
 0x5d4   : > { %v4663_v28 = vpop.f32.mrf.mxu0 }
 0x5d5   : > { %v4664_v34 = vadd.f32 %v7476_v52, %v4663_v28 }
 0x5da   : > { %v4712_v32 = vpop.f32.mrf.mxu1 }
 0x5db   : > { %v7479_v15 = vadd.f32 %v4712_v32, %v4664_v34 }
 0x5dc   : > { %v4665_v16 = vpop.f32.mrf.mxu0 }
 0x5dd   : > { %v4752_v48 = vand.u32 2147483647, %v7479_v15  ;;  %v4666_v38 = vadd.f32 %v7476_v52, %v4665_v16  ;;  %vm5072_vm9 = vcmp.ge.f32.partialorder %v7479_v15, 0.0 }
 0x5df   : > { %v4768_v35 = vsub.f32 0.0, %v4752_v48 }
 0x5e1   : > { %v4784_v36 = vmul.f32 1.442695, %v4768_v35 }
 0x5e2   : > { %v4714_v55 = vpop.f32.mrf.mxu1 }
 0x5e3   : > { %6720 = vpow2.f32 %v4784_v36  ;;  %v7483_v10 = vadd.f32 %v4714_v55, %v4666_v38 }
 0x5e4   : > { %v4668_v47 = vpop.f32.mrf.mxu0 }
 0x5e5   : > { %v4753_v23 = vand.u32 2147483647, %v7483_v10  ;;  %v4669_v46 = vadd.f32 %v7476_v52, %v4668_v47  ;;  %vm5073_vm14 = vcmp.ge.f32.partialorder %v7483_v10, 0.0 }
 0x5e7   : > { %v4769_v37 = vsub.f32 0.0, %v4753_v23 }
 0x5e9   : > { %v6721_v41 = vpop.eup %6720  ;;  %v4786_v43 = vmul.f32 1.442695, %v4769_v37 }
 0x5ea   : > { %v4816_v30 = vadd.f32 1.0, %v6721_v41  ;;  %v4717_v45 = vpop.f32.mrf.mxu1 }
 0x5eb   : > { %6722 = vpow2.f32 %v4786_v43  ;;  %v7487_v49 = vadd.f32 %v4717_v45, %v4669_v46 }
 0x5ec   : > { %6724 = vrcp.f32 %v4816_v30  ;;  %v4670_v51 = vpop.f32.mrf.mxu0  ;;  %v4841_v1 = vand.u32 2147483647, %v4816_v30  ;;  %v4843_v3 = vand.u32 2147483648, %v4816_v30  ;;  %vm4837_vm5 = vweird.f32 %v4816_v30 }
 0x5ed   : > { %v4754_v40 = vand.u32 2147483647, %v7487_v49  ;;  %v4671_v50 = vadd.f32 %v7476_v52, %v4670_v51  ;;  %vm5074_vm3 = vcmp.ge.f32.partialorder %v7487_v49, 0.0 }
 0x5ee   : > { %vm4842_vm7 = vcmp.eq.f32.partialorder %v4841_v1, 8.507059e+37  ;;  %v4844_v7 = vor.u32 1.1754944e-38, %v4843_v3 }
 0x5ef   : > { %v4770_v53 = vsub.f32 0.0, %v4754_v40 }
 0x5f1   : > { %v7491_v54 = vpop.eup %6722  ;;  %v4788_v56 = vmul.f32 1.442695, %v4770_v53 }
 0x5f2   : > { %v6725_v58 = vpop.eup %6724  ;;  %v4817_v59 = vadd.f32 1.0, %v7491_v54  ;;  %v4719_v29 = vpop.f32.mrf.mxu1 }
 0x5f3   : > { %v4833_v61 = vmul.f32 %v6725_v58, %v4816_v30  ;;  %6726 = vpow2.f32 %v4788_v56  ;;  %v7495_v62 = vadd.f32 %v4719_v29, %v4671_v50  ;;  %vm4838_vm4 = vweird.f32 %v6725_v58 }
 0x5f4   : > { %6728 = vrcp.f32 %v4817_v59  ;;  %v4673_v17 = vpop.f32.mrf.mxu0  ;;  %vm4839_vm6 = vmor %vm4837_vm5, %vm4838_vm4  ;;  %v4856_v6 = vand.u32 2147483647, %v4817_v59  ;;  %v4858_v20 = vand.u32 2147483648, %v4817_v59  ;;  %vm4852_vm11 = vweird.f32 %v4817_v59 }
 0x5f5   : > { %v4834_v0 = vsub.f32 1.0, %v4833_v61  ;;  %v4755_v44 = vand.u32 2147483647, %v7495_v62  ;;  %v4674_v12 = vadd.f32 %v7476_v52, %v4673_v17 }
 0x5f6   : > { %v4859_v60 = vor.u32 1.1754944e-38, %v4858_v20  ;;  %vm4857_vm13 = vcmp.eq.f32.partialorder %v4856_v6, 8.507059e+37 }
 0x5f7   : > { %v4835_v4 = vmul.f32 %v6725_v58, %v4834_v0  ;;  %v4771_v5 = vsub.f32 0.0, %v4755_v44 }
 0x5f9   : > { %v7498_v42 = vpop.eup %6726  ;;  %v4836_v26 = vadd.f32 %v6725_v58, %v4835_v4  ;;  %v4790_v39 = vmul.f32 1.442695, %v4771_v5 }
 0x5fa   : > { %v6729_v57 = vpop.eup %6728  ;;  %v4818_v8 = vadd.f32 1.0, %v7498_v42  ;;  %v4722_v11 = vpop.f32.mrf.mxu1 }
 0x5fb   : > { %v4840_v19 = vsel %vm4839_vm6, %v6725_v58, %v4836_v26  ;;  %v4848_v63 = vmul.f32 %v6729_v57, %v4817_v59  ;;  %6730 = vpow2.f32 %v4790_v39  ;;  %v7507_v31 = vadd.f32 %v4722_v11, %v4674_v12 }
 0x5fc   : > { %v4845_v13 = vsel %vm4842_vm7, %v4844_v7, %v4840_v19  ;;  %6732 = vrcp.f32 %v4818_v8  ;;  %v4675_v14 = vpop.f32.mrf.mxu0  ;;  %vm4853_vm10 = vweird.f32 %v6729_v57  ;;  %v4873_v47 = vand.u32 2147483648, %v4818_v8 }
 0x5fd   : > { %v5088_v18 = vmul.f32 %v6721_v41, %v4845_v13  ;;  %v4849_v2 = vsub.f32 1.0, %v4848_v63  ;;  %v4756_v33 = vand.u32 2147483647, %v7507_v31  ;;  %vm4854_vm12 = vmor %vm4852_vm11, %vm4853_vm10  ;;  %v4676_v35 = vadd.f32 %v7476_v52, %v4675_v14 }
 0x5fe   : > { %v4871_v43 = vand.u32 2147483647, %v4818_v8  ;;  %vm4867_vm0 = vweird.f32 %v4818_v8  ;;  %v4874_v40 = vor.u32 1.1754944e-38, %v4873_v47 }
 0x5ff   : > { %v5104_v21 = vsel %vm5072_vm9, %v4845_v13, %v5088_v18  ;;  %v4850_v22 = vmul.f32 %v6729_v57, %v4849_v2  ;;  %v4772_v25 = vsub.f32 0.0, %v4756_v33  ;;  %vm5075_vm9 = vcmp.ge.f32.partialorder %v7495_v62, 0.0 }
 0x600   : > { %5121 = vst.msk [vmem:[%s7505_s11] sm:$0xff] %vm5120_vm8, %v5104_v21  ;;  %vm4872_vm2 = vcmp.eq.f32.partialorder %v4871_v43, 8.507059e+37 }
 0x601   : > { %v7513_v9 = vpop.eup %6730  ;;  %v4851_v24 = vadd.f32 %v6729_v57, %v4850_v22  ;;  %v4792_v16 = vmul.f32 1.442695, %v4772_v25 }
 0x602   : > { %v6733_v27 = vpop.eup %6732  ;;  %v4819_v28 = vadd.f32 1.0, %v7513_v9  ;;  %v4724_v34 = vpop.f32.mrf.mxu1 }
 0x603   : > { %v4855_v32 = vsel %vm4854_vm12, %v6729_v57, %v4851_v24  ;;  %v4863_v15 = vmul.f32 %v6733_v27, %v4818_v8  ;;  %v7519_v23 = vadd.f32 %v4724_v34, %v4676_v35  ;;  %vm4868_vm15 = vweird.f32 %v6733_v27 }
 0x604   : > { %v4860_v48 = vsel %vm4857_vm13, %v4859_v60, %v4855_v32  ;;  %6734 = vrcp.f32 %v4819_v28  ;;  %v4678_v36 = vpop.f32.mrf.mxu0  ;;  %vm4869_vm1 = vmor %vm4867_vm0, %vm4868_vm15  ;;  %v4886_v3 = vand.u32 2147483647, %v4819_v28  ;;  %v4888_v4 = vand.u32 2147483648, %v4819_v28 }
 0x605   : > { %v5089_v38 = vmul.f32 %v7491_v54, %v4860_v48  ;;  %v4864_v55 = vsub.f32 1.0, %v4863_v15  ;;  %6736 = vpow2.f32 %v4792_v16  ;;  %v4757_v46 = vand.u32 2147483647, %v7519_v23 }
 0x606   : > { %v4679_v45 = vadd.f32 %v7476_v52, %v4678_v36  ;;  %vm4882_vm5 = vweird.f32 %v4819_v28  ;;  %vm4887_vm7 = vcmp.eq.f32.partialorder %v4886_v3, 8.507059e+37 }
 0x607   : > { %v5105_v37 = vsel %vm5073_vm14, %v4860_v48, %v5089_v38  ;;  %v4865_v41 = vmul.f32 %v6733_v27, %v4864_v55  ;;  %v4773_v53 = vsub.f32 0.0, %v4757_v46  ;;  %vm5076_vm14 = vcmp.ge.f32.partialorder %v7507_v31, 0.0 }
 0x608   : > { %5122 = vst.msk [vmem:[%s7505_s11 + $0x8] sm:$0xff] %vm5120_vm8, %v5105_v37 }
 0x609   : > { %v4866_v30 = vadd.f32 %v6733_v27, %v4865_v41  ;;  %v4794_v61 = vmul.f32 1.442695, %v4773_v53 }
 0x60a   : > { %v6735_v51 = vpop.eup %6734  ;;  %v4727_v10 = vpop.f32.mrf.mxu1 }
 0x60b   : > { %v7525_v54 = vpop.eup %6736  ;;  %v4870_v56 = vsel %vm4869_vm1, %v6733_v27, %v4866_v30  ;;  %v4878_v50 = vmul.f32 %v6735_v51, %v4819_v28  ;;  %v7527_v58 = vadd.f32 %v4727_v10, %v4679_v45  ;;  %vm4883_vm4 = vweird.f32 %v6735_v51 }
 0x60c   : > { %v4875_v59 = vsel %vm4872_vm2, %v4874_v40, %v4870_v56  ;;  %v4820_v29 = vadd.f32 1.0, %v7525_v54  ;;  %v4680_v17 = vpop.f32.mrf.mxu0  ;;  %vm4884_vm6 = vmor %vm4882_vm5, %vm4883_vm4  ;;  %vm5077_vm5 = vcmp.ge.f32.partialorder %v7519_v23, 0.0 }
 0x60d   : > { %v5090_v0 = vmul.f32 %v7498_v42, %v4875_v59  ;;  %v4879_v44 = vsub.f32 1.0, %v4878_v50  ;;  %v4758_v1 = vand.u32 2147483647, %v7527_v58  ;;  %v4681_v49 = vadd.f32 %v7476_v52, %v4680_v17 }
 0x60e   : > { %6738 = vrcp.f32 %v4820_v29  ;;  %v4889_v42 = vor.u32 1.1754944e-38, %v4888_v4  ;;  %v4901_v24 = vand.u32 2147483647, %v4820_v29  ;;  %v4903_v25 = vand.u32 2147483648, %v4820_v29 }
 0x60f   : > { %v5106_v5 = vsel %vm5074_vm3, %v4875_v59, %v5090_v0  ;;  %v4880_v26 = vmul.f32 %v6735_v51, %v4879_v44  ;;  %6740 = vpow2.f32 %v4794_v61  ;;  %v4774_v39 = vsub.f32 0.0, %v4758_v1 }
 0x610   : > { %5123 = vst.msk [vmem:[%s7505_s11 + $0x10] sm:$0xff] %vm5120_vm8, %v5106_v5  ;;  %vm4897_vm11 = vweird.f32 %v4820_v29  ;;  %v4904_v16 = vor.u32 1.1754944e-38, %v4903_v25  ;;  %vm4902_vm13 = vcmp.eq.f32.partialorder %v4901_v24, 8.507059e+37 }
 0x611   : > { %v4881_v57 = vadd.f32 %v6735_v51, %v4880_v26  ;;  %v4796_v7 = vmul.f32 1.442695, %v4774_v39 }
 0x612   : > { %v4729_v8 = vpop.f32.mrf.mxu1 }
 0x613   : > { %v4885_v11 = vsel %vm4884_vm6, %v6735_v51, %v4881_v57  ;;  %6742 = vpow2.f32 %v4796_v7  ;;  %v7536_v19 = vadd.f32 %v4729_v8, %v4681_v49 }
 0x614   : > { %v6739_v63 = vpop.eup %6738  ;;  %v4890_v12 = vsel %vm4887_vm7, %v4889_v42, %v4885_v11  ;;  %v4683_v13 = vpop.f32.mrf.mxu0 }
 0x615   : > { %v7538_v14 = vpop.eup %6740  ;;  %v5091_v18 = vmul.f32 %v7513_v9, %v4890_v12  ;;  %v4893_v2 = vmul.f32 %v6739_v63, %v4820_v29  ;;  %v4759_v6 = vand.u32 2147483647, %v7536_v19  ;;  %vm4898_vm10 = vweird.f32 %v6739_v63 }
 0x616   : > { %v4821_v20 = vadd.f32 1.0, %v7538_v14  ;;  %v4684_v28 = vadd.f32 %v7476_v52, %v4683_v13  ;;  %vm4899_vm12 = vmor %vm4897_vm11, %vm4898_vm10 }
 0x617   : > { %v5107_v21 = vsel %vm5075_vm9, %v4890_v12, %v5091_v18  ;;  %v4894_v22 = vsub.f32 1.0, %v4893_v2  ;;  %v4775_v33 = vsub.f32 0.0, %v4759_v6  ;;  %vm5078_vm9 = vcmp.ge.f32.partialorder %v7527_v58, 0.0 }
 0x618   : > { %5124 = vst.msk [vmem:[%s7505_s11 + $0x18] sm:$0xff] %vm5120_vm8, %v5107_v21  ;;  %6744 = vrcp.f32 %v4821_v20  ;;  %v4916_v40 = vand.u32 2147483647, %v4821_v20  ;;  %v4918_v53 = vand.u32 2147483648, %v4821_v20  ;;  %vm4912_vm0 = vweird.f32 %v4821_v20 }
 0x619   : > { %v7546_v27 = vpop.eup %6742  ;;  %v4895_v60 = vmul.f32 %v6739_v63, %v4894_v22  ;;  %v4798_v9 = vmul.f32 1.442695, %v4775_v33 }
 0x61a   : > { %v7550_v34 = vadd.f32 1.0, %v7546_v27  ;;  %v4732_v62 = vpop.f32.mrf.mxu1  ;;  %vm4917_vm2 = vcmp.eq.f32.partialorder %v4916_v40, 8.507059e+37  ;;  %v4919_v0 = vor.u32 1.1754944e-38, %v4918_v53 }
 0x61b   : > { %v4896_v32 = vadd.f32 %v6739_v63, %v4895_v60  ;;  %6746 = vpow2.f32 %v4798_v9  ;;  %v7552_v15 = vadd.f32 %v4732_v62, %v4684_v28 }
 0x61c   : > { %6748 = vrcp.f32 %v7550_v34  ;;  %v4685_v48 = vpop.f32.mrf.mxu0  ;;  %v4931_v44 = vand.u32 2147483647, %v7550_v34  ;;  %v4933_v1 = vand.u32 2147483648, %v7550_v34  ;;  %vm4927_vm4 = vweird.f32 %v7550_v34 }
 0x61d   : > { %v4900_v35 = vsel %vm4899_vm12, %v6739_v63, %v4896_v32  ;;  %v4760_v36 = vand.u32 2147483647, %v7552_v15  ;;  %v4686_v56 = vadd.f32 %v7476_v52, %v4685_v48 }
 0x61e   : > { %v6745_v38 = vpop.eup %6744  ;;  %v4905_v55 = vsel %vm4902_vm13, %v4904_v16, %v4900_v35  ;;  %v4934_v8 = vor.u32 1.1754944e-38, %v4933_v1  ;;  %vm4932_vm7 = vcmp.eq.f32.partialorder %v4931_v44, 8.507059e+37 }
 0x61f   : > { %v5092_v47 = vmul.f32 %v7525_v54, %v4905_v55  ;;  %v4908_v37 = vmul.f32 %v6745_v38, %v4821_v20  ;;  %v4776_v41 = vsub.f32 0.0, %v4760_v36  ;;  %vm4913_vm15 = vweird.f32 %v6745_v38 }
 0x620   : > { %vm4914_vm1 = vmor %vm4912_vm0, %vm4913_vm15 }
 0x621   : > { %v7558_v43 = vpop.eup %6746  ;;  %v5108_v46 = vsel %vm5076_vm14, %v4905_v55, %v5092_v47  ;;  %v4909_v30 = vsub.f32 1.0, %v4908_v37  ;;  %v4800_v45 = vmul.f32 1.442695, %v4776_v41  ;;  %vm5079_vm14 = vcmp.ge.f32.partialorder %v7536_v19, 0.0 }
 0x622   : > { %v6749_v51 = vpop.eup %6748  ;;  %5125 = vst.msk [vmem:[%s7505_s11 + $0x20] sm:$0xff] %vm5120_vm8, %v5108_v46  ;;  %v7563_v10 = vadd.f32 1.0, %v7558_v43  ;;  %v4734_v54 = vpop.f32.mrf.mxu1 }
 0x623   : > { %v4910_v50 = vmul.f32 %v6745_v38, %v4909_v30  ;;  %v4923_v31 = vmul.f32 %v6749_v51, %v7550_v34  ;;  %6750 = vpow2.f32 %v4800_v45  ;;  %v7568_v17 = vadd.f32 %v4734_v54, %v4686_v56 }
 0x624   : > { %6752 = vrcp.f32 %v7563_v10  ;;  %v4688_v59 = vpop.f32.mrf.mxu0  ;;  %vm4928_vm3 = vweird.f32 %v6749_v51  ;;  %v4946_v22 = vand.u32 2147483647, %v7563_v10  ;;  %v4948_v33 = vand.u32 2147483648, %v7563_v10 }
 0x625   : > { %v4911_v29 = vadd.f32 %v6745_v38, %v4910_v50  ;;  %v4924_v61 = vsub.f32 1.0, %v4923_v31  ;;  %v4761_v5 = vand.u32 2147483647, %v7568_v17  ;;  %vm4929_vm6 = vmor %vm4927_vm4, %vm4928_vm3  ;;  %v4689_v2 = vadd.f32 %v7476_v52, %v4688_v59 }
 0x626   : > { %vm4942_vm11 = vweird.f32 %v7563_v10  ;;  %v4949_v34 = vor.u32 1.1754944e-38, %v4948_v33  ;;  %vm4947_vm13 = vcmp.eq.f32.partialorder %v4946_v22, 8.507059e+37  ;;  %vm5080_vm3 = vcmp.ge.f32.partialorder %v7552_v15, 0.0 }
 0x627   : > { %v4915_v3 = vsel %vm4914_vm1, %v6745_v38, %v4911_v29  ;;  %v4925_v4 = vmul.f32 %v6749_v51, %v4924_v61  ;;  %v4777_v49 = vsub.f32 0.0, %v4761_v5 }
 0x628   : > { %v4920_v26 = vsel %vm4917_vm2, %v4919_v0, %v4915_v3 }
 0x629   : > { %v7573_v39 = vpop.eup %6750  ;;  %v5093_v57 = vmul.f32 %v7538_v14, %v4920_v26  ;;  %v4926_v7 = vadd.f32 %v6749_v51, %v4925_v4  ;;  %v4802_v21 = vmul.f32 1.442695, %v4777_v49 }
 0x62a   : > { %v6753_v42 = vpop.eup %6752  ;;  %v7579_v11 = vadd.f32 1.0, %v7573_v39  ;;  %v4737_v63 = vpop.f32.mrf.mxu1 }
 0x62b   : > { %v5109_v12 = vsel %vm5077_vm5, %v4920_v26, %v5093_v57  ;;  %v4930_v13 = vsel %vm4929_vm6, %v6749_v51, %v4926_v7  ;;  %v4938_v18 = vmul.f32 %v6753_v42, %v7563_v10  ;;  %v7590_v24 = vadd.f32 %v4737_v63, %v4689_v2 }
 0x62c   : > { %5126 = vst.msk [vmem:[%s7505_s11 + $0x28] sm:$0xff] %vm5120_vm8, %v5109_v12  ;;  %v4935_v14 = vsel %vm4932_vm7, %v4934_v8, %v4930_v13  ;;  %6754 = vrcp.f32 %v7579_v11  ;;  %v4690_v23 = vpop.f32.mrf.mxu0  ;;  %vm4943_vm10 = vweird.f32 %v6753_v42  ;;  %v4961_v30 = vand.u32 2147483647, %v7579_v11 }
 0x62d   : > { %v5094_v6 = vmul.f32 %v7546_v27, %v4935_v14  ;;  %v4939_v20 = vsub.f32 1.0, %v4938_v18  ;;  %6756 = vpow2.f32 %v4802_v21  ;;  %v4762_v9 = vand.u32 2147483647, %v7590_v24  ;;  %vm4944_vm12 = vmor %vm4942_vm11, %vm4943_vm10 }
 0x62e   : > { %v4691_v27 = vadd.f32 %v7476_v52, %v4690_v23  ;;  %v4963_v45 = vand.u32 2147483648, %v7579_v11  ;;  %vm4957_vm0 = vweird.f32 %v7579_v11  ;;  %vm4962_vm2 = vcmp.eq.f32.partialorder %v4961_v30, 8.507059e+37 }
 0x62f   : > { %v5110_v25 = vsel %vm5078_vm9, %v4935_v14, %v5094_v6  ;;  %v4940_v60 = vmul.f32 %v6753_v42, %v4939_v20  ;;  %v4778_v62 = vsub.f32 0.0, %v4762_v9  ;;  %vm5081_vm9 = vcmp.ge.f32.partialorder %v7568_v17, 0.0 }
 0x630   : > { %5127 = vst.msk [vmem:[%s7505_s11 + $0x30] sm:$0xff] %vm5120_vm8, %v5110_v25  ;;  %v4964_v54 = vor.u32 1.1754944e-38, %v4963_v45 }
 0x631   : > { %v4941_v28 = vadd.f32 %v6753_v42, %v4940_v60  ;;  %v4804_v38 = vmul.f32 1.442695, %v4778_v62 }
 0x632   : > { %v6755_v58 = vpop.eup %6754  ;;  %v4739_v32 = vpop.f32.mrf.mxu1 }
 0x633   : > { %v4945_v16 = vsel %vm4944_vm12, %v6753_v42, %v4941_v28  ;;  %v4953_v48 = vmul.f32 %v6755_v58, %v7579_v11  ;;  %v7598_v35 = vadd.f32 %v4739_v32, %v4691_v27  ;;  %v7600_v47 = vpop.eup %6756  ;;  %6758 = vpow2.f32 %v4804_v38 }
 0x634   : > { %v4950_v36 = vsel %vm4947_vm13, %v4949_v34, %v4945_v16  ;;  %v4693_v55 = vpop.f32.mrf.mxu0  ;;  %v4825_v51 = vadd.f32 1.0, %v7600_v47  ;;  %vm4958_vm15 = vweird.f32 %v6755_v58 }
 0x635   : > { %v5095_v37 = vmul.f32 %v7558_v43, %v4950_v36  ;;  %v4954_v41 = vsub.f32 1.0, %v4953_v48  ;;  %v4763_v46 = vand.u32 2147483647, %v7598_v35  ;;  %v4694_v56 = vadd.f32 %v7476_v52, %v4693_v55  ;;  %vm4959_vm1 = vmor %vm4957_vm0, %vm4958_vm15 }
 0x636   : > { %6760 = vrcp.f32 %v4825_v51  ;;  %v4978_v8 = vand.u32 2147483648, %v4825_v51  ;;  %v4976_v15 = vand.u32 2147483647, %v4825_v51  ;;  %vm4972_vm5 = vweird.f32 %v4825_v51 }
 0x637   : > { %v5111_v40 = vsel %vm5079_vm14, %v4950_v36, %v5095_v37  ;;  %v4955_v53 = vmul.f32 %v6755_v58, %v4954_v41  ;;  %v4779_v10 = vsub.f32 0.0, %v4763_v46  ;;  %vm5082_vm15 = vcmp.ge.f32.partialorder %v7590_v24, 0.0 }
 0x638   : > { %5128 = vst.msk [vmem:[%s7505_s11 + $0x38] sm:$0xff] %vm5120_vm8, %v5111_v40  ;;  %v4979_v6 = vor.u32 1.1754944e-38, %v4978_v8  ;;  %vm4977_vm7 = vcmp.eq.f32.partialorder %v4976_v15, 8.507059e+37 }
 0x639   : > { %v4956_v19 = vadd.f32 %v6755_v58, %v4955_v53  ;;  %v4806_v43 = vmul.f32 1.442695, %v4779_v10  ;;  %v7614_v29 = vpop.eup %6758 }
 0x63a   : > { %v4742_v50 = vpop.f32.mrf.mxu1  ;;  %v4826_v1 = vadd.f32 1.0, %v7614_v29 }
 0x63b   : > { %v4960_v31 = vsel %vm4959_vm1, %v6755_v58, %v4956_v19  ;;  %6762 = vpow2.f32 %v4806_v43  ;;  %v7612_v59 = vadd.f32 %v4742_v50, %v4694_v56 }
 0x63c   : > { %v4965_v61 = vsel %vm4962_vm2, %v4964_v54, %v4960_v31  ;;  %v4695_v0 = vpop.f32.mrf.mxu0  ;;  %v6761_v4 = vpop.eup %6760  ;;  %6764 = vrcp.f32 %v4826_v1  ;;  %v4991_v9 = vand.u32 2147483647, %v4826_v1  ;;  %v4993_v28 = vand.u32 2147483648, %v4826_v1 }
 0x63d   : > { %v5096_v44 = vmul.f32 %v7573_v39, %v4965_v61  ;;  %v4764_v3 = vand.u32 2147483647, %v7612_v59  ;;  %v4968_v26 = vmul.f32 %v6761_v4, %v4825_v51  ;;  %v4696_v42 = vadd.f32 %v7476_v52, %v4695_v0 }
 0x63e   : > { %vm4973_vm4 = vweird.f32 %v6761_v4  ;;  %vm4987_vm11 = vweird.f32 %v4826_v1  ;;  %vm4992_vm13 = vcmp.eq.f32.partialorder %v4991_v9, 8.507059e+37  ;;  %v4994_v17 = vor.u32 1.1754944e-38, %v4993_v28 }
 0x63f   : > { %v5112_v5 = vsel %vm5080_vm3, %v4965_v61, %v5096_v44  ;;  %v4780_v57 = vsub.f32 0.0, %v4764_v3  ;;  %v4969_v49 = vsub.f32 1.0, %v4968_v26  ;;  %vm4974_vm6 = vmor %vm4972_vm5, %vm4973_vm4  ;;  %vm5083_vm3 = vcmp.ge.f32.partialorder %v7598_v35, 0.0 }
 0x640   : > { %5129 = vst.msk [vmem:[%s7505_s11 + $0x40] sm:$0xff] %vm5120_vm8, %v5112_v5 }
 0x641   : > { %v7622_v7 = vpop.eup %6762  ;;  %v4808_v11 = vmul.f32 1.442695, %v4780_v57  ;;  %v4970_v12 = vmul.f32 %v6761_v4, %v4969_v49 }
 0x642   : > { %v7626_v39 = vadd.f32 1.0, %v7622_v7  ;;  %v4744_v63 = vpop.f32.mrf.mxu1  ;;  %v6765_v14 = vpop.eup %6764 }
 0x643   : > { %v7628_v13 = vadd.f32 %v4744_v63, %v4696_v42  ;;  %v4971_v2 = vadd.f32 %v6761_v4, %v4970_v12  ;;  %v4983_v20 = vmul.f32 %v6765_v14, %v4826_v1  ;;  %vm4988_vm10 = vweird.f32 %v6765_v14 }
 0x644   : > { %6766 = vrcp.f32 %v7626_v39  ;;  %v4698_v18 = vpop.f32.mrf.mxu0  ;;  %vm4989_vm12 = vmor %vm4987_vm11, %vm4988_vm10  ;;  %v5006_v46 = vand.u32 2147483647, %v7626_v39  ;;  %v5008_v30 = vand.u32 2147483648, %v7626_v39  ;;  %vm5002_vm0 = vweird.f32 %v7626_v39 }
 0x645   : > { %6768 = vpow2.f32 %v4808_v11  ;;  %v4765_v23 = vand.u32 2147483647, %v7628_v13  ;;  %v4975_v21 = vsel %vm4974_vm6, %v6761_v4, %v4971_v2  ;;  %v4984_v25 = vsub.f32 1.0, %v4983_v20 }
 0x646   : > { %v4980_v33 = vsel %vm4977_vm7, %v4979_v6, %v4975_v21  ;;  %v4699_v62 = vadd.f32 %v7476_v52, %v4698_v18  ;;  %v5009_v31 = vor.u32 1.1754944e-38, %v5008_v30  ;;  %vm5007_vm2 = vcmp.eq.f32.partialorder %v5006_v46, 8.507059e+37 }
 0x647   : > { %v4781_v22 = vsub.f32 0.0, %v4765_v23  ;;  %v5097_v60 = vmul.f32 %v7600_v47, %v4980_v33  ;;  %v4985_v34 = vmul.f32 %v6765_v14, %v4984_v25  ;;  %vm5084_vm10 = vcmp.ge.f32.partialorder %v7612_v59, 0.0 }
 0x649   : > { %v4810_v27 = vmul.f32 1.442695, %v4781_v22  ;;  %v5113_v48 = vsel %vm5081_vm9, %v4980_v33, %v5097_v60  ;;  %v4986_v38 = vadd.f32 %v6765_v14, %v4985_v34 }
 0x64a   : > { %v6767_v58 = vpop.eup %6766  ;;  %v4747_v32 = vpop.f32.mrf.mxu1  ;;  %5130 = vst.msk [vmem:[%s7505_s11 + $0x48] sm:$0xff] %vm5120_vm8, %v5113_v48 }
 0x64b   : > { %v7635_v16 = vpop.eup %6768  ;;  %v4998_v36 = vmul.f32 %v6767_v58, %v7626_v39  ;;  %6770 = vpow2.f32 %v4810_v27  ;;  %v7641_v47 = vadd.f32 %v4747_v32, %v4699_v62  ;;  %v4990_v41 = vsel %vm4989_vm12, %v6765_v14, %v4986_v38 }
 0x64c   : > { %v4828_v55 = vadd.f32 1.0, %v7635_v16  ;;  %v4700_v45 = vpop.f32.mrf.mxu0  ;;  %v4995_v51 = vsel %vm4992_vm13, %v4994_v17, %v4990_v41  ;;  %vm5003_vm14 = vweird.f32 %v6767_v58 }
 0x64d   : > { %v4999_v37 = vsub.f32 1.0, %v4998_v36  ;;  %v4766_v53 = vand.u32 2147483647, %v7641_v47  ;;  %v5098_v10 = vmul.f32 %v7614_v29, %v4995_v51  ;;  %v4701_v54 = vadd.f32 %v7476_v52, %v4700_v45  ;;  %vm5004_vm1 = vmor %vm5002_vm0, %vm5003_vm14 }
 0x64e   : > { %6772 = vrcp.f32 %v4828_v55  ;;  %v5023_v49 = vand.u32 2147483648, %v4828_v55  ;;  %v5021_v39 = vand.u32 2147483647, %v4828_v55  ;;  %vm5017_vm5 = vweird.f32 %v4828_v55 }
 0x64f   : > { %v5000_v40 = vmul.f32 %v6767_v58, %v4999_v37  ;;  %v4782_v56 = vsub.f32 0.0, %v4766_v53  ;;  %v5114_v50 = vsel %vm5082_vm15, %v4995_v51, %v5098_v10  ;;  %vm5085_vm14 = vcmp.ge.f32.partialorder %v7628_v13, 0.0 }
 0x650   : > { %5131 = vst.msk [vmem:[%s7505_s11 + $0x50] sm:$0xff] %vm5120_vm8, %v5114_v50  ;;  %v5024_v35 = vor.u32 1.1754944e-38, %v5023_v49  ;;  %vm5022_vm7 = vcmp.eq.f32.partialorder %v5021_v39, 8.507059e+37 }
 0x651   : > { %v7648_v19 = vpop.eup %6770  ;;  %v5001_v43 = vadd.f32 %v6767_v58, %v5000_v40  ;;  %v4812_v29 = vmul.f32 1.442695, %v4782_v56 }
 0x652   : > { %v4829_v61 = vadd.f32 1.0, %v7648_v19  ;;  %v4749_v0 = vpop.f32.mrf.mxu1 }
 0x653   : > { %v5005_v24 = vsel %vm5004_vm1, %v6767_v58, %v5001_v43  ;;  %v7655_v44 = vadd.f32 %v4749_v0, %v4701_v54 }
 0x654   : > { %v6773_v1 = vpop.eup %6772  ;;  %v5010_v3 = vsel %vm5007_vm2, %v5009_v31, %v5005_v24  ;;  %6774 = vrcp.f32 %v4829_v61  ;;  %v5036_v6 = vand.u32 2147483647, %v4829_v61  ;;  %v5038_v20 = vand.u32 2147483648, %v4829_v61 }
 0x655   : > { %v5099_v4 = vmul.f32 %v7622_v7, %v5010_v3  ;;  %v5013_v52 = vmul.f32 %v6773_v1, %v4828_v55  ;;  %6776 = vpow2.f32 %v4812_v29  ;;  %v4767_v5 = vand.u32 2147483647, %v7655_v44 }
 0x656   : > { %vm5018_vm4 = vweird.f32 %v6773_v1  ;;  %vm5032_vm11 = vweird.f32 %v4829_v61  ;;  %v5039_v9 = vor.u32 1.1754944e-38, %v5038_v20  ;;  %vm5037_vm13 = vcmp.eq.f32.partialorder %v5036_v6, 8.507059e+37 }
 0x657   : > { %v5115_v26 = vsel %vm5083_vm3, %v5010_v3, %v5099_v4  ;;  %v5014_v57 = vsub.f32 1.0, %v5013_v52  ;;  %v4783_v42 = vsub.f32 0.0, %v4767_v5  ;;  %vm5019_vm6 = vmor %vm5017_vm5, %vm5018_vm4  ;;  %vm5086_vm4 = vcmp.ge.f32.partialorder %v7641_v47, 0.0 }
 0x658   : > { %5132 = vst.msk [vmem:[%s7505_s11 + $0x58] sm:$0xff] %vm5120_vm8, %v5115_v26 }
 0x659   : > { %v5015_v8 = vmul.f32 %v6773_v1, %v5014_v57  ;;  %v4814_v63 = vmul.f32 1.442695, %v4783_v42 }
 0x65a   : > { %v6775_v11 = vpop.eup %6774 }
 0x65b   : > { %v5016_v12 = vadd.f32 %v6773_v1, %v5015_v8  ;;  %v5028_v7 = vmul.f32 %v6775_v11, %v4829_v61  ;;  %v6777_v15 = vpop.eup %6776  ;;  %6778 = vpow2.f32 %v4814_v63  ;;  %vm5033_vm9 = vweird.f32 %v6775_v11 }
 0x65c   : > { %v4830_v2 = vadd.f32 1.0, %v6777_v15  ;;  %vm5034_vm12 = vmor %vm5032_vm11, %vm5033_vm9  ;;  %vm5087_vm9 = vcmp.ge.f32.partialorder %v7655_v44, 0.0 }
 0x65d   : > { %v5020_v18 = vsel %vm5019_vm6, %v6773_v1, %v5016_v12  ;;  %v5029_v14 = vsub.f32 1.0, %v5028_v7 }
 0x65e   : > { %v5025_v23 = vsel %vm5022_vm7, %v5024_v35, %v5020_v18  ;;  %6780 = vrcp.f32 %v4830_v2  ;;  %v5053_v48 = vand.u32 2147483648, %v4830_v2  ;;  %v5051_v38 = vand.u32 2147483647, %v4830_v2 }
 0x65f   : > { %v5100_v21 = vmul.f32 %v7635_v16, %v5025_v23  ;;  %v5030_v22 = vmul.f32 %v6775_v11, %v5029_v14  ;;  %vm5047_vm0 = vweird.f32 %v4830_v2 }
 0x660   : > { %v5054_v41 = vor.u32 1.1754944e-38, %v5053_v48  ;;  %vm5052_vm2 = vcmp.eq.f32.partialorder %v5051_v38, 8.507059e+37 }
 0x661   : > { %v5116_v33 = vsel %vm5084_vm10, %v5025_v23, %v5100_v21  ;;  %v5031_v25 = vadd.f32 %v6775_v11, %v5030_v22  ;;  %v6779_v60 = vpop.eup %6778 }
 0x662   : > { %5133 = vst.msk [vmem:[%s7505_s11 + $0x60] sm:$0xff] %vm5120_vm8, %v5116_v33  ;;  %v4831_v27 = vadd.f32 1.0, %v6779_v60 }
 0x663   : > { %v5035_v28 = vsel %vm5034_vm12, %v6775_v11, %v5031_v25 }
 0x664   : > { %v5040_v58 = vsel %vm5037_vm13, %v5039_v9, %v5035_v28  ;;  %v6781_v34 = vpop.eup %6780  ;;  %6782 = vrcp.f32 %v4831_v27  ;;  %v5068_v45 = vand.u32 2147483648, %v4831_v27  ;;  %v5066_v53 = vand.u32 2147483647, %v4831_v27 }
 0x665   : > { %v5101_v62 = vmul.f32 %v7648_v19, %v5040_v58  ;;  %v5043_v59 = vmul.f32 %v6781_v34, %v4830_v2  ;;  %vm5048_vm15 = vweird.f32 %v6781_v34  ;;  %vm5062_vm5 = vweird.f32 %v4831_v27 }
 0x666   : > { %vm5049_vm1 = vmor %vm5047_vm0, %vm5048_vm15  ;;  %v5069_v43 = vor.u32 1.1754944e-38, %v5068_v45  ;;  %vm5067_vm7 = vcmp.eq.f32.partialorder %v5066_v53, 8.507059e+37 }
 0x667   : > { %v5117_v32 = vsel %vm5085_vm14, %v5040_v58, %v5101_v62  ;;  %v5044_v16 = vsub.f32 1.0, %v5043_v59 }
 0x668   : > { %5134 = vst.msk [vmem:[%s7505_s11 + $0x68] sm:$0xff] %vm5120_vm8, %v5117_v32 }
 0x669   : > { %v5045_v36 = vmul.f32 %v6781_v34, %v5044_v16 }
 0x66a   : > { %v6783_v55 = vpop.eup %6782 }
 0x66b   : > { %v5046_v17 = vadd.f32 %v6781_v34, %v5045_v36  ;;  %v5058_v37 = vmul.f32 %v6783_v55, %v4831_v27  ;;  %vm5063_vm3 = vweird.f32 %v6783_v55 }
 0x66c   : > { %vm5064_vm6 = vmor %vm5062_vm5, %vm5063_vm3 }
 0x66d   : > { %v5050_v46 = vsel %vm5049_vm1, %v6781_v34, %v5046_v17  ;;  %v5059_v30 = vsub.f32 1.0, %v5058_v37 }
 0x66e   : > { %v5055_v13 = vsel %vm5052_vm2, %v5054_v41, %v5050_v46 }
 0x66f   : > { %v5102_v51 = vmul.f32 %v6777_v15, %v5055_v13  ;;  %v5060_v40 = vmul.f32 %v6783_v55, %v5059_v30 }
 0x671   : > { %v5118_v10 = vsel %vm5086_vm4, %v5055_v13, %v5102_v51  ;;  %v5061_v19 = vadd.f32 %v6783_v55, %v5060_v40 }
 0x672   : > { %5135 = vst.msk [vmem:[%s7505_s11 + $0x70] sm:$0xff] %vm5120_vm8, %v5118_v10 }
 0x673   : > { %v5065_v56 = vsel %vm5064_vm6, %v6783_v55, %v5061_v19 }
 0x674   : > { %v5070_v54 = vsel %vm5067_vm7, %v5069_v43, %v5065_v56 }
 0x675   : > { %v5103_v50 = vmul.f32 %v6779_v60, %v5070_v54 }
 0x677   : > { %v5119_v31 = vsel %vm5087_vm9, %v5070_v54, %v5103_v50 }
 0x678   : > { %5136 = vst.msk [vmem:[%s7505_s11 + $0x78] sm:$0xff] %vm5120_vm8, %v5119_v31 }
 0x679 PF: > { %s21_s13 = sadd.s32 1, %s6825_s13  }
 0x67a   : > { %p18_p11 = scmp.ge.s32.totalorder %s21_s13, 4  }
 0x67c   :  { %20 = sbr.rel (!%p18_p11) target bundleno = 1 (0x1), region = 116 }
 0x681   :  { %5159 = vsyncpa [#allocation3], 1 }
 0x682   :  { %5161 = vsyncpa [#allocation3 + $0x1], 1 }

</bundles_post_ra>
